<compile_context>
chip_gen: v6e
topology: v6e:2x2x1
jax: 0.10.0
libtpu: 0.0.40
codegen_flags: <defaults>
</compile_context>

<pallas_src>
import math
from functools import partial

import jax
import jax.numpy as jnp
from jax import lax
from jax.experimental import pallas as pl
from jax.experimental.pallas import tpu as pltpu


def _round_up(x, m):
    return ((x + m - 1) // m) * m


def asdb_flash_kernel(q_ref, kv_ref, wt_ref, b_ref, o_ref,
                      m_sc, l_sc, acc_sc,
                      *, scale, s_valid, tk, mask_tail):
    # q_ref  : (1, tq, Ep)  query tile for (batch b, q-tile i)
    # kv_ref : (1, tk, Ep)  key/value tile for kv step k
    # wt_ref : (Ep, Ep)     Linear weight, already (in, out); grid-invariant
    # b_ref  : (1, Ep)      Linear bias; grid-invariant
    # o_ref  : (1, tq, Ep)  output tile (written on the last kv step)
    # m_sc / l_sc / acc_sc : (tq,1)/(tq,1)/(tq,Ep) f32 online-softmax state
    k_idx = pl.program_id(2)

    @pl.when(k_idx == 0)
    def _():
        m_sc[...] = jnp.full_like(m_sc, -jnp.inf)
        l_sc[...] = jnp.zeros_like(l_sc)
        acc_sc[...] = jnp.zeros_like(acc_sc)

    q = q_ref[0] * scale            # fold 1/sqrt(E) into Q (tq*Ep, not tq*tk)
    kv = kv_ref[0]                  # (tk, Ep)

    # scores = Q @ K^T : contract last axis of both -> no XLU transpose of K.
    s = lax.dot_general(q, kv, (((1,), (1,)), ((), ())),
                        preferred_element_type=jnp.float32)   # (tq, tk) f32

    if mask_tail:
        # Padded key columns (global index >= true S) must not contribute.
        col = lax.broadcasted_iota(jnp.int32, s.shape, 1) + k_idx * tk
        s = jnp.where(col < s_valid, s, -1e30)

    # Online (flash) softmax update. Normalization is deferred to after the
    # PV matmul (softmax is scale-invariant on its numerator).
    m_prev = m_sc[...]
    m_new = jnp.maximum(m_prev, jnp.max(s, axis=-1, keepdims=True))
    alpha = jnp.exp(m_prev - m_new)
    p = jnp.exp(s - m_new)
    l_sc[...] = alpha * l_sc[...] + jnp.sum(p, axis=-1, keepdims=True)
    acc_sc[...] = alpha * acc_sc[...] + jnp.dot(
        p.astype(kv.dtype), kv, preferred_element_type=jnp.float32)
    m_sc[...] = m_new

    # attn_dropout: identity in eval mode.

    @pl.when(k_idx == pl.num_programs(2) - 1)
    def _():
        # Deferred normalization: (tq, Ep) multiply; reciprocal on the EUP.
        ctx = acc_sc[...] * pl.reciprocal(l_sc[...], approx=True)
        # Linear: ctx @ W_t + b   (W_t is (in, out): no transpose here).
        out = jnp.dot(ctx.astype(wt_ref.dtype), wt_ref[...],
                      preferred_element_type=jnp.float32)
        out = out + b_ref[...]
        # proj_dropout: identity in eval mode.
        o_ref[0] = out.astype(o_ref.dtype)


def asdb_block(hidden_states1, hidden_states2, w_t, bias):
    """ASDBBlcok forward.

    hidden_states1/2: (B, S, E); w_t: (E, E) Linear weight pre-transposed to
    (in, out) layout — do this ONCE at model-load time, not per call; bias: (E,).
    Caller may feed bf16 activations/weights for the MXU fast path; all matmuls
    accumulate in f32.
    """
    B, S, E = hidden_states1.shape
    dtype = hidden_states1.dtype

    # Pad seq and embed dims to lane/sublane-friendly multiples of 128 so every
    # block is (8,128)-aligned and output stores are lane-dense. Padded key
    # columns are masked inside the kernel; padded E columns are zero and
    # contribute nothing to any matmul. Padded query rows are sliced off.
    tq = 128
    tk = 128
    S_pad = _round_up(max(S, tq), tq)
    E_pad = _round_up(max(E, 128), 128)
    num_q_tiles = S_pad // tq
    num_kv_tiles = S_pad // tk

    hs1 = jnp.pad(hidden_states1, ((0, 0), (0, S_pad - S), (0, E_pad - E)))
    hs2 = jnp.pad(hidden_states2, ((0, 0), (0, S_pad - S), (0, E_pad - E)))
    w_t_p = jnp.pad(w_t, ((0, E_pad - E), (0, E_pad - E)))
    bias_p = jnp.pad(bias, (0, E_pad - E)).reshape(1, E_pad)

    # VMEM planning (flash tiling keeps this bounded regardless of S):
    #   q / out double-buffered, kv double-buffered, weight + bias
    #   single-buffered, plus the f32 online-softmax scratch and scores tile.
    # TODO(synk): for very large embed dims (E_pad >= ~2048 in f32) the resident
    # (E_pad, E_pad) weight must be K/N-tiled instead of held whole in VMEM.
    elt = dtype.itemsize
    vmem_est = (
        2 * tq * E_pad * elt              # q (double-buffered)
        + 2 * tk * E_pad * elt            # kv (double-buffered)
        + 2 * tq * E_pad * elt            # out (double-buffered)
        + (E_pad * E_pad + E_pad) * elt   # weight + bias (single-buffered)
        + tq * (E_pad + 2) * 4            # f32 acc / m / l scratch
        + tq * tk * 4                     # f32 scores tile
    )
    # Keep below v7x's 64 MiB per-TC VMEM; on v5e/v6e (128 MiB) this could be
    # raised, but flash tiling keeps the footprint small anyway.
    vmem_limit = int(min(max(2 * vmem_est, 32 * 1024 * 1024), 60 * 1024 * 1024))

    # Megacore sharding: when B >= 2 split batches across cores so each core
    # DMAs disjoint KV; otherwise let the q-tile axis be the parallel one.
    if B >= 2:
        dims = ("parallel", "arbitrary", "arbitrary")
    else:
        dims = ("parallel", "parallel", "arbitrary")

    kernel = partial(asdb_flash_kernel,
                     scale=1.0 / math.sqrt(E),
                     s_valid=S, tk=tk, mask_tail=(S_pad != S))

    def _call(single_buffer_invariants):
        inv_kwargs = (
            {"pipeline_mode": pl.Buffered(1)}
            if (single_buffer_invariants and hasattr(pl, "Buffered"))
            else {}
        )
        return pl.pallas_call(
            kernel,
            out_shape=jax.ShapeDtypeStruct((B, S_pad, E_pad), dtype),
            grid=(B, num_q_tiles, num_kv_tiles),
            in_specs=[
                pl.BlockSpec((1, tq, E_pad), lambda b, i, k: (b, i, 0)),   # Q
                pl.BlockSpec((1, tk, E_pad), lambda b, i, k: (b, k, 0)),   # K/V
                pl.BlockSpec((E_pad, E_pad), lambda b, i, k: (0, 0),
                             **inv_kwargs),                                # W^T
                pl.BlockSpec((1, E_pad), lambda b, i, k: (0, 0),
                             **inv_kwargs),                                # bias
            ],
            out_specs=pl.BlockSpec((1, tq, E_pad), lambda b, i, k: (b, i, 0)),
            scratch_shapes=[
                pltpu.VMEM((tq, 1), jnp.float32),       # running max m
                pltpu.VMEM((tq, 1), jnp.float32),       # running denom l
                pltpu.VMEM((tq, E_pad), jnp.float32),   # running PV accumulator
            ],
            compiler_params=pltpu.CompilerParams(
                dimension_semantics=dims,
                vmem_limit_bytes=vmem_limit,
            ),
        )(hs1, hs2, w_t_p, bias_p)

    try:
        out_p = _call(True)
    except Exception:
        # Fallback if Buffered(1) single-buffering is unsupported in this build.
        out_p = _call(False)

    return out_p[:, :S, :E]


if __name__ == "__main__":
    B, S, E = 2, 8, 32  # batch, seq, embed_dim (small test shapes)

    key = jax.random.PRNGKey(0)
    k1, k2, kw, kb = jax.random.split(key, 4)

    hidden_states1 = jax.random.normal(k1, (B, S, E), dtype=jnp.float32)
    hidden_states2 = jax.random.normal(k2, (B, S, E), dtype=jnp.float32)

    # Deterministic init of nn.Linear(embed_dim, embed_dim) params
    # (uniform(-1/sqrt(E), 1/sqrt(E)) like the PyTorch default).
    bound = 1.0 / math.sqrt(E)
    weight = jax.random.uniform(kw, (E, E), minval=-bound, maxval=bound,
                                dtype=jnp.float32)
    bias = jax.random.uniform(kb, (E,), minval=-bound, maxval=bound,
                              dtype=jnp.float32)

    # One-time layout conversion (would live at model-load time in real use):
    w_t = weight.T   # (in, out)

    out = asdb_block(hidden_states1, hidden_states2, w_t, bias)
    out = jax.block_until_ready(out)

    # Pure-JAX reference (eval-mode dropout == identity).
    scores = jnp.einsum("bqe,bke->bqk", hidden_states1, hidden_states2) / math.sqrt(E)
    probs = jax.nn.softmax(scores, axis=-1)
    ctx = jnp.einsum("bqk,bke->bqe", probs, hidden_states2)
    ref = ctx @ weight.T + bias

    # Tolerance accounts for the EUP approximate reciprocal in the softmax.
    max_err = float(jnp.max(jnp.abs(out - ref)))
    assert jnp.allclose(out, ref, atol=1e-2, rtol=1e-2), max_err

    print("KERNEL_OK")
</pallas_src>

<mosaic_0001>
module attributes {stable_mosaic.version = 11 : i64} {
  func.func @asdb_flash_kernel(%arg0: i32, %arg1: i32, %arg2: i32, %arg3: memref<1x128x128xf32, #tpu.memory_space<vmem>>, %arg4: memref<1x128x128xf32, #tpu.memory_space<vmem>>, %arg5: memref<128x128xf32, #tpu.memory_space<vmem>>, %arg6: memref<1x128xf32, #tpu.memory_space<vmem>>, %arg7: memref<1x128x128xf32, #tpu.memory_space<vmem>>, %arg8: memref<128x1xf32, #tpu.memory_space<vmem>>, %arg9: memref<128x1xf32, #tpu.memory_space<vmem>>, %arg10: memref<128x128xf32, #tpu.memory_space<vmem>>) attributes {dimension_semantics = [#tpu.dimension_semantics<parallel>, #tpu.dimension_semantics<arbitrary>, #tpu.dimension_semantics<arbitrary>], iteration_bounds = array<i64: 2, 1, 1>, scalar_prefetch = 0 : i64, scratch_operands = 3 : i64, tpu.core_type = #tpu.core_type<tc>, window_params = [{transform_indices = @transform_0, window_bounds = array<i64: 1, 128, 128>}, {transform_indices = @transform_1, window_bounds = array<i64: 1, 128, 128>}, {pipeline_mode = #tpu.pipeline_mode<synchronous>, transform_indices = @transform_2, window_bounds = array<i64: 128, 128>}, {pipeline_mode = #tpu.pipeline_mode<synchronous>, transform_indices = @transform_3, window_bounds = array<i64: 1, 128>}, {transform_indices = @transform_4, window_bounds = array<i64: 1, 128, 128>}]} {
    %c0_i32 = arith.constant 0 : i32
    %0 = arith.cmpi eq, %arg2, %c0_i32 : i32
    %1 = arith.extui %0 : i1 to i32
    %c0_i32_0 = arith.constant 0 : i32
    %2 = arith.cmpi ne, %1, %c0_i32_0 : i32
    scf.if %2 {
      %cst_25 = arith.constant 0xFF800000 : f32
      %43 = vector.broadcast %cst_25 : f32 to vector<128x1xf32>
      %c0_26 = arith.constant 0 : index
      %c0_27 = arith.constant 0 : index
      %44 = vector.load %arg8[%c0_26, %c0_27] : memref<128x1xf32, #tpu.memory_space<vmem>>, vector<128x1xf32>
      tpu.vector_store %arg8[%c0_26, %c0_27], %43 {strides = array<i32>} : memref<128x1xf32, #tpu.memory_space<vmem>>, vector<128x1xf32>,
      %cst_28 = arith.constant 0.000000e+00 : f32
      %45 = vector.broadcast %cst_28 : f32 to vector<128x1xf32>
      %c0_29 = arith.constant 0 : index
      %c0_30 = arith.constant 0 : index
      %46 = vector.load %arg9[%c0_29, %c0_30] : memref<128x1xf32, #tpu.memory_space<vmem>>, vector<128x1xf32>
      tpu.vector_store %arg9[%c0_29, %c0_30], %45 {strides = array<i32>} : memref<128x1xf32, #tpu.memory_space<vmem>>, vector<128x1xf32>,
      %cst_31 = arith.constant 0.000000e+00 : f32
      %47 = vector.broadcast %cst_31 : f32 to vector<128x128xf32>
      %c0_32 = arith.constant 0 : index
      %c0_33 = arith.constant 0 : index
      %48 = vector.load %arg10[%c0_32, %c0_33] : memref<128x128xf32, #tpu.memory_space<vmem>>, vector<128x128xf32>
      tpu.vector_store %arg10[%c0_32, %c0_33], %47 {strides = array<i32>} : memref<128x128xf32, #tpu.memory_space<vmem>>, vector<128x128xf32>,
    } else {
    }
    %c0 = arith.constant 0 : index
    %c0_1 = arith.constant 0 : index
    %c0_2 = arith.constant 0 : index
    %3 = vector.load %arg3[%c0, %c0_1, %c0_2] : memref<1x128x128xf32, #tpu.memory_space<vmem>>, vector<1x128x128xf32>
    %4 = vector.shape_cast %3 : vector<1x128x128xf32> to vector<128x128xf32>
    %cst = arith.constant 0.176776692 : f32
    %5 = vector.broadcast %cst : f32 to vector<128x128xf32>
    %6 = arith.mulf %4, %5 : vector<128x128xf32>
    %c0_3 = arith.constant 0 : index
    %c0_4 = arith.constant 0 : index
    %c0_5 = arith.constant 0 : index
    %7 = vector.load %arg4[%c0_3, %c0_4, %c0_5] : memref<1x128x128xf32, #tpu.memory_space<vmem>>, vector<1x128x128xf32>
    %8 = vector.shape_cast %7 : vector<1x128x128xf32> to vector<128x128xf32>
    %cst_6 = arith.constant dense<0.000000e+00> : vector<128x128xf32>
    %9 = tpu.matmul %6, %8, %cst_6 {dimension_numbers = #tpu.dot_dimension_numbers<[1], [1], [0], [0], [0, 0, 1, 0], [], []>} : vector<128x128xf32>, vector<128x128xf32>, vector<128x128xf32> -> vector<128x128xf32>
    %10 = tpu.iota {dimensions = array<i32: 1>} : vector<128x128xi32>
    %c128_i32 = arith.constant 128 : i32
    %11 = arith.muli %arg2, %c128_i32 : i32
    %12 = vector.broadcast %11 : i32 to vector<128x128xi32>
    %13 = arith.addi %10, %12 : vector<128x128xi32>
    %c8_i32 = arith.constant 8 : i32
    %14 = vector.broadcast %c8_i32 : i32 to vector<128x128xi32>
    %15 = arith.cmpi slt, %13, %14 : vector<128x128xi32>
    %cst_7 = arith.constant -1.000000e+30 : f32
    %16 = vector.broadcast %cst_7 : f32 to vector<128x128xf32>
    %17 = arith.select %15, %9, %16 : vector<128x128xi1>, vector<128x128xf32>
    %c0_8 = arith.constant 0 : index
    %c0_9 = arith.constant 0 : index
    %18 = vector.load %arg8[%c0_8, %c0_9] : memref<128x1xf32, #tpu.memory_space<vmem>>, vector<128x1xf32>
    %cst_10 = arith.constant dense<0xFF800000> : vector<128xf32>
    %19 = vector.multi_reduction <maximumf>, %17, %cst_10 [1] : vector<128x128xf32> to vector<128xf32>
    %20 = vector.shape_cast %19 : vector<128xf32> to vector<128x1xf32>
    %21 = arith.maximumf %18, %20 : vector<128x1xf32>
    %22 = arith.subf %18, %21 : vector<128x1xf32>
    %23 = math.exp %22 : vector<128x1xf32>
    %24 = vector.broadcast %21 : vector<128x1xf32> to vector<128x128xf32>
    %25 = arith.subf %17, %24 : vector<128x128xf32>
    %26 = math.exp %25 : vector<128x128xf32>
    %c0_11 = arith.constant 0 : index
    %c0_12 = arith.constant 0 : index
    %27 = vector.load %arg9[%c0_11, %c0_12] : memref<128x1xf32, #tpu.memory_space<vmem>>, vector<128x1xf32>
    %28 = arith.mulf %23, %27 : vector<128x1xf32>
    %cst_13 = arith.constant dense<0.000000e+00> : vector<128xf32>
    %29 = vector.multi_reduction <add>, %26, %cst_13 [1] : vector<128x128xf32> to vector<128xf32>
    %30 = vector.shape_cast %29 : vector<128xf32> to vector<128x1xf32>
    %31 = arith.addf %28, %30 : vector<128x1xf32>
    %c0_14 = arith.constant 0 : index
    %c0_15 = arith.constant 0 : index
    %32 = vector.load %arg9[%c0_14, %c0_15] : memref<128x1xf32, #tpu.memory_space<vmem>>, vector<128x1xf32>
    tpu.vector_store %arg9[%c0_14, %c0_15], %31 {strides = array<i32>} : memref<128x1xf32, #tpu.memory_space<vmem>>, vector<128x1xf32>,
    %c0_16 = arith.constant 0 : index
    %c0_17 = arith.constant 0 : index
    %33 = vector.load %arg10[%c0_16, %c0_17] : memref<128x128xf32, #tpu.memory_space<vmem>>, vector<128x128xf32>
    %34 = vector.broadcast %23 : vector<128x1xf32> to vector<128x128xf32>
    %35 = arith.mulf %34, %33 : vector<128x128xf32>
    %cst_18 = arith.constant dense<0.000000e+00> : vector<128x128xf32>
    %36 = tpu.matmul %26, %8, %cst_18 {dimension_numbers = #tpu.dot_dimension_numbers<[1], [0], [0], [1], [0, 0, 1, 1], [], []>} : vector<128x128xf32>, vector<128x128xf32>, vector<128x128xf32> -> vector<128x128xf32>
    %37 = arith.addf %35, %36 : vector<128x128xf32>
    %c0_19 = arith.constant 0 : index
    %c0_20 = arith.constant 0 : index
    %38 = vector.load %arg10[%c0_19, %c0_20] : memref<128x128xf32, #tpu.memory_space<vmem>>, vector<128x128xf32>
    tpu.vector_store %arg10[%c0_19, %c0_20], %37 {strides = array<i32>} : memref<128x128xf32, #tpu.memory_space<vmem>>, vector<128x128xf32>,
    %c0_21 = arith.constant 0 : index
    %c0_22 = arith.constant 0 : index
    %39 = vector.load %arg8[%c0_21, %c0_22] : memref<128x1xf32, #tpu.memory_space<vmem>>, vector<128x1xf32>
    tpu.vector_store %arg8[%c0_21, %c0_22], %21 {strides = array<i32>} : memref<128x1xf32, #tpu.memory_space<vmem>>, vector<128x1xf32>,
    %c0_i32_23 = arith.constant 0 : i32
    %40 = arith.cmpi eq, %arg2, %c0_i32_23 : i32
    %41 = arith.extui %40 : i1 to i32
    %c0_i32_24 = arith.constant 0 : i32
    %42 = arith.cmpi ne, %41, %c0_i32_24 : i32
    scf.if %42 {
      %c0_25 = arith.constant 0 : index
      %c0_26 = arith.constant 0 : index
      %43 = vector.load %arg10[%c0_25, %c0_26] : memref<128x128xf32, #tpu.memory_space<vmem>>, vector<128x128xf32>
      %c0_27 = arith.constant 0 : index
      %c0_28 = arith.constant 0 : index
      %44 = vector.load %arg9[%c0_27, %c0_28] : memref<128x1xf32, #tpu.memory_space<vmem>>, vector<128x1xf32>
      %45 = tpu.reciprocal %44 {approx = true} : vector<128x1xf32> -> vector<128x1xf32>
      %46 = vector.broadcast %45 : vector<128x1xf32> to vector<128x128xf32>
      %47 = arith.mulf %43, %46 : vector<128x128xf32>
      %c0_29 = arith.constant 0 : index
      %c0_30 = arith.constant 0 : index
      %48 = vector.load %arg5[%c0_29, %c0_30] : memref<128x128xf32, #tpu.memory_space<vmem>>, vector<128x128xf32>
      %cst_31 = arith.constant dense<0.000000e+00> : vector<128x128xf32>
      %49 = tpu.matmul %47, %48, %cst_31 {dimension_numbers = #tpu.dot_dimension_numbers<[1], [0], [0], [1], [0, 0, 1, 1], [], []>} : vector<128x128xf32>, vector<128x128xf32>, vector<128x128xf32> -> vector<128x128xf32>
      %c0_32 = arith.constant 0 : index
      %c0_33 = arith.constant 0 : index
      %50 = vector.load %arg6[%c0_32, %c0_33] : memref<1x128xf32, #tpu.memory_space<vmem>>, vector<1x128xf32>
      %51 = vector.broadcast %50 : vector<1x128xf32> to vector<128x128xf32>
      %52 = arith.addf %49, %51 : vector<128x128xf32>
      %c0_34 = arith.constant 0 : index
      %c0_35 = arith.constant 0 : index
      %c0_36 = arith.constant 0 : index
      %53 = vector.load %arg7[%c0_34, %c0_35, %c0_36] : memref<1x128x128xf32, #tpu.memory_space<vmem>>, vector<1x128x128xf32>
      %54 = vector.shape_cast %53 : vector<1x128x128xf32> to vector<128x128xf32>
      %55 = vector.shape_cast %52 : vector<128x128xf32> to vector<1x128x128xf32>
      tpu.vector_store %arg7[%c0_34, %c0_35, %c0_36], %55 {strides = array<i32>} : memref<1x128x128xf32, #tpu.memory_space<vmem>>, vector<1x128x128xf32>,
    } else {
    }
    return
  }
  func.func @transform_0(%arg0: i32, %arg1: i32, %arg2: i32) -> (i32, i32, i32) {
    %c0_i32 = arith.constant 0 : i32
    %c0_i32_0 = arith.constant 0 : i32
    return %arg0, %arg1, %c0_i32 : i32, i32, i32
  }
  func.func @transform_1(%arg0: i32, %arg1: i32, %arg2: i32) -> (i32, i32, i32) {
    %c0_i32 = arith.constant 0 : i32
    %c0_i32_0 = arith.constant 0 : i32
    return %arg0, %arg2, %c0_i32 : i32, i32, i32
  }
  func.func @transform_2(%arg0: i32, %arg1: i32, %arg2: i32) -> (i32, i32) {
    %c0_i32 = arith.constant 0 : i32
    %c0_i32_0 = arith.constant 0 : i32
    %c0_i32_1 = arith.constant 0 : i32
    return %c0_i32, %c0_i32_0 : i32, i32
  }
  func.func @transform_3(%arg0: i32, %arg1: i32, %arg2: i32) -> (i32, i32) {
    %c0_i32 = arith.constant 0 : i32
    %c0_i32_0 = arith.constant 0 : i32
    %c0_i32_1 = arith.constant 0 : i32
    return %c0_i32, %c0_i32_0 : i32, i32
  }
  func.func @transform_4(%arg0: i32, %arg1: i32, %arg2: i32) -> (i32, i32, i32) {
    %c0_i32 = arith.constant 0 : i32
    %c0_i32_0 = arith.constant 0 : i32
    return %arg0, %arg1, %c0_i32 : i32, i32, i32
  }
}

module attributes {stable_mosaic.version = 11 : i64} {
  func.func @asdb_flash_kernel(%arg0: i32, %arg1: i32, %arg2: i32, %arg3: memref<1x128x128xf32, #tpu.memory_space<vmem>>, %arg4: memref<1x128x128xf32, #tpu.memory_space<vmem>>, %arg5: memref<128x128xf32, #tpu.memory_space<vmem>>, %arg6: memref<1x128xf32, #tpu.memory_space<vmem>>, %arg7: memref<1x128x128xf32, #tpu.memory_space<vmem>>, %arg8: memref<128x1xf32, #tpu.memory_space<vmem>>, %arg9: memref<128x1xf32, #tpu.memory_space<vmem>>, %arg10: memref<128x128xf32, #tpu.memory_space<vmem>>) attributes {dimension_semantics = [#tpu.dimension_semantics<parallel>, #tpu.dimension_semantics<arbitrary>, #tpu.dimension_semantics<arbitrary>], iteration_bounds = array<i64: 2, 1, 1>, scalar_prefetch = 0 : i64, scratch_operands = 3 : i64, tpu.core_type = #tpu.core_type<tc>, window_params = [{transform_indices = @transform_0, window_bounds = array<i64: 1, 128, 128>}, {transform_indices = @transform_1, window_bounds = array<i64: 1, 128, 128>}, {pipeline_mode = #tpu.pipeline_mode<synchronous>, transform_indices = @transform_2, window_bounds = array<i64: 128, 128>}, {pipeline_mode = #tpu.pipeline_mode<synchronous>, transform_indices = @transform_3, window_bounds = array<i64: 1, 128>}, {transform_indices = @transform_4, window_bounds = array<i64: 1, 128, 128>}]} {
    %c0_i32 = arith.constant 0 : i32
    %0 = arith.cmpi eq, %arg2, %c0_i32 : i32
    %1 = arith.extui %0 : i1 to i32
    %c0_i32_0 = arith.constant 0 : i32
    %2 = arith.cmpi ne, %1, %c0_i32_0 : i32
    scf.if %2 {
      %cst_25 = arith.constant 0xFF800000 : f32
      %43 = vector.broadcast %cst_25 : f32 to vector<128x1xf32>
      %c0_26 = arith.constant 0 : index
      %c0_27 = arith.constant 0 : index
      %44 = vector.load %arg8[%c0_26, %c0_27] : memref<128x1xf32, #tpu.memory_space<vmem>>, vector<128x1xf32>
      tpu.vector_store %arg8[%c0_26, %c0_27], %43 {strides = array<i32>} : memref<128x1xf32, #tpu.memory_space<vmem>>, vector<128x1xf32>,
      %cst_28 = arith.constant 0.000000e+00 : f32
      %45 = vector.broadcast %cst_28 : f32 to vector<128x1xf32>
      %c0_29 = arith.constant 0 : index
      %c0_30 = arith.constant 0 : index
      %46 = vector.load %arg9[%c0_29, %c0_30] : memref<128x1xf32, #tpu.memory_space<vmem>>, vector<128x1xf32>
      tpu.vector_store %arg9[%c0_29, %c0_30], %45 {strides = array<i32>} : memref<128x1xf32, #tpu.memory_space<vmem>>, vector<128x1xf32>,
      %cst_31 = arith.constant 0.000000e+00 : f32
      %47 = vector.broadcast %cst_31 : f32 to vector<128x128xf32>
      %c0_32 = arith.constant 0 : index
      %c0_33 = arith.constant 0 : index
      %48 = vector.load %arg10[%c0_32, %c0_33] : memref<128x128xf32, #tpu.memory_space<vmem>>, vector<128x128xf32>
      tpu.vector_store %arg10[%c0_32, %c0_33], %47 {strides = array<i32>} : memref<128x128xf32, #tpu.memory_space<vmem>>, vector<128x128xf32>,
    } else {
    }
    %c0 = arith.constant 0 : index
    %c0_1 = arith.constant 0 : index
    %c0_2 = arith.constant 0 : index
    %3 = vector.load %arg3[%c0, %c0_1, %c0_2] : memref<1x128x128xf32, #tpu.memory_space<vmem>>, vector<1x128x128xf32>
    %4 = vector.shape_cast %3 : vector<1x128x128xf32> to vector<128x128xf32>
    %cst = arith.constant 0.176776692 : f32
    %5 = vector.broadcast %cst : f32 to vector<128x128xf32>
    %6 = arith.mulf %4, %5 : vector<128x128xf32>
    %c0_3 = arith.constant 0 : index
    %c0_4 = arith.constant 0 : index
    %c0_5 = arith.constant 0 : index
    %7 = vector.load %arg4[%c0_3, %c0_4, %c0_5] : memref<1x128x128xf32, #tpu.memory_space<vmem>>, vector<1x128x128xf32>
    %8 = vector.shape_cast %7 : vector<1x128x128xf32> to vector<128x128xf32>
    %cst_6 = arith.constant dense<0.000000e+00> : vector<128x128xf32>
    %9 = tpu.matmul %6, %8, %cst_6 {dimension_numbers = #tpu.dot_dimension_numbers<[1], [1], [0], [0], [0, 0, 1, 0], [], []>} : vector<128x128xf32>, vector<128x128xf32>, vector<128x128xf32> -> vector<128x128xf32>
    %10 = tpu.iota {dimensions = array<i32: 1>} : vector<128x128xi32>
    %c128_i32 = arith.constant 128 : i32
    %11 = arith.muli %arg2, %c128_i32 : i32
    %12 = vector.broadcast %11 : i32 to vector<128x128xi32>
    %13 = arith.addi %10, %12 : vector<128x128xi32>
    %c8_i32 = arith.constant 8 : i32
    %14 = vector.broadcast %c8_i32 : i32 to vector<128x128xi32>
    %15 = arith.cmpi slt, %13, %14 : vector<128x128xi32>
    %cst_7 = arith.constant -1.000000e+30 : f32
    %16 = vector.broadcast %cst_7 : f32 to vector<128x128xf32>
    %17 = arith.select %15, %9, %16 : vector<128x128xi1>, vector<128x128xf32>
    %c0_8 = arith.constant 0 : index
    %c0_9 = arith.constant 0 : index
    %18 = vector.load %arg8[%c0_8, %c0_9] : memref<128x1xf32, #tpu.memory_space<vmem>>, vector<128x1xf32>
    %cst_10 = arith.constant dense<0xFF800000> : vector<128xf32>
    %19 = vector.multi_reduction <maximumf>, %17, %cst_10 [1] : vector<128x128xf32> to vector<128xf32>
    %20 = vector.shape_cast %19 : vector<128xf32> to vector<128x1xf32>
    %21 = arith.maximumf %18, %20 : vector<128x1xf32>
    %22 = arith.subf %18, %21 : vector<128x1xf32>
    %23 = math.exp %22 : vector<128x1xf32>
    %24 = vector.broadcast %21 : vector<128x1xf32> to vector<128x128xf32>
    %25 = arith.subf %17, %24 : vector<128x128xf32>
    %26 = math.exp %25 : vector<128x128xf32>
    %c0_11 = arith.constant 0 : index
    %c0_12 = arith.constant 0 : index
    %27 = vector.load %arg9[%c0_11, %c0_12] : memref<128x1xf32, #tpu.memory_space<vmem>>, vector<128x1xf32>
    %28 = arith.mulf %23, %27 : vector<128x1xf32>
    %cst_13 = arith.constant dense<0.000000e+00> : vector<128xf32>
    %29 = vector.multi_reduction <add>, %26, %cst_13 [1] : vector<128x128xf32> to vector<128xf32>
    %30 = vector.shape_cast %29 : vector<128xf32> to vector<128x1xf32>
    %31 = arith.addf %28, %30 : vector<128x1xf32>
    %c0_14 = arith.constant 0 : index
    %c0_15 = arith.constant 0 : index
    %32 = vector.load %arg9[%c0_14, %c0_15] : memref<128x1xf32, #tpu.memory_space<vmem>>, vector<128x1xf32>
    tpu.vector_store %arg9[%c0_14, %c0_15], %31 {strides = array<i32>} : memref<128x1xf32, #tpu.memory_space<vmem>>, vector<128x1xf32>,
    %c0_16 = arith.constant 0 : index
    %c0_17 = arith.constant 0 : index
    %33 = vector.load %arg10[%c0_16, %c0_17] : memref<128x128xf32, #tpu.memory_space<vmem>>, vector<128x128xf32>
    %34 = vector.broadcast %23 : vector<128x1xf32> to vector<128x128xf32>
    %35 = arith.mulf %34, %33 : vector<128x128xf32>
    %cst_18 = arith.constant dense<0.000000e+00> : vector<128x128xf32>
    %36 = tpu.matmul %26, %8, %cst_18 {dimension_numbers = #tpu.dot_dimension_numbers<[1], [0], [0], [1], [0, 0, 1, 1], [], []>} : vector<128x128xf32>, vector<128x128xf32>, vector<128x128xf32> -> vector<128x128xf32>
    %37 = arith.addf %35, %36 : vector<128x128xf32>
    %c0_19 = arith.constant 0 : index
    %c0_20 = arith.constant 0 : index
    %38 = vector.load %arg10[%c0_19, %c0_20] : memref<128x128xf32, #tpu.memory_space<vmem>>, vector<128x128xf32>
    tpu.vector_store %arg10[%c0_19, %c0_20], %37 {strides = array<i32>} : memref<128x128xf32, #tpu.memory_space<vmem>>, vector<128x128xf32>,
    %c0_21 = arith.constant 0 : index
    %c0_22 = arith.constant 0 : index
    %39 = vector.load %arg8[%c0_21, %c0_22] : memref<128x1xf32, #tpu.memory_space<vmem>>, vector<128x1xf32>
    tpu.vector_store %arg8[%c0_21, %c0_22], %21 {strides = array<i32>} : memref<128x1xf32, #tpu.memory_space<vmem>>, vector<128x1xf32>,
    %c0_i32_23 = arith.constant 0 : i32
    %40 = arith.cmpi eq, %arg2, %c0_i32_23 : i32
    %41 = arith.extui %40 : i1 to i32
    %c0_i32_24 = arith.constant 0 : i32
    %42 = arith.cmpi ne, %41, %c0_i32_24 : i32
    scf.if %42 {
      %c0_25 = arith.constant 0 : index
      %c0_26 = arith.constant 0 : index
      %43 = vector.load %arg10[%c0_25, %c0_26] : memref<128x128xf32, #tpu.memory_space<vmem>>, vector<128x128xf32>
      %c0_27 = arith.constant 0 : index
      %c0_28 = arith.constant 0 : index
      %44 = vector.load %arg9[%c0_27, %c0_28] : memref<128x1xf32, #tpu.memory_space<vmem>>, vector<128x1xf32>
      %45 = tpu.reciprocal %44 {approx = true} : vector<128x1xf32> -> vector<128x1xf32>
      %46 = vector.broadcast %45 : vector<128x1xf32> to vector<128x128xf32>
      %47 = arith.mulf %43, %46 : vector<128x128xf32>
      %c0_29 = arith.constant 0 : index
      %c0_30 = arith.constant 0 : index
      %48 = vector.load %arg5[%c0_29, %c0_30] : memref<128x128xf32, #tpu.memory_space<vmem>>, vector<128x128xf32>
      %cst_31 = arith.constant dense<0.000000e+00> : vector<128x128xf32>
      %49 = tpu.matmul %47, %48, %cst_31 {dimension_numbers = #tpu.dot_dimension_numbers<[1], [0], [0], [1], [0, 0, 1, 1], [], []>} : vector<128x128xf32>, vector<128x128xf32>, vector<128x128xf32> -> vector<128x128xf32>
      %c0_32 = arith.constant 0 : index
      %c0_33 = arith.constant 0 : index
      %50 = vector.load %arg6[%c0_32, %c0_33] : memref<1x128xf32, #tpu.memory_space<vmem>>, vector<1x128xf32>
      %51 = vector.broadcast %50 : vector<1x128xf32> to vector<128x128xf32>
      %52 = arith.addf %49, %51 : vector<128x128xf32>
      %c0_34 = arith.constant 0 : index
      %c0_35 = arith.constant 0 : index
      %c0_36 = arith.constant 0 : index
      %53 = vector.load %arg7[%c0_34, %c0_35, %c0_36] : memref<1x128x128xf32, #tpu.memory_space<vmem>>, vector<1x128x128xf32>
      %54 = vector.shape_cast %53 : vector<1x128x128xf32> to vector<128x128xf32>
      %55 = vector.shape_cast %52 : vector<128x128xf32> to vector<1x128x128xf32>
      tpu.vector_store %arg7[%c0_34, %c0_35, %c0_36], %55 {strides = array<i32>} : memref<1x128x128xf32, #tpu.memory_space<vmem>>, vector<1x128x128xf32>,
    } else {
    }
    return
  }
  func.func @transform_0(%arg0: i32, %arg1: i32, %arg2: i32) -> (i32, i32, i32) {
    %c0_i32 = arith.constant 0 : i32
    %c0_i32_0 = arith.constant 0 : i32
    return %arg0, %arg1, %c0_i32 : i32, i32, i32
  }
  func.func @transform_1(%arg0: i32, %arg1: i32, %arg2: i32) -> (i32, i32, i32) {
    %c0_i32 = arith.constant 0 : i32
    %c0_i32_0 = arith.constant 0 : i32
    return %arg0, %arg2, %c0_i32 : i32, i32, i32
  }
  func.func @transform_2(%arg0: i32, %arg1: i32, %arg2: i32) -> (i32, i32) {
    %c0_i32 = arith.constant 0 : i32
    %c0_i32_0 = arith.constant 0 : i32
    %c0_i32_1 = arith.constant 0 : i32
    return %c0_i32, %c0_i32_0 : i32, i32
  }
  func.func @transform_3(%arg0: i32, %arg1: i32, %arg2: i32) -> (i32, i32) {
    %c0_i32 = arith.constant 0 : i32
    %c0_i32_0 = arith.constant 0 : i32
    %c0_i32_1 = arith.constant 0 : i32
    return %c0_i32, %c0_i32_0 : i32, i32
  }
  func.func @transform_4(%arg0: i32, %arg1: i32, %arg2: i32) -> (i32, i32, i32) {
    %c0_i32 = arith.constant 0 : i32
    %c0_i32_0 = arith.constant 0 : i32
    return %arg0, %arg1, %c0_i32 : i32, i32, i32
  }
}

</mosaic_0001>

<bundles_post_ra>
// kernel: tpu_custom_call.1
= control target key start
LH: loop header
LB: loop body
LE: loop exit
PB: predicated region body
PF: predicated region fallthrough
CT: control target
= control target key end

     0   :  { %s3052_s0 = inlined_call_operand.hbm [shape: f32[2,128,128], index: 0, kind: input, shape index: {}]   ;;  %s3053_s1 = inlined_call_operand.hbm [shape: f32[2,128,128], index: 1, kind: input, shape index: {}]   ;;  %s3054_s2 = inlined_call_operand.hbm [shape: f32[128,128], index: 2, kind: input, shape index: {}]   ;;  %s3055_s3 = inlined_call_operand.vmem [shape: f32[1,128], index: 3, kind: input, shape index: {}]   ;;  %s3056_s4 = inlined_call_operand.hbm [shape: f32[2,128,128], index: 4, kind: output, shape index: {}]  }
   0x1   :  { %3063 = sst [smem:[#allocation18_spill]] %s3054_s2 }
   0x2   :  { %9 = vsyncpa [#allocation6], 0 }
   0x3   :  { %11 = vsyncpa [#allocation6 + $0x1], 0 }
   0x4   :  { %12 = vsyncpa [#allocation9], 0 }
   0x5   :  { %14 = vsyncpa [#allocation9 + $0x1], 0 }
   0x6   :  { %15 = vsyncpa [#allocation7], 0 }
   0x7   :  { %17 = vsyncpa [#allocation7 + $0x1], 0  ;;  %s2364_s15 = smov 0   ;;  %s2366_s16 = smov 0  }
   0x8   :  { %s2368_s17 = smov 0   ;;  %s2370_s18 = smov 0  }
   0x9   :  { %s2372_s19 = smov 0   ;;  %s2374_s20 = smov 0  }
   0xa LB: > { %3064 = sst [smem:[#allocation16_spill]] %s2322_s19  ;;  %s2395_s21 = sadd.s32 4294967295, %s2326_s20   ;;  %s2326_s20 = sphi %s2374_s20, %s23_s20   ;;  %s2322_s19 = sphi %s2372_s19, %s3093_s19   ;;  %s2318_s18 = sphi %s2370_s18, %s3092_s18   ;;  %s2314_s17 = sphi %s2368_s17, %s3096_s17   ;;  %s2310_s16 = sphi %s2366_s16, %s3095_s16   ;;  %s2306_s15 = sphi %s2364_s15, %s3094_s15  }
   0xb   : > { %s1685_s22 = sadd.s32 4294967294, %s2326_s20   ;;  %p64_p0 = scmp.ne.s32.totalorder %s2310_s16, %s2306_s15 }
   0xc   : > { %p65_p1 = scmp.eq.s32.totalorder %s2395_s21, 0  ;;  %p166_p3 = scmp.eq.s32.totalorder %s1685_s22, 1 }
   0xd   : > { %p1686_p5 = scmp.ge.s32.totalorder %s2326_s20, 1  ;;  %p173_p7 = scmp.lt.s32.totalorder %s2326_s20, 3 }
   0xe   : > { %p2404_p4 = por %p65_p1, %p64_p0  ;;  %p2409_p6 = por %p166_p3, %p64_p0 }
   0xf   : > { %p2414_p8 = pnand %p1686_p5, %p173_p7  ;;  %s2328_s26 = smov [#allocation10]  }
  0x10   : > { %s3066_s24 = scalar_select %p2409_p6, 1, 0 }
  0x11   : > { %s185_s27 = sshll.u32 %s2328_s26, 4  ;;  %p1983_p9 = pneg %p2414_p8  ;;  %s186_s27 = int_to_ptr.vmem [resolvable:$true] %s185_s27 }
  0x12   : > { %s42_s29 = sadd.s32 1, %s2322_s19  ;;  %s2167_s30 = scalar_lea.vmem %s186_s27, 2048 }
  0x13   : > { %p2423_p11 = pnand %p1983_p9, %p65_p1  ;;  %p2168_p13 = scmp.ne.s32.totalorder %s186_s27, %s2167_s30 }
  0x14   : > { %p2175_p5 = scmp.lt.s32.totalorder %s186_s27, %s186_s27  ;;  %p2176_p7 = scmp.lt.s32.totalorder %s2167_s30, %s2167_s30 }
  0x15   : > { %p2158_p12 = pneg %p2423_p11 }
  0x16   : > { %p2177_p2 = por %p2176_p7, %p2175_p5 }
  0x17   : > { %p2170_p0 = pnand %p2168_p13, %p2158_p12 }
  0x19   : > { %p2171_p3 = pneg %p2170_p0 }
  0x1b   : > { %p2178_p6 = pnand %p2177_p2, %p2171_p3 }
  0x1d   : > { %2181 = shalt.err (!%p2178_p6)
}
  0x1e   : > { %s3057_s5 = smov 128   ;;  %s3059_s6 = smov 8  }
  0x1f   : > { %s3069_s2 = sld [smem:[#allocation18_spill]]  ;;  %p44_p2 = scmp.ge.s32.totalorder %s42_s29, 2 }
  0x20   : > { %s51_s9 = sadd.s32 1, %s2314_s17  ;;  %p58_p6 = scmp.ne.s32.totalorder %s2314_s17, %s2310_s16 }
  0x21   : > { %p59_p9 = scmp.eq.s32.totalorder %s2326_s20, 0  ;;  %s3098_s29 = smov (%p44_p2, %s42_s29), 0 }
  0x22   : > { %3070 = sst [smem:[#allocation17_spill]] %s3098_s29  ;;  %p3072_p13 = scmp.eq.s32.totalorder %s2395_s21, 1 }
  0x23   : > { %p2444_p12 = por %p59_p9, %p58_p6  ;;  %s46_s12 = ssub.s32 %s2322_s19, %s3098_s29 }
  0x24   : > { %p2450_p0 = por %p3072_p13, %p58_p6  ;;  %p1999_p3 = scmp.lt.s32.totalorder %s2326_s20, 2 }
  0x25   : > { %1986 = dma.hbm_to_vmem [thread:$0]  (!%p2423_p11), %s3069_s2, 2048, %s186_s27, [#allocation9], %s3057_s5, %s3057_s5, %s3059_s6  }
  0x26   : > { %p49_p11 = scmp.eq.s32.totalorder %s46_s12, 0  ;;  %s202_s13 = sand.u32 1, %s2314_s17  }
  0x27   : > { %s1689_s14 = sshll.u32 %s202_s13, 7  ;;  %s1706_s26 = sshll.u32 %s2322_s19, 11 }
  0x28   : > { %s2459_s22 = scalar_select %p49_p11, %s2314_s17, %s51_s9  }
  0x29   : > { %s214_s30 = scalar_lea.hbm %s3052_s0, %s1706_s26  ;;  %s206_s7 = scalar_lea.vmem [#allocation5], %s1689_s14 }
  0x2a   : > { %s215_s8 = sshll.u32 %s206_s7, 4  ;;  %p2467_p5 = pnand %p1999_p3, %p2444_p12  ;;  %s216_s8 = int_to_ptr.vmem [resolvable:$true] %s215_s8 }
  0x2b   : > { %s2474_s9 = scalar_lea.hbm %s3053_s1, %s1706_s26  ;;  %s229_s12 = scalar_lea.vmem [#allocation8], %s1689_s14 }
  0x2c   : > { %s238_s29 = sshll.u32 %s229_s12, 4  ;;  %s203_s19 = scalar_lea.sflag [#allocation6], %s202_s13  ;;  %s239_s29 = int_to_ptr.vmem [resolvable:$true] %s238_s29 }
  0x2d   : > { %p2184_p7 = pneg %p2467_p5  ;;  %s2195_s27 = scalar_lea.vmem %s216_s8, 2048 }
  0x2e   : > { %p2196_p2 = scmp.ne.s32.totalorder %s216_s8, %s2195_s27  ;;  %s2331_s10 = smov [#allocation5]  }
  0x2f   : > { %s2200_s28 = sshll.u32 %s2331_s10, 4  ;;  %s2201_s28 = int_to_ptr.vmem [resolvable:$false] %s2200_s28 }
  0x30   : > { %p2198_p6 = pnand %p2196_p2, %p2184_p7  ;;  %s2202_s7 = scalar_lea.vmem %s2201_s28, 4096 }
  0x31   : > { %p2203_p12 = scmp.lt.s32.totalorder %s216_s8, %s2201_s28  ;;  %p2204_p13 = scmp.lt.s32.totalorder %s2202_s7, %s2195_s27 }
  0x32   : > { %p2199_p9 = pneg %p2198_p6 }
  0x33   : > { %p2205_p3 = por %p2204_p13, %p2203_p12 }
  0x35   : > { %p2206_p11 = pnand %p2205_p3, %p2199_p9 }
  0x37   : > { %2209 = shalt.err (!%p2206_p11)
}
  0x38   : > { %s3075_s2 = smov 8   ;;  %s3076_s6 = smov 128  }
  0x39   : > { %1990 = dma.hbm_to_vmem [thread:$0]  (!%p2467_p5), %s214_s30, 2048, %s216_s8, %s203_s19, %s3076_s6, %s3076_s6, %s3075_s2  }
  0x3a   : > { %s225_s13 = sand.u32 1, %s2326_s20   ;;  %s2223_s26 = scalar_lea.vmem %s239_s29, 2048 }
  0x3b   : > { %s226_s14 = scalar_lea.sflag [#allocation9], %s225_s13  ;;  %p2224_p2 = scmp.ne.s32.totalorder %s239_s29, %s2223_s26 }
  0x3c   : > { %s2332_s12 = smov [#allocation8]  }
  0x3d   : > { %p2226_p6 = pnand %p2224_p2, %p2184_p7  ;;  %s2228_s27 = sshll.u32 %s2332_s12, 4  ;;  %s2229_s27 = int_to_ptr.vmem [resolvable:$false] %s2228_s27 }
  0x3e   : > { %s2230_s10 = scalar_lea.vmem %s2229_s27, 4096  ;;  %p2231_p9 = scmp.lt.s32.totalorder %s239_s29, %s2229_s27 }
  0x3f   : > { %p2227_p10 = pneg %p2226_p6  ;;  %p2232_p12 = scmp.lt.s32.totalorder %s2230_s10, %s2223_s26 }
  0x41   : > { %p2233_p13 = por %p2232_p12, %p2231_p9 }
  0x43   : > { %p2234_p3 = pnand %p2233_p13, %p2227_p10 }
  0x45   : > { %2237 = shalt.err (!%p2234_p3)
}
  0x46   : > { %1993 = dma.hbm_to_vmem [thread:$0]  (!%p2467_p5), %s2474_s9, 2048, %s239_s29, %s226_s14, %s3076_s6, %s3076_s6, %s3075_s2  }
  0x47   : > { %250 = sbr.rel (%p2414_p8) target bundleno = 1184 (0x4a0), region = 36  ;;  %s2499_s19 = sand.u32 (!%p2414_p8), 1, %s2310_s16  }
  0x48   : > { %s2502_s30 = sshll.u32 (!%p2414_p8), %s2499_s19, 7  ;;  %s253_s8 = scalar_lea.sflag (!%p2414_p8), [#allocation6], %s2499_s19 }
  0x49   : > { %s2506_s28 = scalar_lea.vmem (!%p2414_p8), [#allocation5], %s2502_s30 }
  0x4c   : > { %2289 = dma.done.wait (%p2404_p4), %s253_s8, 2048  }
  0x4d   : > { %2291 = vsyncadd (%p2404_p4), %s253_s8, 4294965248  ;;  %s261_s25 = sand.u32 1, %s2395_s21   ;;  %s2514_s5 = scalar_lea.vmem [#allocation8], %s2502_s30 }
  0x4e   : > { %s262_s29 = scalar_lea.sflag [#allocation9], %s261_s25 }
  0x4f   : > { %2293 = dma.done.wait (%p2404_p4), %s262_s29, 2048  }
  0x50   : > { %2295 = vsyncadd (%p2404_p4), %s262_s29, 4294965248 }
  0x51   : > { %2297 = dma.done.wait (%p65_p1), [#allocation9], 2048  }
  0x52   : > { %2299 = vsyncadd (%p65_p1), [#allocation9], 4294965248  ;;  %v402_v0 = vld [vmem:[%s2514_s5 + $0x78] sm:$0xff]  ;;  %v401_v1 = vld [vmem:[%s2514_s5 + $0x70] sm:$0xff]  ;;  %vm306_vm0 = vcmask 7168   ;;  %v2333_v48 = vmov -inf   ;;  %v548_v49 = vlaneseq }
  0x53   : > { %1805 = vmatprep.subr.mxu0 %v402_v0  ;;  %1861 = vmatprep.subr.mxu1 %v402_v0  ;;  %v400_v2 = vld [vmem:[%s2514_s5 + $0x68] sm:$0xff]  ;;  %v355_v3 = vld [vmem:[%s2506_s28] sm:$0xff]  ;;  %v398_v6 = vld [vmem:[%s2514_s5 + $0x58] sm:$0xff]  ;;  %307 = vst.msk [vmem:[#allocation2] sm:$0xff] %vm306_vm0, %v2333_v48  ;;  %s2979_s9 = scalar_lea.vmem [#allocation11], %s2502_s30  ;;  %s1708_s7 = sshll.u32 %s2318_s18, 11 }
  0x54   : > { %1806 = vmatpush3.xpose.msra.mxu0 %v402_v0  ;;  %1862 = vmatpush3.msra.mxu1 %v402_v0  ;;  %v399_v4 = vld [vmem:[%s2514_s5 + $0x60] sm:$0xff]  ;;  %v371_v5 = vmul.f32 0.17677669, %v355_v3  ;;  %v397_v7 = vld [vmem:[%s2514_s5 + $0x50] sm:$0xff]  ;;  %v396_v8 = vld [vmem:[%s2514_s5 + $0x48] sm:$0xff]  ;;  %308 = vst.msk [vmem:[#allocation2 + $0x8] sm:$0xff] %vm306_vm0, %v2333_v48  ;;  %s3000_s14 = scalar_lea.hbm %s3056_s4, %s1708_s7 }
  0x55   : > { %1807 = vmatprep.subr.mxu0 %v401_v1  ;;  %1863 = vmatprep.subr.mxu1 %v401_v1  ;;  %v395_v9 = vld [vmem:[%s2514_s5 + $0x40] sm:$0xff]  ;;  %v394_v10 = vld [vmem:[%s2514_s5 + $0x38] sm:$0xff]  ;;  %v393_v11 = vld [vmem:[%s2514_s5 + $0x30] sm:$0xff]  ;;  %309 = vst.msk [vmem:[#allocation2 + $0x10] sm:$0xff] %vm306_vm0, %v2333_v48  ;;  %v2572_v50 = vand.u32 127, %v548_v49  ;;  %v2334_v3 = vmov 0  }
  0x56   : > { %1864 = vmatpush3.msra.mxu1 %v401_v1  ;;  %1837 = vmatprep.mubr.f32.mxu0 %v371_v5  ;;  %v392_v12 = vld [vmem:[%s2514_s5 + $0x28] sm:$0xff]  ;;  %v391_v13 = vld [vmem:[%s2514_s5 + $0x20] sm:$0xff]  ;;  %v390_v14 = vld [vmem:[%s2514_s5 + $0x18] sm:$0xff]  ;;  %310 = vst.msk [vmem:[#allocation2 + $0x18] sm:$0xff] %vm306_vm0, %v2333_v48  ;;  %s1559_s2 = sshll.u32 %s2979_s9, 4  ;;  %s1544_s26 = scalar_lea.sflag [#allocation7], %s2499_s19  ;;  %s3002_s2 = int_to_ptr.vmem [resolvable:$true] %s1559_s2 }
  0x57   : > { %1865 = vmatprep.subr.mxu1 %v400_v2  ;;  %v389_v15 = vld [vmem:[%s2514_s5 + $0x10] sm:$0xff]  ;;  %v388_v16 = vld [vmem:[%s2514_s5 + $0x8] sm:$0xff]  ;;  %v387_v17 = vld [vmem:[%s2514_s5] sm:$0xff]  ;;  %311 = vst.msk [vmem:[#allocation2 + $0x20] sm:$0xff] %vm306_vm0, %v2333_v48  ;;  %vm553_vm1 = vcmp.lt.s32.totalorder %v2572_v50, 8  ;;  %2058 = vset.pattern.permute.xlu0 %v2334_v3  ;;  %s2238_s18 = scalar_lea.vmem %s3002_s2, 2048 }
  0x58   : > { %1808 = vmatpush3.xpose.msra.mxu0 %v401_v1  ;;  %1866 = vmatpush3.msra.mxu1 %v400_v2  ;;  %v356_v18 = vld [vmem:[%s2506_s28 + $0x8] sm:$0xff]  ;;  %v357_v19 = vld [vmem:[%s2506_s28 + $0x10] sm:$0xff]  ;;  %v358_v22 = vld [vmem:[%s2506_s28 + $0x18] sm:$0xff]  ;;  %312 = vst.msk [vmem:[#allocation2 + $0x28] sm:$0xff] %vm306_vm0, %v2333_v48  ;;  %p2239_p1 = scmp.ne.s32.totalorder %s3002_s2, %s2238_s18  ;;  %s2336_s12 = smov [#allocation11]  }
  0x59   : > { %1809 = vmatprep.subr.mxu0 %v400_v2  ;;  %1867 = vmatprep.subr.mxu1 %v399_v4  ;;  %v372_v20 = vmul.f32 0.17677669, %v356_v18  ;;  %v373_v21 = vmul.f32 0.17677669, %v357_v19  ;;  %v359_v23 = vld [vmem:[%s2506_s28 + $0x20] sm:$0xff]  ;;  %v360_v26 = vld [vmem:[%s2506_s28 + $0x28] sm:$0xff] }
  0x5a   : > { %1868 = vmatpush3.msra.mxu1 %v399_v4  ;;  %v374_v24 = vmul.f32 0.17677669, %v358_v22  ;;  %v375_v25 = vmul.f32 0.17677669, %v359_v23  ;;  %v361_v27 = vld [vmem:[%s2506_s28 + $0x30] sm:$0xff]  ;;  %v362_v30 = vld [vmem:[%s2506_s28 + $0x38] sm:$0xff]  ;;  %2059 = vset.pattern.permute.xlu1 %v2334_v3  ;;  %p2240_p4 = pnand %p2239_p1, %p2450_p0 }
  0x5b   : > { %1869 = vmatprep.subr.mxu1 %v398_v6  ;;  %v376_v28 = vmul.f32 0.17677669, %v360_v26  ;;  %v377_v29 = vmul.f32 0.17677669, %v361_v27  ;;  %v363_v31 = vld [vmem:[%s2506_s28 + $0x40] sm:$0xff]  ;;  %v364_v34 = vld [vmem:[%s2506_s28 + $0x48] sm:$0xff] }
  0x5c   : > { %1810 = vmatpush3.xpose.msra.mxu0 %v400_v2  ;;  %1870 = vmatpush3.msra.mxu1 %v398_v6  ;;  %v378_v32 = vmul.f32 0.17677669, %v362_v30  ;;  %v379_v33 = vmul.f32 0.17677669, %v363_v31  ;;  %v365_v35 = vld [vmem:[%s2506_s28 + $0x50] sm:$0xff]  ;;  %v366_v38 = vld [vmem:[%s2506_s28 + $0x58] sm:$0xff]  ;;  %p2241_p8 = pneg %p2240_p4 }
  0x5d   : > { %1811 = vmatprep.subr.mxu0 %v399_v4  ;;  %1871 = vmatprep.subr.mxu1 %v397_v7  ;;  %v380_v36 = vmul.f32 0.17677669, %v364_v34  ;;  %v381_v37 = vmul.f32 0.17677669, %v365_v35  ;;  %v367_v39 = vld [vmem:[%s2506_s28 + $0x60] sm:$0xff]  ;;  %v368_v42 = vld [vmem:[%s2506_s28 + $0x68] sm:$0xff] }
  0x5e   : > { %1872 = vmatpush3.msra.mxu1 %v397_v7  ;;  %v382_v40 = vmul.f32 0.17677669, %v366_v38  ;;  %v383_v41 = vmul.f32 0.17677669, %v367_v39  ;;  %v369_v43 = vld [vmem:[%s2506_s28 + $0x70] sm:$0xff]  ;;  %v370_v46 = vld [vmem:[%s2506_s28 + $0x78] sm:$0xff] }
  0x5f   : > { %1873 = vmatprep.subr.mxu1 %v396_v8  ;;  %v384_v44 = vmul.f32 0.17677669, %v368_v42  ;;  %v385_v45 = vmul.f32 0.17677669, %v369_v43  ;;  %v386_v47 = vmul.f32 0.17677669, %v370_v46 }
  0x60   : > { %1812 = vmatpush3.xpose.msra.mxu0 %v399_v4  ;;  %1874 = vmatpush3.msra.mxu1 %v396_v8  ;;  %313 = vst.msk [vmem:[#allocation2 + $0x30] sm:$0xff] %vm306_vm0, %v2333_v48  ;;  %314 = vst.msk [vmem:[#allocation2 + $0x38] sm:$0xff] %vm306_vm0, %v2333_v48  ;;  %v2673_v23 = vld [vmem:[#allocation2 + $0x18] sm:$0xff]  ;;  %v2678_v26 = vld [vmem:[#allocation2 + $0x8] sm:$0xff]  ;;  %s2242_s27 = sshll.u32 %s2336_s12, 4  ;;  %s2243_s27 = int_to_ptr.vmem [resolvable:$false] %s2242_s27 }
  0x61   : > { %1813 = vmatprep.subr.mxu0 %v398_v6  ;;  %1875 = vmatprep.subr.mxu1 %v395_v9  ;;  %315 = vst.msk [vmem:[#allocation2 + $0x40] sm:$0xff] %vm306_vm0, %v2333_v48  ;;  %316 = vst.msk [vmem:[#allocation2 + $0x48] sm:$0xff] %vm306_vm0, %v2333_v48  ;;  %v2688_v30 = vld [vmem:[#allocation2 + $0x10] sm:$0xff]  ;;  %v2697_v34 = vld [vmem:[#allocation2 + $0x20] sm:$0xff]  ;;  %s2244_s10 = scalar_lea.vmem %s2243_s27, 4096  ;;  %p2245_p10 = scmp.lt.s32.totalorder %s3002_s2, %s2243_s27 }
  0x62   : > { %1876 = vmatpush3.msra.mxu1 %v395_v9  ;;  %317 = vst.msk [vmem:[#allocation2 + $0x50] sm:$0xff] %vm306_vm0, %v2333_v48  ;;  %318 = vst.msk [vmem:[#allocation2 + $0x58] sm:$0xff] %vm306_vm0, %v2333_v48  ;;  %p2246_p5 = scmp.lt.s32.totalorder %s2244_s10, %s2238_s18 }
  0x63   : > { %1877 = vmatprep.subr.mxu1 %v394_v10  ;;  %319 = vst.msk [vmem:[#allocation2 + $0x60] sm:$0xff] %vm306_vm0, %v2333_v48  ;;  %320 = vst.msk [vmem:[#allocation2 + $0x68] sm:$0xff] %vm306_vm0, %v2333_v48 }
  0x64   : > { %1814 = vmatpush3.xpose.msra.mxu0 %v398_v6  ;;  %1878 = vmatpush3.msra.mxu1 %v394_v10  ;;  %321 = vst.msk [vmem:[#allocation2 + $0x70] sm:$0xff] %vm306_vm0, %v2333_v48  ;;  %322 = vst.msk [vmem:[#allocation2 + $0x78] sm:$0xff] %vm306_vm0, %v2333_v48  ;;  %p2247_p7 = por %p2246_p5, %p2245_p10 }
  0x65   : > { %1815 = vmatprep.subr.mxu0 %v397_v7  ;;  %1879 = vmatprep.subr.mxu1 %v393_v11 }
  0x66   : > { %1880 = vmatpush3.msra.mxu1 %v393_v11  ;;  %p2248_p11 = pnand %p2247_p7, %p2241_p8 }
  0x67   : > { %1881 = vmatprep.subr.mxu1 %v392_v12  ;;  %v2716_v42 = vld [vmem:[#allocation2 + $0x30] sm:$0xff] }
  0x68   : > { %1816 = vmatpush3.xpose.msra.mxu0 %v397_v7  ;;  %1882 = vmatpush3.msra.mxu1 %v392_v12  ;;  %v2735_v50 = vld [vmem:[#allocation2 + $0x40] sm:$0xff] }
  0x69   : > { %1817 = vmatprep.subr.mxu0 %v396_v8  ;;  %1883 = vmatprep.subr.mxu1 %v391_v13 }
  0x6a   : > { %1884 = vmatpush3.msra.mxu1 %v391_v13 }
  0x6b   : > { %1885 = vmatprep.subr.mxu1 %v390_v14 }
  0x6c   : > { %1818 = vmatpush3.xpose.msra.mxu0 %v396_v8  ;;  %1886 = vmatpush3.msra.mxu1 %v390_v14 }
  0x6d   : > { %1819 = vmatprep.subr.mxu0 %v395_v9  ;;  %1887 = vmatprep.subr.mxu1 %v389_v15 }
  0x6e   : > { %1888 = vmatpush3.msra.mxu1 %v389_v15 }
  0x6f   : > { %1889 = vmatprep.subr.mxu1 %v388_v16 }
  0x70   : > { %1820 = vmatpush3.xpose.msra.mxu0 %v395_v9  ;;  %1890 = vmatpush3.msra.mxu1 %v388_v16 }
  0x71   : > { %1821 = vmatprep.subr.mxu0 %v394_v10  ;;  %1891 = vmatprep.subr.mxu1 %v387_v17 }
  0x72   : > { %1892 = vmatpush3.msra.mxu1 %v387_v17 }
  0x74   : > { %1822 = vmatpush3.xpose.msra.mxu0 %v394_v10 }
  0x75   : > { %1823 = vmatprep.subr.mxu0 %v393_v11 }
  0x78   : > { %1824 = vmatpush3.xpose.msra.mxu0 %v393_v11 }
  0x79   : > { %1825 = vmatprep.subr.mxu0 %v392_v12 }
  0x7c   : > { %1826 = vmatpush3.xpose.msra.mxu0 %v392_v12 }
  0x7d   : > { %1827 = vmatprep.subr.mxu0 %v391_v13 }
  0x80   : > { %1828 = vmatpush3.xpose.msra.mxu0 %v391_v13 }
  0x81   : > { %1829 = vmatprep.subr.mxu0 %v390_v14 }
  0x84   : > { %1830 = vmatpush3.xpose.msra.mxu0 %v390_v14 }
  0x85   : > { %1831 = vmatprep.subr.mxu0 %v389_v15 }
  0x88   : > { %1832 = vmatpush3.xpose.msra.mxu0 %v389_v15 }
  0x89   : > { %1833 = vmatprep.subr.mxu0 %v388_v16 }
  0x8c   : > { %1834 = vmatpush3.xpose.msra.mxu0 %v388_v16  ;;  %v2335_v16 = vmov 0.0  }
  0x8d   : > { %1835 = vmatprep.subr.mxu0 %v387_v17  ;;  %323 = vst.msk [vmem:[#allocation3] sm:$0xff] %vm306_vm0, %v2335_v16  ;;  %324 = vst.msk [vmem:[#allocation3 + $0x8] sm:$0xff] %vm306_vm0, %v2335_v16 }
  0x8e   : > { %325 = vst.msk [vmem:[#allocation3 + $0x10] sm:$0xff] %vm306_vm0, %v2335_v16  ;;  %326 = vst.msk [vmem:[#allocation3 + $0x18] sm:$0xff] %vm306_vm0, %v2335_v16 }
  0x8f   : > { %327 = vst.msk [vmem:[#allocation3 + $0x20] sm:$0xff] %vm306_vm0, %v2335_v16  ;;  %328 = vst.msk [vmem:[#allocation3 + $0x28] sm:$0xff] %vm306_vm0, %v2335_v16 }
  0x90   : > { %1836 = vmatpush3.xpose.msra.mxu0 %v387_v17  ;;  %329 = vst.msk [vmem:[#allocation3 + $0x30] sm:$0xff] %vm306_vm0, %v2335_v16  ;;  %330 = vst.msk [vmem:[#allocation3 + $0x38] sm:$0xff] %vm306_vm0, %v2335_v16 }
  0x91   : > { %331 = vst.msk [vmem:[#allocation3 + $0x40] sm:$0xff] %vm306_vm0, %v2335_v16  ;;  %332 = vst.msk [vmem:[#allocation3 + $0x48] sm:$0xff] %vm306_vm0, %v2335_v16 }
  0x92   : > { %333 = vst.msk [vmem:[#allocation3 + $0x50] sm:$0xff] %vm306_vm0, %v2335_v16  ;;  %334 = vst.msk [vmem:[#allocation3 + $0x58] sm:$0xff] %vm306_vm0, %v2335_v16 }
  0x93   : > { %1838 = vmatmul.mubr.f32.vlgmr.msra.gmra.mxu0 %v372_v20  ;;  %335 = vst.msk [vmem:[#allocation3 + $0x60] sm:$0xff] %vm306_vm0, %v2335_v16  ;;  %336 = vst.msk [vmem:[#allocation3 + $0x68] sm:$0xff] %vm306_vm0, %v2335_v16 }
  0x94   : > { %1840 = vmatprep.mubr.f32.mxu0 %v373_v21  ;;  %337 = vst.msk [vmem:[#allocation3 + $0x70] sm:$0xff] %vm306_vm0, %v2335_v16  ;;  %338 = vst.msk [vmem:[#allocation3 + $0x78] sm:$0xff] %vm306_vm0, %v2335_v16  ;;  %v2671_v21 = vld [vmem:[#allocation2] sm:$0xff] }
  0x95   : > { %v2774_v16 = vld [vmem:[#allocation2 + $0x60] sm:$0xff] }
  0x97   : > { %1841 = vmatmul.mubr.f32.gmra.mxu0 %v374_v24 }
  0x98   : > { %1843 = vmatprep.mubr.f32.mxu0 %v375_v25 }
  0x9b   : > { %1844 = vmatmul.mubr.f32.gmra.mxu0 %v376_v28 }
  0x9c   : > { %1846 = vmatprep.mubr.f32.mxu0 %v377_v29 }
  0x9f   : > { %1847 = vmatmul.mubr.f32.gmra.mxu0 %v378_v32 }
  0xa0   : > { %1849 = vmatprep.mubr.f32.mxu0 %v379_v33 }
  0xa3   : > { %1850 = vmatmul.mubr.f32.gmra.mxu0 %v380_v36 }
  0xa4   : > { %1852 = vmatprep.mubr.f32.mxu0 %v381_v37  ;;  %v2707_v37 = vld [vmem:[#allocation2 + $0x28] sm:$0xff] }
  0xa7   : > { %1853 = vmatmul.mubr.f32.gmra.mxu0 %v382_v40 }
  0xa8   : > { %1855 = vmatprep.mubr.f32.mxu0 %v383_v41 }
  0xab   : > { %1856 = vmatmul.mubr.f32.gmra.mxu0 %v384_v44 }
  0xac   : > { %1858 = vmatprep.mubr.f32.mxu0 %v385_v45  ;;  %v2726_v45 = vld [vmem:[#allocation2 + $0x38] sm:$0xff] }
  0xaf   : > { %1859 = vmatmul.mubr.f32.gmra.mxu0 %v386_v47 }
 0x153   : > { %v1839_v51 = vpop.f32.mrf.mxu0 }
 0x154   : > { %v2587_v57 = vsel %vm553_vm1, %v1839_v51, -1e+30 }
 0x155   : > { %v469_v52 = vpop.f32.mrf.mxu0 }
 0x156   : > { %v2577_v53 = vsel %vm553_vm1, %v469_v52, -1e+30 }
 0x157   : > { %586 = vmax.xlane.f32.xlu0 %v2577_v53  ;;  %v1842_v54 = vpop.f32.mrf.mxu0 }
 0x158   : > { %v2582_v55 = vsel %vm553_vm1, %v1842_v54, -1e+30  ;;  %v2745_v54 = vld [vmem:[#allocation2 + $0x48] sm:$0xff] }
 0x159   : > { %592 = vmax.xlane.f32.xlu1 %v2582_v55  ;;  %v479_v56 = vpop.f32.mrf.mxu0 }
 0x15a   : > { %v2591_v58 = vsel %vm553_vm1, %v479_v56, -1e+30 }
 0x15b   : > { %588 = vmax.xlane.f32.xlu0 %v2587_v57  ;;  %v1845_v59 = vpop.f32.mrf.mxu0 }
 0x15c   : > { %v2597_v61 = vsel %vm553_vm1, %v1845_v59, -1e+30 }
 0x15d   : > { %590 = vmax.xlane.f32.xlu1 %v2591_v58  ;;  %v489_v60 = vpop.f32.mrf.mxu0 }
 0x15e   : > { %v2601_v62 = vsel %vm553_vm1, %v489_v60, -1e+30 }
 0x15f   : > { %v1848_v63 = vpop.f32.mrf.mxu0  ;;  %594 = vmax.xlane.f32.xlu0 %v2601_v62 }
 0x160   : > { %v2607_v1 = vsel %vm553_vm1, %v1848_v63, -1e+30 }
 0x161   : > { %596 = vmax.xlane.f32.xlu1 %v2597_v61  ;;  %v499_v0 = vpop.f32.mrf.mxu0 }
 0x162   : > { %v2611_v2 = vsel %vm553_vm1, %v499_v0, -1e+30  ;;  %v2754_v0 = vld [vmem:[#allocation2 + $0x50] sm:$0xff] }
 0x163   : > { %v1851_v4 = vpop.f32.mrf.mxu0  ;;  %598 = vmax.xlane.f32.xlu0 %v2611_v2 }
 0x164   : > { %v2617_v6 = vsel %vm553_vm1, %v1851_v4, -1e+30 }
 0x165   : > { %600 = vmax.xlane.f32.xlu1 %v2607_v1  ;;  %v509_v5 = vpop.f32.mrf.mxu0 }
 0x166   : > { %v2621_v7 = vsel %vm553_vm1, %v509_v5, -1e+30  ;;  %v2764_v5 = vld [vmem:[#allocation2 + $0x58] sm:$0xff] }
 0x167   : > { %v1854_v8 = vpop.f32.mrf.mxu0  ;;  %602 = vmax.xlane.f32.xlu0 %v2621_v7 }
 0x168   : > { %v2627_v10 = vsel %vm553_vm1, %v1854_v8, -1e+30 }
 0x169   : > { %604 = vmax.xlane.f32.xlu1 %v2617_v6  ;;  %v519_v9 = vpop.f32.mrf.mxu0 }
 0x16a   : > { %v2631_v11 = vsel %vm553_vm1, %v519_v9, -1e+30 }
 0x16b   : > { %v1857_v12 = vpop.f32.mrf.mxu0  ;;  %606 = vmax.xlane.f32.xlu0 %v2631_v11 }
 0x16c   : > { %v2637_v14 = vsel %vm553_vm1, %v1857_v12, -1e+30 }
 0x16d   : > { %608 = vmax.xlane.f32.xlu1 %v2627_v10  ;;  %v529_v13 = vpop.f32.mrf.mxu0 }
 0x16e   : > { %v2641_v15 = vsel %vm553_vm1, %v529_v13, -1e+30 }
 0x16f   : > { %v1860_v17 = vpop.f32.mrf.mxu0  ;;  %610 = vmax.xlane.f32.xlu0 %v2641_v15 }
 0x170   : > { %v2663_v19 = vsel %vm553_vm1, %v1860_v17, -1e+30 }
 0x171   : > { %612 = vmax.xlane.f32.xlu1 %v2637_v14  ;;  %v539_v18 = vpop.f32.mrf.mxu0 }
 0x172   : > { %v2667_v20 = vsel %vm553_vm1, %v539_v18, -1e+30 }
 0x173   : > { %614 = vmax.xlane.f32.xlu0 %v2667_v20 }
 0x175   : > { %616 = vmax.xlane.f32.xlu1 %v2663_v19 }
 0x1e0   : > { %v587_v22 = vpop.xlane.xlu0 %586 }
 0x1e1   : > { %v2676_v24 = vmax.f32 %v2671_v21, %v587_v22  ;;  %v2784_v22 = vld [vmem:[#allocation2 + $0x68] sm:$0xff] }
 0x1e2   : > { %v593_v25 = vpop.xlane.xlu1 %592 }
 0x1e3   : > { %v634_v27 = vsub.f32 %v2671_v21, %v2676_v24  ;;  %1196 = vst.msk [vmem:[#allocation2] sm:$0xff] %vm306_vm0, %v2676_v24  ;;  %v2685_v28 = vmax.f32 %v2673_v23, %v593_v25  ;;  %684 = vperm.xlu0 %2058, %v2676_v24  }
 0x1e4   : > { %v589_v29 = vpop.xlane.xlu0 %588 }
 0x1e5   : > { %1199 = vst.msk [vmem:[#allocation2 + $0x18] sm:$0xff] %vm306_vm0, %v2685_v28  ;;  %v2695_v32 = vmax.f32 %v2678_v26, %v589_v29 }
 0x1e6   : > { %v591_v33 = vpop.xlane.xlu1 %590 }
 0x1e7   : > { %v635_v35 = vsub.f32 %v2678_v26, %v2695_v32  ;;  %1197 = vst.msk [vmem:[#allocation2 + $0x8] sm:$0xff] %vm306_vm0, %v2695_v32  ;;  %v2704_v36 = vmax.f32 %v2688_v30, %v591_v33  ;;  %689 = vperm.xlu1 %2059, %v2695_v32   ;;  %v3077_v26 = vsub.f32 %v2673_v23, %v2685_v28 }
 0x1e8   : > { %v595_v38 = vpop.xlane.xlu0 %594 }
 0x1e9   : > { %v636_v39 = vsub.f32 %v2688_v30, %v2704_v36  ;;  %1198 = vst.msk [vmem:[#allocation2 + $0x10] sm:$0xff] %vm306_vm0, %v2704_v36  ;;  %v2714_v40 = vmax.f32 %v2697_v34, %v595_v38  ;;  %v656_v32 = vmul.f32 1.442695, %v3077_v26 }
 0x1ea   : > { %v597_v41 = vpop.xlane.xlu1 %596 }
 0x1eb   : > { %v2719_v43 = vmax.f32 %v2707_v37, %v597_v41  ;;  %699 = vperm.xlu1 %2059, %v2685_v28   ;;  %1200 = vst.msk [vmem:[#allocation2 + $0x20] sm:$0xff] %vm306_vm0, %v2714_v40  ;;  %v2794_v41 = vld [vmem:[#allocation2 + $0x70] sm:$0xff] }
 0x1ec   : > { %v599_v46 = vpop.xlane.xlu0 %598 }
 0x1ed   : > { %1201 = vst.msk [vmem:[#allocation2 + $0x28] sm:$0xff] %vm306_vm0, %v2719_v43  ;;  %v2733_v48 = vmax.f32 %v2716_v42, %v599_v46  ;;  %v3079_v30 = vsub.f32 %v2707_v37, %v2719_v43 }
 0x1ee   : > { %v601_v49 = vpop.xlane.xlu1 %600 }
 0x1ef   : > { %v2738_v51 = vmax.f32 %v2726_v45, %v601_v49  ;;  %694 = vperm.xlu1 %2059, %v2704_v36   ;;  %1202 = vst.msk [vmem:[#allocation2 + $0x30] sm:$0xff] %vm306_vm0, %v2733_v48  ;;  %v660_v36 = vmul.f32 1.442695, %v3079_v30  ;;  %v3080_v21 = vsub.f32 %v2716_v42, %v2733_v48 }
 0x1f0   : > { %v603_v56 = vpop.xlane.xlu0 %602 }
 0x1f1   : > { %1203 = vst.msk [vmem:[#allocation2 + $0x38] sm:$0xff] %vm306_vm0, %v2738_v51  ;;  %v2752_v60 = vmax.f32 %v2735_v50, %v603_v56  ;;  %v2804_v56 = vld [vmem:[#allocation2 + $0x78] sm:$0xff]  ;;  %v662_v23 = vmul.f32 1.442695, %v3080_v21  ;;  %v3081_v28 = vsub.f32 %v2726_v45, %v2738_v51  ;;  %v815_v21 = vld [vmem:[#allocation3 + $0x28] sm:$0xff] }
 0x1f2   : > { %v605_v63 = vpop.xlane.xlu1 %604 }
 0x1f3   : > { %v2757_v3 = vmax.f32 %v2745_v54, %v605_v63  ;;  %709 = vperm.xlu1 %2059, %v2719_v43   ;;  %1204 = vst.msk [vmem:[#allocation2 + $0x40] sm:$0xff] %vm306_vm0, %v2752_v60 }
 0x1f4   : > { %v607_v8 = vpop.xlane.xlu0 %606 }
 0x1f5   : > { %1205 = vst.msk [vmem:[#allocation2 + $0x48] sm:$0xff] %vm306_vm0, %v2757_v3  ;;  %729 = vperm.xlu0 %2058, %v2757_v3   ;;  %v2772_v12 = vmax.f32 %v2754_v0, %v607_v8  ;;  %v3083_v45 = vsub.f32 %v2745_v54, %v2757_v3 }
 0x1f6   : > { %v609_v13 = vpop.xlane.xlu1 %608 }
 0x1f7   : > { %v2777_v17 = vmax.f32 %v2764_v5, %v609_v13  ;;  %704 = vperm.xlu1 %2059, %v2714_v40   ;;  %1206 = vst.msk [vmem:[#allocation2 + $0x50] sm:$0xff] %vm306_vm0, %v2772_v12 }
 0x1f8   : > { %v611_v25 = vpop.xlane.xlu0 %610 }
 0x1f9   : > { %1207 = vst.msk [vmem:[#allocation2 + $0x58] sm:$0xff] %vm306_vm0, %v2777_v17  ;;  %739 = vperm.xlu0 %2058, %v2777_v17   ;;  %v2792_v33 = vmax.f32 %v2774_v16, %v611_v25 }
 0x1fa   : > { %v613_v38 = vpop.xlane.xlu1 %612 }
 0x1fb   : > { %v2797_v46 = vmax.f32 %v2784_v22, %v613_v38  ;;  %719 = vperm.xlu1 %2059, %v2738_v51   ;;  %1208 = vst.msk [vmem:[#allocation2 + $0x60] sm:$0xff] %vm306_vm0, %v2792_v33  ;;  %v3086_v3 = vsub.f32 %v2774_v16, %v2792_v33 }
 0x1fc   : > { %v615_v63 = vpop.xlane.xlu0 %614 }
 0x1fd   : > { %1209 = vst.msk [vmem:[#allocation2 + $0x68] sm:$0xff] %vm306_vm0, %v2797_v46  ;;  %749 = vperm.xlu0 %2058, %v2797_v46   ;;  %v2812_v13 = vmax.f32 %v2794_v41, %v615_v63 }
 0x1fe   : > { %v617_v25 = vpop.xlane.xlu1 %616 }
 0x1ff   : > { %v2815_v38 = vmax.f32 %v2804_v56, %v617_v25  ;;  %714 = vperm.xlu1 %2059, %v2733_v48   ;;  %1210 = vst.msk [vmem:[#allocation2 + $0x70] sm:$0xff] %vm306_vm0, %v2812_v13  ;;  %v668_v48 = vmul.f32 1.442695, %v3083_v45 }
 0x201   : > { %1211 = vst.msk [vmem:[#allocation2 + $0x78] sm:$0xff] %vm306_vm0, %v2815_v38  ;;  %759 = vperm.xlu0 %2058, %v2815_v38  }
 0x203   : > { %724 = vperm.xlu1 %2059, %v2752_v60  }
 0x207   : > { %734 = vperm.xlu1 %2059, %v2772_v12  }
 0x20b   : > { %744 = vperm.xlu1 %2059, %v2792_v33   ;;  %v3089_v33 = vsub.f32 %v2804_v56, %v2815_v38  ;;  %v1374_v38 = vld [vmem:[#allocation10 + $0x78] sm:$0xff] }
 0x20c   : > { %1917 = vmatprep.subr.mxu1 %v1374_v38 }
 0x20f   : > { %754 = vperm.xlu1 %2059, %v2812_v13  }
 0x25e   : > { %v685_v63 = vpop.permute.xlu0 %684 }
 0x25f   : > { %v762_v25 = vsub.f32 %v2577_v53, %v685_v63 }
 0x261   : > { %v778_v49 = vmul.f32 1.442695, %v762_v25 }
 0x262   : > { %v690_v29 = vpop.permute.xlu1 %689 }
 0x263   : > { %2060 = vpow2.f32 %v778_v49  ;;  %v763_v8 = vsub.f32 %v2587_v57, %v690_v29 }
 0x265   : > { %v780_v18 = vmul.f32 1.442695, %v763_v8 }
 0x266   : > { %v700_v9 = vpop.permute.xlu1 %699 }
 0x267   : > { %2062 = vpow2.f32 %v780_v18  ;;  %v765_v4 = vsub.f32 %v2582_v55, %v700_v9 }
 0x269   : > { %v784_v59 = vmul.f32 1.442695, %v765_v4 }
 0x26a   : > { %v695_v52 = vpop.permute.xlu1 %694 }
 0x26b   : > { %2064 = vpow2.f32 %v784_v59  ;;  %v764_v47 = vsub.f32 %v2591_v58, %v695_v52 }
 0x26d   : > { %v782_v44 = vmul.f32 1.442695, %v764_v47 }
 0x26e   : > { %v710_v31 = vpop.permute.xlu1 %709 }
 0x26f   : > { %2066 = vpow2.f32 %v782_v44  ;;  %v767_v53 = vsub.f32 %v2597_v61, %v710_v31 }
 0x270   : > { %v2061_v63 = vpop.eup %2060  ;;  %v730_v25 = vpop.permute.xlu0 %729 }
 0x271   : > { %v788_v49 = vmul.f32 1.442695, %v767_v53  ;;  %842 = vadd.xlane.f32.xlu1 %v2061_v63  ;;  %1893 = vmatprep.mubr.f32.mxu1 %v2061_v63  ;;  %v771_v61 = vsub.f32 %v2617_v6, %v730_v25 }
 0x272   : > { %v705_v57 = vpop.permute.xlu1 %704 }
 0x273   : > { %2068 = vpow2.f32 %v788_v49  ;;  %v766_v18 = vsub.f32 %v2601_v62, %v705_v57  ;;  %v796_v8 = vmul.f32 1.442695, %v771_v61 }
 0x274   : > { %v2063_v55 = vpop.eup %2062  ;;  %v740_v9 = vpop.permute.xlu0 %739 }
 0x275   : > { %v786_v4 = vmul.f32 1.442695, %v766_v18  ;;  %844 = vadd.xlane.f32.xlu0 %v2063_v55  ;;  %1894 = vmatmul.mubr.f32.vlgmr.msra.gmra.mxu1 %v2063_v55  ;;  %v773_v53 = vsub.f32 %v2627_v10, %v740_v9 }
 0x276   : > { %v720_v58 = vpop.permute.xlu1 %719  ;;  %1918 = vmatpush3.msra.mxu1 %v1374_v38 }
 0x277   : > { %2070 = vpow2.f32 %v786_v4  ;;  %v769_v44 = vsub.f32 %v2607_v1, %v720_v58  ;;  %v800_v25 = vmul.f32 1.442695, %v773_v53 }
 0x278   : > { %v2065_v47 = vpop.eup %2064  ;;  %v750_v59 = vpop.permute.xlu0 %749 }
 0x279   : > { %v792_v31 = vmul.f32 1.442695, %v769_v44  ;;  %848 = vadd.xlane.f32.xlu1 %v2065_v47  ;;  %v775_v57 = vsub.f32 %v2637_v14, %v750_v59 }
 0x27a   : > { %v715_v52 = vpop.permute.xlu1 %714 }
 0x27b   : > { %2072 = vpow2.f32 %v792_v31  ;;  %v768_v29 = vsub.f32 %v2611_v2, %v715_v52  ;;  %v804_v9 = vmul.f32 1.442695, %v775_v57 }
 0x27c   : > { %v2067_v62 = vpop.eup %2066  ;;  %v760_v18 = vpop.permute.xlu0 %759 }
 0x27d   : > { %v790_v63 = vmul.f32 1.442695, %v768_v29  ;;  %846 = vadd.xlane.f32.xlu0 %v2067_v62  ;;  %1896 = vmatprep.mubr.f32.mxu1 %v2067_v62  ;;  %v777_v58 = vsub.f32 %v2663_v19, %v760_v18  ;;  %v3084_v18 = vsub.f32 %v2754_v0, %v2772_v12  ;;  %v3087_v12 = vsub.f32 %v2784_v22, %v2797_v46 }
 0x27e   : > { %v725_v49 = vpop.permute.xlu1 %724  ;;  %1897 = vmatmul.mubr.f32.gmra.mxu1 %v2065_v47 }
 0x27f   : > { %2074 = vpow2.f32 %v790_v63  ;;  %v770_v1 = vsub.f32 %v2621_v7, %v725_v49  ;;  %v808_v61 = vmul.f32 1.442695, %v777_v58  ;;  %v652_v49 = vmul.f32 1.442695, %v635_v35 }
 0x280   : > { %v2069_v6 = vpop.eup %2068  ;;  %2076 = vpow2.f32 %v796_v8  ;;  %v3078_v35 = vsub.f32 %v2697_v34, %v2714_v40  ;;  %v664_v34 = vmul.f32 1.442695, %v3081_v28  ;;  %v3082_v40 = vsub.f32 %v2735_v50, %v2752_v60 }
 0x281   : > { %v794_v55 = vmul.f32 1.442695, %v770_v1  ;;  %852 = vadd.xlane.f32.xlu1 %v2069_v6  ;;  %v3085_v60 = vsub.f32 %v2764_v5, %v2777_v17  ;;  %v3088_v17 = vsub.f32 %v2794_v41, %v2812_v13  ;;  %v680_v58 = vmul.f32 1.442695, %v3089_v33 }
 0x282   : > { %v735_v2 = vpop.permute.xlu1 %734  ;;  %v658_v57 = vmul.f32 1.442695, %v3078_v35  ;;  %v666_v42 = vmul.f32 1.442695, %v3082_v40  ;;  %v812_v35 = vld [vmem:[#allocation3 + $0x10] sm:$0xff] }
 0x283   : > { %2078 = vpow2.f32 %v794_v55  ;;  %v772_v10 = vsub.f32 %v2631_v11, %v735_v2  ;;  %v670_v55 = vmul.f32 1.442695, %v3084_v18  ;;  %v672_v2 = vmul.f32 1.442695, %v3085_v60  ;;  %v816_v60 = vld [vmem:[#allocation3 + $0x30] sm:$0xff] }
 0x284   : > { %v2071_v4 = vpop.eup %2070  ;;  %2080 = vpow2.f32 %v800_v25  ;;  %v650_v25 = vmul.f32 1.442695, %v634_v27 }
 0x285   : > { %v798_v44 = vmul.f32 1.442695, %v772_v10  ;;  %850 = vadd.xlane.f32.xlu0 %v2071_v4  ;;  %1899 = vmatprep.mubr.f32.mxu1 %v2071_v4  ;;  %v674_v10 = vmul.f32 1.442695, %v3086_v3  ;;  %v676_v4 = vmul.f32 1.442695, %v3087_v12 }
 0x286   : > { %v745_v7 = vpop.permute.xlu1 %744  ;;  %1900 = vmatmul.mubr.f32.gmra.mxu1 %v2069_v6  ;;  %v654_v6 = vmul.f32 1.442695, %v636_v39  ;;  %v1361_v12 = vld [vmem:[#allocation10 + $0x10] sm:$0xff] }
 0x287   : > { %2082 = vpow2.f32 %v798_v44  ;;  %v774_v14 = vsub.f32 %v2641_v15, %v745_v7  ;;  %v1373_v44 = vld [vmem:[#allocation10 + $0x70] sm:$0xff]  ;;  %v1372_v7 = vld [vmem:[#allocation10 + $0x68] sm:$0xff] }
 0x288   : > { %v2073_v47 = vpop.eup %2072  ;;  %2084 = vpow2.f32 %v804_v9  ;;  %v678_v9 = vmul.f32 1.442695, %v3088_v17  ;;  %1919 = vmatprep.subr.mxu1 %v1373_v44 }
 0x289   : > { %v802_v31 = vmul.f32 1.442695, %v774_v14  ;;  %856 = vadd.xlane.f32.xlu1 %v2073_v47  ;;  %1920 = vmatpush3.msra.mxu1 %v1373_v44  ;;  %v1371_v14 = vld [vmem:[#allocation10 + $0x60] sm:$0xff] }
 0x28a   : > { %v755_v52 = vpop.permute.xlu1 %754  ;;  %1921 = vmatprep.subr.mxu1 %v1372_v7 }
 0x28b   : > { %2086 = vpow2.f32 %v802_v31  ;;  %v776_v11 = vsub.f32 %v2667_v20, %v755_v52  ;;  %1922 = vmatpush3.msra.mxu1 %v1372_v7  ;;  %v1368_v31 = vld [vmem:[#allocation10 + $0x48] sm:$0xff]  ;;  %v1367_v52 = vld [vmem:[#allocation10 + $0x40] sm:$0xff]  ;;  %v821_v7 = vld [vmem:[#allocation3 + $0x58] sm:$0xff] }
 0x28c   : > { %v2075_v59 = vpop.eup %2074  ;;  %2088 = vpow2.f32 %v808_v61  ;;  %1923 = vmatprep.subr.mxu1 %v1371_v14  ;;  %v1369_v61 = vld [vmem:[#allocation10 + $0x50] sm:$0xff] }
 0x28d   : > { %v2077_v19 = vpop.eup %2076  ;;  %v806_v29 = vmul.f32 1.442695, %v776_v11  ;;  %854 = vadd.xlane.f32.xlu0 %v2075_v59  ;;  %1902 = vmatprep.mubr.f32.mxu1 %v2075_v59  ;;  %v1366_v11 = vld [vmem:[#allocation10 + $0x38] sm:$0xff]  ;;  %v1365_v59 = vld [vmem:[#allocation10 + $0x30] sm:$0xff] }
 0x28e   : > { %860 = vadd.xlane.f32.xlu1 %v2077_v19  ;;  %1903 = vmatmul.mubr.f32.gmra.mxu1 %v2073_v47  ;;  %v1370_v47 = vld [vmem:[#allocation10 + $0x58] sm:$0xff] }
 0x28f   : > { %2090 = vpow2.f32 %v806_v29  ;;  %1924 = vmatpush3.msra.mxu1 %v1371_v14  ;;  %v810_v29 = vld [vmem:[#allocation3] sm:$0xff] }
 0x290   : > { %v2079_v62 = vpop.eup %2078  ;;  %2092 = vpow2.f32 %v652_v49  ;;  %1925 = vmatprep.subr.mxu1 %v1370_v47  ;;  %v1359_v14 = vld [vmem:[#allocation10] sm:$0xff] }
 0x291   : > { %v2081_v15 = vpop.eup %2080  ;;  %858 = vadd.xlane.f32.xlu0 %v2079_v62  ;;  %1905 = vmatprep.mubr.f32.mxu1 %v2079_v62  ;;  %2094 = vpow2.f32 %v654_v6  ;;  %v1363_v62 = vld [vmem:[#allocation10 + $0x20] sm:$0xff]  ;;  %v813_v6 = vld [vmem:[#allocation3 + $0x18] sm:$0xff] }
 0x292   : > { %864 = vadd.xlane.f32.xlu1 %v2081_v15  ;;  %1906 = vmatmul.mubr.f32.gmra.mxu1 %v2077_v19  ;;  %2096 = vpow2.f32 %v650_v25  ;;  %v1364_v19 = vld [vmem:[#allocation10 + $0x28] sm:$0xff] }
 0x293   : > { %2098 = vpow2.f32 %v656_v32  ;;  %1926 = vmatpush3.msra.mxu1 %v1370_v47 }
 0x294   : > { %v2083_v8 = vpop.eup %2082  ;;  %2100 = vpow2.f32 %v658_v57  ;;  %1927 = vmatprep.subr.mxu1 %v1369_v61 }
 0x295   : > { %v2085_v53 = vpop.eup %2084  ;;  %862 = vadd.xlane.f32.xlu0 %v2083_v8  ;;  %1908 = vmatprep.mubr.f32.mxu1 %v2083_v8  ;;  %2102 = vpow2.f32 %v660_v36 }
 0x296   : > { %868 = vadd.xlane.f32.xlu1 %v2085_v53  ;;  %1909 = vmatmul.mubr.f32.gmra.mxu1 %v2081_v15  ;;  %2104 = vpow2.f32 %v662_v23  ;;  %v1362_v15 = vld [vmem:[#allocation10 + $0x18] sm:$0xff] }
 0x297   : > { %2106 = vpow2.f32 %v664_v34  ;;  %1928 = vmatpush3.msra.mxu1 %v1369_v61  ;;  %v814_v34 = vld [vmem:[#allocation3 + $0x20] sm:$0xff] }
 0x298   : > { %v2087_v20 = vpop.eup %2086  ;;  %2108 = vpow2.f32 %v666_v42  ;;  %1929 = vmatprep.subr.mxu1 %v1368_v31 }
 0x299   : > { %v2089_v63 = vpop.eup %2088  ;;  %866 = vadd.xlane.f32.xlu0 %v2087_v20  ;;  %1911 = vmatprep.mubr.f32.mxu1 %v2087_v20  ;;  %2110 = vpow2.f32 %v668_v48  ;;  %v811_v20 = vld [vmem:[#allocation3 + $0x8] sm:$0xff] }
 0x29a   : > { %872 = vadd.xlane.f32.xlu1 %v2089_v63  ;;  %1912 = vmatmul.mubr.f32.gmra.mxu1 %v2085_v53  ;;  %2112 = vpow2.f32 %v670_v55 }
 0x29b   : > { %2114 = vpow2.f32 %v672_v2  ;;  %1930 = vmatpush3.msra.mxu1 %v1368_v31 }
 0x29c   : > { %v2091_v1 = vpop.eup %2090  ;;  %2116 = vpow2.f32 %v674_v10  ;;  %1931 = vmatprep.subr.mxu1 %v1367_v52  ;;  %v819_v10 = vld [vmem:[#allocation3 + $0x48] sm:$0xff] }
 0x29d   : > { %870 = vadd.xlane.f32.xlu0 %v2091_v1  ;;  %1914 = vmatprep.mubr.f32.mxu1 %v2091_v1  ;;  %v2865_v39 = vpop.eup %2092  ;;  %2118 = vpow2.f32 %v676_v4  ;;  %v1360_v4 = vld [vmem:[#allocation10 + $0x8] sm:$0xff] }
 0x29e   : > { %1915 = vmatmul.mubr.f32.gmra.mxu1 %v2089_v63  ;;  %v2871_v24 = vpop.eup %2094  ;;  %2120 = vpow2.f32 %v678_v9  ;;  %v827_v49 = vmul.f32 %v2865_v39, %v811_v20 }
 0x29f   : > { %v2874_v27 = vpop.eup %2096  ;;  %2122 = vpow2.f32 %v680_v58  ;;  %1932 = vmatpush3.msra.mxu1 %v1367_v52  ;;  %v828_v30 = vmul.f32 %v2871_v24, %v812_v35  ;;  %v820_v52 = vld [vmem:[#allocation3 + $0x50] sm:$0xff] }
 0x2a0   : > { %v2879_v37 = vpop.eup %2098  ;;  %1933 = vmatprep.subr.mxu1 %v1366_v11  ;;  %v826_v8 = vmul.f32 %v2874_v27, %v810_v29  ;;  %v823_v29 = vld [vmem:[#allocation3 + $0x68] sm:$0xff] }
 0x2a1   : > { %v2886_v43 = vpop.eup %2100  ;;  %1934 = vmatpush3.msra.mxu1 %v1366_v11  ;;  %v829_v26 = vmul.f32 %v2879_v37, %v813_v6 }
 0x2a2   : > { %v2892_v51 = vpop.eup %2102  ;;  %1935 = vmatprep.subr.mxu1 %v1365_v59  ;;  %v830_v42 = vmul.f32 %v2886_v43, %v814_v34 }
 0x2a3   : > { %v2898_v50 = vpop.eup %2104  ;;  %1936 = vmatpush3.msra.mxu1 %v1365_v59 }
 0x2a4   : > { %v2904_v54 = vpop.eup %2106  ;;  %1937 = vmatprep.subr.mxu1 %v1364_v19 }
 0x2a5   : > { %v2910_v0 = vpop.eup %2108  ;;  %1938 = vmatpush3.msra.mxu1 %v1364_v19 }
 0x2a6   : > { %v2916_v5 = vpop.eup %2110  ;;  %1939 = vmatprep.subr.mxu1 %v1363_v62 }
 0x2a7   : > { %v2922_v16 = vpop.eup %2112  ;;  %1940 = vmatpush3.msra.mxu1 %v1363_v62  ;;  %v835_v9 = vmul.f32 %v2916_v5, %v819_v10 }
 0x2a8   : > { %v2928_v22 = vpop.eup %2114  ;;  %1941 = vmatprep.subr.mxu1 %v1362_v15 }
 0x2a9   : > { %v2931_v46 = vpop.eup %2116  ;;  %1942 = vmatpush3.msra.mxu1 %v1362_v15  ;;  %v836_v15 = vmul.f32 %v2922_v16, %v820_v52 }
 0x2aa   : > { %v2934_v41 = vpop.eup %2118  ;;  %1943 = vmatprep.subr.mxu1 %v1361_v12 }
 0x2ab   : > { %930 = vperm.xlu1 %2059, %v2865_v39   ;;  %v2937_v13 = vpop.eup %2120  ;;  %v831_v39 = vmul.f32 %v2892_v51, %v815_v21  ;;  %1944 = vmatpush3.msra.mxu1 %v1361_v12 }
 0x2ac   : > { %v2940_v56 = vpop.eup %2122  ;;  %1945 = vmatprep.subr.mxu1 %v1360_v4 }
 0x2ad   : > { %1946 = vmatpush3.msra.mxu1 %v1360_v4 }
 0x2ae   : > { %1947 = vmatprep.subr.mxu1 %v1359_v14 }
 0x2af   : > { %935 = vperm.xlu1 %2059, %v2871_v24   ;;  %v817_v24 = vld [vmem:[#allocation3 + $0x38] sm:$0xff]  ;;  %1948 = vmatpush3.msra.mxu1 %v1359_v14 }
 0x2b0   : > { %v833_v55 = vmul.f32 %v2904_v54, %v817_v24 }
 0x2b3   : > { %940 = vperm.xlu1 %2059, %v2879_v37   ;;  %925 = vperm.xlu0 %2058, %v2874_v27  }
 0x2b7   : > { %945 = vperm.xlu1 %2059, %v2886_v43   ;;  %v832_v43 = vmul.f32 %v2898_v50, %v816_v60 }
 0x2bb   : > { %950 = vperm.xlu1 %2059, %v2892_v51  }
 0x2bf   : > { %955 = vperm.xlu1 %2059, %v2898_v50  }
 0x2c3   : > { %960 = vperm.xlu1 %2059, %v2904_v54   ;;  %v818_v54 = vld [vmem:[#allocation3 + $0x40] sm:$0xff] }
 0x2c4   : > { %v834_v50 = vmul.f32 %v2910_v0, %v818_v54 }
 0x2c7   : > { %965 = vperm.xlu1 %2059, %v2910_v0  }
 0x2cb   : > { %970 = vperm.xlu1 %2059, %v2916_v5   ;;  %v837_v5 = vmul.f32 %v2928_v22, %v821_v7 }
 0x2cf   : > { %975 = vperm.xlu1 %2059, %v2922_v16  }
 0x2d3   : > { %980 = vperm.xlu1 %2059, %v2928_v22   ;;  %v822_v22 = vld [vmem:[#allocation3 + $0x60] sm:$0xff] }
 0x2d7   : > { %985 = vperm.xlu1 %2059, %v2931_v46  }
 0x2db   : > { %990 = vperm.xlu1 %2059, %v2934_v41  }
 0x2df   : > { %995 = vperm.xlu1 %2059, %v2937_v13  }
 0x2e3   : > { %1000 = vperm.xlu1 %2059, %v2940_v56  }
 0x2fa   : > { %v843_v53 = vpop.xlane.xlu1 %842 }
 0x2fb   : > { %v874_v63 = vadd.f32 %v843_v53, %v826_v8  ;;  %v839_v8 = vmul.f32 %v2934_v41, %v823_v29  ;;  %v824_v41 = vld [vmem:[#allocation3 + $0x70] sm:$0xff] }
 0x2fc   : > { %v840_v21 = vmul.f32 %v2937_v13, %v824_v41 }
 0x2fd   : > { %891 = vst.msk [vmem:[#allocation3] sm:$0xff] %vm306_vm0, %v874_v63 }
 0x2fe   : > { %v845_v1 = vpop.xlane.xlu0 %844 }
 0x2ff   : > { %v875_v25 = vadd.f32 %v845_v1, %v827_v49  ;;  %v825_v1 = vld [vmem:[#allocation3 + $0x78] sm:$0xff] }
 0x301   : > { %892 = vst.msk [vmem:[#allocation3 + $0x8] sm:$0xff] %vm306_vm0, %v875_v25  ;;  %v838_v25 = vmul.f32 %v2931_v46, %v822_v22 }
 0x302   : > { %v849_v32 = vpop.xlane.xlu1 %848 }
 0x303   : > { %v877_v57 = vadd.f32 %v849_v32, %v829_v26  ;;  %v841_v26 = vmul.f32 %v2940_v56, %v825_v1 }
 0x304   : > { %v1231_v40 = vld [vmem:[#allocation3] sm:$0xff] }
 0x305   : > { %894 = vst.msk [vmem:[#allocation3 + $0x18] sm:$0xff] %vm306_vm0, %v877_v57 }
 0x306   : > { %v847_v36 = vpop.xlane.xlu0 %846 }
 0x307   : > { %v876_v23 = vadd.f32 %v847_v36, %v828_v30 }
 0x308   : > { %v1232_v27 = vld [vmem:[#allocation3 + $0x8] sm:$0xff] }
 0x309   : > { %893 = vst.msk [vmem:[#allocation3 + $0x10] sm:$0xff] %vm306_vm0, %v876_v23  ;;  %2124 = vrcp.f32 %v1232_v27 }
 0x30a   : > { %v853_v28 = vpop.xlane.xlu1 %852  ;;  %2126 = vrcp.f32 %v1231_v40 }
 0x30b   : > { %v879_v37 = vadd.f32 %v853_v28, %v831_v39 }
 0x30c   : > { %v1234_v48 = vld [vmem:[#allocation3 + $0x18] sm:$0xff] }
 0x30d   : > { %896 = vst.msk [vmem:[#allocation3 + $0x28] sm:$0xff] %vm306_vm0, %v879_v37  ;;  %2128 = vrcp.f32 %v1234_v48 }
 0x30e   : > { %v851_v45 = vpop.xlane.xlu0 %850 }
 0x30f   : > { %v878_v18 = vadd.f32 %v851_v45, %v830_v42 }
 0x310   : > { %v1233_v2 = vld [vmem:[#allocation3 + $0x10] sm:$0xff] }
 0x311   : > { %895 = vst.msk [vmem:[#allocation3 + $0x20] sm:$0xff] %vm306_vm0, %v878_v18  ;;  %2130 = vrcp.f32 %v1233_v2 }
 0x312   : > { %v857_v51 = vpop.xlane.xlu1 %856 }
 0x313   : > { %v881_v3 = vadd.f32 %v857_v51, %v833_v55 }
 0x314   : > { %v1236_v58 = vld [vmem:[#allocation3 + $0x28] sm:$0xff] }
 0x315   : > { %898 = vst.msk [vmem:[#allocation3 + $0x38] sm:$0xff] %vm306_vm0, %v881_v3  ;;  %2132 = vrcp.f32 %v1236_v58 }
 0x316   : > { %v2125_v17 = vpop.eup %2124  ;;  %v855_v33 = vpop.xlane.xlu0 %854 }
 0x317   : > { %v861_v38 = vpop.xlane.xlu1 %860  ;;  %v880_v44 = vadd.f32 %v855_v33, %v832_v43  ;;  %1270 = vperm.xlu0 %2058, %v2125_v17   ;;  %v2127_v61 = vpop.eup %2126 }
 0x318   : > { %v883_v47 = vadd.f32 %v861_v38, %v835_v9  ;;  %v1235_v11 = vld [vmem:[#allocation3 + $0x20] sm:$0xff] }
 0x319   : > { %897 = vst.msk [vmem:[#allocation3 + $0x30] sm:$0xff] %vm306_vm0, %v880_v44  ;;  %2134 = vrcp.f32 %v1235_v11 }
 0x31a   : > { %900 = vst.msk [vmem:[#allocation3 + $0x48] sm:$0xff] %vm306_vm0, %v883_v47  ;;  %v859_v31 = vpop.xlane.xlu0 %858  ;;  %v2129_v0 = vpop.eup %2128 }
 0x31b   : > { %v865_v59 = vpop.xlane.xlu1 %864  ;;  %v882_v19 = vadd.f32 %v859_v31, %v834_v50  ;;  %1265 = vperm.xlu0 %2058, %v2127_v61  }
 0x31c   : > { %v885_v62 = vadd.f32 %v865_v59, %v837_v5  ;;  %v1238_v20 = vld [vmem:[#allocation3 + $0x38] sm:$0xff] }
 0x31d   : > { %899 = vst.msk [vmem:[#allocation3 + $0x40] sm:$0xff] %vm306_vm0, %v882_v19  ;;  %2136 = vrcp.f32 %v1238_v20 }
 0x31e   : > { %902 = vst.msk [vmem:[#allocation3 + $0x58] sm:$0xff] %vm306_vm0, %v885_v62  ;;  %v863_v53 = vpop.xlane.xlu0 %862  ;;  %v2131_v16 = vpop.eup %2130 }
 0x31f   : > { %v869_v63 = vpop.xlane.xlu1 %868  ;;  %v884_v49 = vadd.f32 %v863_v53, %v836_v15  ;;  %1280 = vperm.xlu0 %2058, %v2129_v0  }
 0x320   : > { %v887_v6 = vadd.f32 %v869_v63, %v839_v8  ;;  %v1237_v35 = vld [vmem:[#allocation3 + $0x30] sm:$0xff] }
 0x321   : > { %901 = vst.msk [vmem:[#allocation3 + $0x50] sm:$0xff] %vm306_vm0, %v884_v49  ;;  %2138 = vrcp.f32 %v1237_v35  ;;  %v1240_v27 = vld [vmem:[#allocation3 + $0x48] sm:$0xff] }
 0x322   : > { %904 = vst.msk [vmem:[#allocation3 + $0x68] sm:$0xff] %vm306_vm0, %v887_v6  ;;  %v867_v32 = vpop.xlane.xlu0 %866  ;;  %v2133_v23 = vpop.eup %2132  ;;  %2140 = vrcp.f32 %v1240_v27 }
 0x323   : > { %v873_v57 = vpop.xlane.xlu1 %872  ;;  %v886_v30 = vadd.f32 %v867_v32, %v838_v25  ;;  %1275 = vperm.xlu0 %2058, %v2131_v16  }
 0x324   : > { %v889_v36 = vadd.f32 %v873_v57, %v841_v26  ;;  %v1239_v28 = vld [vmem:[#allocation3 + $0x40] sm:$0xff] }
 0x325   : > { %903 = vst.msk [vmem:[#allocation3 + $0x60] sm:$0xff] %vm306_vm0, %v886_v30  ;;  %2142 = vrcp.f32 %v1239_v28  ;;  %v1242_v34 = vld [vmem:[#allocation3 + $0x58] sm:$0xff] }
 0x326   : > { %906 = vst.msk [vmem:[#allocation3 + $0x78] sm:$0xff] %vm306_vm0, %v889_v36  ;;  %v871_v46 = vpop.xlane.xlu0 %870  ;;  %v2135_v56 = vpop.eup %2134  ;;  %2144 = vrcp.f32 %v1242_v34 }
 0x327   : > { %v888_v39 = vadd.f32 %v871_v46, %v840_v21  ;;  %1290 = vperm.xlu0 %2058, %v2133_v23   ;;  %v931_v4 = vpop.permute.xlu1 %930 }
 0x328   : > { %v1241_v42 = vld [vmem:[#allocation3 + $0x50] sm:$0xff]  ;;  %v1004_v61 = vmul.f32 0.0, %v931_v4 }
 0x329   : > { %905 = vst.msk [vmem:[#allocation3 + $0x70] sm:$0xff] %vm306_vm0, %v888_v39  ;;  %v1244_v18 = vld [vmem:[#allocation3 + $0x68] sm:$0xff] }
 0x32a   : > { %v2137_v40 = vpop.eup %2136 }
 0x32b   : > { %1285 = vperm.xlu0 %2058, %v2135_v56   ;;  %v936_v43 = vpop.permute.xlu1 %935 }
 0x32c   : > { %v1243_v24 = vld [vmem:[#allocation3 + $0x60] sm:$0xff]  ;;  %v1005_v0 = vmul.f32 0.0, %v936_v43 }
 0x32d   : > { %v1246_v60 = vld [vmem:[#allocation3 + $0x78] sm:$0xff] }
 0x32e   : > { %v2139_v13 = vpop.eup %2138  ;;  %v926_v38 = vpop.permute.xlu0 %925 }
 0x32f   : > { %1300 = vperm.xlu0 %2058, %v2137_v40   ;;  %v2141_v45 = vpop.eup %2140  ;;  %v941_v17 = vpop.permute.xlu1 %940  ;;  %v1003_v47 = vmul.f32 0.0, %v926_v38 }
 0x330   : > { %v1245_v37 = vld [vmem:[#allocation3 + $0x70] sm:$0xff]  ;;  %v1006_v8 = vmul.f32 0.0, %v941_v17 }
 0x331   : > { %2146 = vrcp.f32 %v1245_v37 }
 0x332   : > { %2148 = vrcp.f32 %v1241_v42  ;;  %v2143_v48 = vpop.eup %2142 }
 0x333   : > { %1295 = vperm.xlu0 %2058, %v2139_v13   ;;  %2150 = vrcp.f32 %v1243_v24  ;;  %v2145_v55 = vpop.eup %2144  ;;  %v946_v9 = vpop.permute.xlu1 %945 }
 0x334   : > { %2152 = vrcp.f32 %v1244_v18  ;;  %v1007_v26 = vmul.f32 0.0, %v946_v9 }
 0x335   : > { %2154 = vrcp.f32 %v1246_v60  ;;  %v1895_v58 = vpop.f32.mrf.mxu1 }
 0x336   : > { %v1165_v31 = vadd.f32 %v1895_v58, %v1004_v61 }
 0x337   : > { %1310 = vperm.xlu0 %2058, %v2141_v45   ;;  %v951_v33 = vpop.permute.xlu1 %950  ;;  %v1085_v44 = vpop.f32.mrf.mxu1 }
 0x338   : > { %v1164_v5 = vadd.f32 %v1085_v44, %v1003_v47  ;;  %v1008_v35 = vmul.f32 0.0, %v951_v33 }
 0x33b   : > { %1305 = vperm.xlu0 %2058, %v2143_v48   ;;  %v956_v54 = vpop.permute.xlu1 %955 }
 0x33c   : > { %v1009_v56 = vmul.f32 0.0, %v956_v54 }
 0x33e   : > { %v2147_v51 = vpop.eup %2146  ;;  %v1898_v50 = vpop.f32.mrf.mxu1 }
 0x33f   : > { %1335 = vperm.xlu1 %2059, %v2147_v51   ;;  %1320 = vperm.xlu0 %2058, %v2145_v55   ;;  %v2149_v2 = vpop.eup %2148  ;;  %v961_v7 = vpop.permute.xlu1 %960  ;;  %v1167_v63 = vadd.f32 %v1898_v50, %v1006_v8 }
 0x340   : > { %v2151_v3 = vpop.eup %2150  ;;  %v1095_v11 = vpop.f32.mrf.mxu1  ;;  %v1010_v34 = vmul.f32 0.0, %v961_v7 }
 0x341   : > { %v2153_v10 = vpop.eup %2152  ;;  %v1166_v53 = vadd.f32 %v1095_v11, %v1005_v0 }
 0x342   : > { %v2155_v12 = vpop.eup %2154 }
 0x343   : > { %1315 = vperm.xlu0 %2058, %v2149_v2   ;;  %v966_v59 = vpop.permute.xlu1 %965 }
 0x344   : > { %v1011_v55 = vmul.f32 0.0, %v966_v59 }
 0x346   : > { %v1901_v62 = vpop.f32.mrf.mxu1 }
 0x347   : > { %1325 = vperm.xlu0 %2058, %v2151_v3   ;;  %v971_v22 = vpop.permute.xlu1 %970  ;;  %v1169_v30 = vadd.f32 %v1901_v62, %v1008_v35 }
 0x348   : > { %v1105_v20 = vpop.f32.mrf.mxu1  ;;  %v1012_v60 = vmul.f32 0.0, %v971_v22 }
 0x349   : > { %v1168_v57 = vadd.f32 %v1105_v20, %v1007_v26 }
 0x34b   : > { %1330 = vperm.xlu0 %2058, %v2153_v10   ;;  %v976_v32 = vpop.permute.xlu1 %975 }
 0x34c   : > { %v1013_v33 = vmul.f32 0.0, %v976_v32 }
 0x34e   : > { %v1904_v1 = vpop.f32.mrf.mxu1 }
 0x34f   : > { %1340 = vperm.xlu0 %2058, %v2155_v12   ;;  %v981_v27 = vpop.permute.xlu1 %980  ;;  %v1171_v37 = vadd.f32 %v1904_v1, %v1010_v34 }
 0x350   : > { %v1115_v41 = vpop.f32.mrf.mxu1  ;;  %v1014_v38 = vmul.f32 0.0, %v981_v27 }
 0x351   : > { %v1170_v40 = vadd.f32 %v1115_v41, %v1009_v56 }
 0x352   : > { %v1907_v21 = vpop.f32.mrf.mxu1 }
 0x353   : > { %v986_v42 = vpop.permute.xlu1 %985  ;;  %v1173_v10 = vadd.f32 %v1907_v21, %v1012_v60 }
 0x354   : > { %v1125_v28 = vpop.f32.mrf.mxu1  ;;  %v1015_v47 = vmul.f32 0.0, %v986_v42 }
 0x355   : > { %v1172_v2 = vadd.f32 %v1125_v28, %v1011_v55 }
 0x356   : > { %v1910_v45 = vpop.f32.mrf.mxu1 }
 0x357   : > { %v991_v3 = vpop.permute.xlu1 %990  ;;  %v1175_v7 = vadd.f32 %v1910_v45, %v1014_v38 }
 0x358   : > { %v1135_v51 = vpop.f32.mrf.mxu1  ;;  %v1016_v59 = vmul.f32 0.0, %v991_v3 }
 0x359   : > { %v1174_v44 = vadd.f32 %v1135_v51, %v1013_v33 }
 0x35a   : > { %v1913_v4 = vpop.f32.mrf.mxu1 }
 0x35b   : > { %v996_v54 = vpop.permute.xlu1 %995 }
 0x35c   : > { %v1145_v58 = vpop.f32.mrf.mxu1  ;;  %v1017_v62 = vmul.f32 0.0, %v996_v54 }
 0x35e   : > { %v1916_v50 = vpop.f32.mrf.mxu1 }
 0x392   : > { %v1271_v14 = vpop.permute.xlu0 %1270 }
 0x393   : > { %v1344_v29 = vmul.f32 %v1271_v14, %v1165_v31  ;;  %v1176_v31 = vadd.f32 %v1145_v58, %v1015_v47 }
 0x396   : > { %v1266_v52 = vpop.permute.xlu0 %1265 }
 0x397   : > { %v1343_v19 = vmul.f32 %v1266_v52, %v1164_v5  ;;  %v1001_v52 = vpop.permute.xlu1 %1000 }
 0x398   : > { %v1018_v0 = vmul.f32 0.0, %v1001_v52 }
 0x399   : > { %1949 = vmatprep.mubr.f32.mxu1 %v1343_v19  ;;  %v1155_v19 = vpop.f32.mrf.mxu1 }
 0x39a   : > { %1950 = vmatmul.mubr.f32.vlgmr.msra.gmra.mxu1 %v1344_v29  ;;  %v1281_v15 = vpop.permute.xlu0 %1280 }
 0x39b   : > { %v1346_v25 = vmul.f32 %v1281_v15, %v1167_v63  ;;  %v1177_v15 = vadd.f32 %v1913_v4, %v1016_v59 }
 0x39e   : > { %v1276_v49 = vpop.permute.xlu0 %1275 }
 0x39f   : > { %v1345_v6 = vmul.f32 %v1276_v49, %v1166_v53  ;;  %v1178_v53 = vadd.f32 %v1155_v19, %v1017_v62  ;;  %v1179_v49 = vadd.f32 %v1916_v50, %v1018_v0 }
 0x3a1   : > { %1952 = vmatprep.mubr.f32.mxu1 %v1345_v6 }
 0x3a2   : > { %1953 = vmatmul.mubr.f32.gmra.mxu1 %v1346_v25  ;;  %v1291_v16 = vpop.permute.xlu0 %1290  ;;  %v1700_v25 = vld [vmem:[%s3055_s3] ss:$0 sm:$0xff] }
 0x3a3   : > { %v1348_v46 = vmul.f32 %v1291_v16, %v1169_v30 }
 0x3a6   : > { %v1286_v36 = vpop.permute.xlu0 %1285 }
 0x3a7   : > { %v1347_v23 = vmul.f32 %v1286_v36, %v1168_v57 }
 0x3a9   : > { %1955 = vmatprep.mubr.f32.mxu1 %v1347_v23 }
 0x3aa   : > { %1956 = vmatmul.mubr.f32.gmra.mxu1 %v1348_v46  ;;  %v1301_v39 = vpop.permute.xlu0 %1300 }
 0x3ab   : > { %v1350_v48 = vmul.f32 %v1301_v39, %v1171_v37 }
 0x3ae   : > { %v1296_v13 = vpop.permute.xlu0 %1295 }
 0x3af   : > { %v1349_v24 = vmul.f32 %v1296_v13, %v1170_v40 }
 0x3b1   : > { %1958 = vmatprep.mubr.f32.mxu1 %v1349_v24 }
 0x3b2   : > { %1959 = vmatmul.mubr.f32.gmra.mxu1 %v1350_v48  ;;  %v1311_v18 = vpop.permute.xlu0 %1310 }
 0x3b3   : > { %v1352_v17 = vmul.f32 %v1311_v18, %v1173_v10 }
 0x3b6   : > { %v1306_v12 = vpop.permute.xlu0 %1305 }
 0x3b7   : > { %v1351_v43 = vmul.f32 %v1306_v12, %v1172_v2 }
 0x3b9   : > { %1961 = vmatprep.mubr.f32.mxu1 %v1351_v43 }
 0x3ba   : > { %1962 = vmatmul.mubr.f32.gmra.mxu1 %v1352_v17  ;;  %v1321_v9 = vpop.permute.xlu0 %1320  ;;  %v1336_v8 = vpop.permute.xlu1 %1335 }
 0x3bb   : > { %v1354_v5 = vmul.f32 %v1321_v9, %v1175_v7  ;;  %v1357_v63 = vmul.f32 %v1336_v8, %v1178_v53 }
 0x3be   : > { %v1316_v14 = vpop.permute.xlu0 %1315 }
 0x3bf   : > { %v1353_v61 = vmul.f32 %v1316_v14, %v1174_v44 }
 0x3c1   : > { %1964 = vmatprep.mubr.f32.mxu1 %v1353_v61 }
 0x3c2   : > { %1965 = vmatmul.mubr.f32.gmra.mxu1 %v1354_v5  ;;  %v1326_v11 = vpop.permute.xlu0 %1325 }
 0x3c3   : > { %v1355_v29 = vmul.f32 %v1326_v11, %v1176_v31 }
 0x3c5   : > { %1967 = vmatprep.mubr.f32.mxu1 %v1355_v29 }
 0x3c6   : > { %v1331_v22 = vpop.permute.xlu0 %1330 }
 0x3c7   : > { %v1356_v20 = vmul.f32 %v1331_v22, %v1177_v15 }
 0x3c9   : > { %1968 = vmatmul.mubr.f32.gmra.mxu1 %v1356_v20 }
 0x3ca   : > { %1970 = vmatprep.mubr.f32.mxu1 %v1357_v63  ;;  %v1341_v1 = vpop.permute.xlu0 %1340 }
 0x3cb   : > { %v1358_v6 = vmul.f32 %v1341_v1, %v1179_v49 }
 0x3cd   : > { %1971 = vmatmul.mubr.f32.gmra.mxu1 %v1358_v6 }
 0x45a   : > { %v1951_v16 = vpop.f32.mrf.mxu1 }
 0x45b   : > { %v1454_v26 = vadd.f32 %v1951_v16, %v1700_v25 }
 0x45c   : > { %v1448_v32 = vpop.f32.mrf.mxu1 }
 0x45d   : > { %1528 = vst [vmem:[%s2979_s9 + $0x8] sm:$0xff] %v1454_v26  ;;  %v1449_v41 = vadd.f32 %v1700_v25, %v1448_v32 }
 0x45f   : > { %1527 = vst [vmem:[%s2979_s9] sm:$0xff] %v1449_v41 }
 0x462   : > { %v1954_v35 = vpop.f32.mrf.mxu1 }
 0x463   : > { %v1464_v57 = vadd.f32 %v1954_v35, %v1700_v25 }
 0x464   : > { %v1458_v30 = vpop.f32.mrf.mxu1 }
 0x465   : > { %1530 = vst [vmem:[%s2979_s9 + $0x18] sm:$0xff] %v1464_v57  ;;  %v1459_v36 = vadd.f32 %v1700_v25, %v1458_v30 }
 0x467   : > { %1529 = vst [vmem:[%s2979_s9 + $0x10] sm:$0xff] %v1459_v36 }
 0x46a   : > { %v1957_v21 = vpop.f32.mrf.mxu1 }
 0x46b   : > { %v1474_v23 = vadd.f32 %v1957_v21, %v1700_v25 }
 0x46c   : > { %v1468_v46 = vpop.f32.mrf.mxu1 }
 0x46d   : > { %1532 = vst [vmem:[%s2979_s9 + $0x28] sm:$0xff] %v1474_v23  ;;  %v1469_v27 = vadd.f32 %v1700_v25, %v1468_v46 }
 0x46f   : > { %1531 = vst [vmem:[%s2979_s9 + $0x20] sm:$0xff] %v1469_v27 }
 0x472   : > { %v1960_v39 = vpop.f32.mrf.mxu1 }
 0x473   : > { %v1484_v56 = vadd.f32 %v1960_v39, %v1700_v25 }
 0x474   : > { %v1478_v28 = vpop.f32.mrf.mxu1 }
 0x475   : > { %1534 = vst [vmem:[%s2979_s9 + $0x38] sm:$0xff] %v1484_v56  ;;  %v1479_v34 = vadd.f32 %v1700_v25, %v1478_v28 }
 0x477   : > { %1533 = vst [vmem:[%s2979_s9 + $0x30] sm:$0xff] %v1479_v34 }
 0x47a   : > { %v1963_v40 = vpop.f32.mrf.mxu1 }
 0x47b   : > { %v1494_v37 = vadd.f32 %v1963_v40, %v1700_v25 }
 0x47c   : > { %v1488_v13 = vpop.f32.mrf.mxu1 }
 0x47d   : > { %1536 = vst [vmem:[%s2979_s9 + $0x48] sm:$0xff] %v1494_v37  ;;  %v1489_v42 = vadd.f32 %v1700_v25, %v1488_v13 }
 0x47f   : > { %1535 = vst [vmem:[%s2979_s9 + $0x40] sm:$0xff] %v1489_v42 }
 0x482   : > { %v1966_v45 = vpop.f32.mrf.mxu1 }
 0x483   : > { %v1504_v24 = vadd.f32 %v1966_v45, %v1700_v25 }
 0x484   : > { %v1498_v48 = vpop.f32.mrf.mxu1 }
 0x485   : > { %1538 = vst [vmem:[%s2979_s9 + $0x58] sm:$0xff] %v1504_v24  ;;  %v1499_v18 = vadd.f32 %v1700_v25, %v1498_v48 }
 0x487   : > { %1537 = vst [vmem:[%s2979_s9 + $0x50] sm:$0xff] %v1499_v18 }
 0x489   : > { %v1969_v55 = vpop.f32.mrf.mxu1 }
 0x48a   : > { %v1514_v51 = vadd.f32 %v1969_v55, %v1700_v25 }
 0x48b   : > { %v1508_v60 = vpop.f32.mrf.mxu1 }
 0x48c   : > { %1540 = vst [vmem:[%s2979_s9 + $0x68] sm:$0xff] %v1514_v51  ;;  %v1509_v2 = vadd.f32 %v1700_v25, %v1508_v60 }
 0x48d   : > { %v1972_v3 = vpop.f32.mrf.mxu1 }
 0x48e   : > { %1539 = vst [vmem:[%s2979_s9 + $0x60] sm:$0xff] %v1509_v2  ;;  %v1524_v10 = vadd.f32 %v1972_v3, %v1700_v25 }
 0x48f   : > { %v1518_v12 = vpop.f32.mrf.mxu1 }
 0x490   : > { %1542 = vst [vmem:[%s2979_s9 + $0x78] sm:$0xff] %v1524_v10  ;;  %v1519_v4 = vadd.f32 %v1700_v25, %v1518_v12 }
 0x492   : > { %1541 = vst [vmem:[%s2979_s9 + $0x70] sm:$0xff] %v1519_v4 }
 0x493   : > { %2251 = shalt.err (!%p2248_p11)
}
 0x494   : > { %s2252_s30 = scalar_lea.hbm %s3000_s14, 2048  ;;  %s2256_s25 = scalar_lea.hbm %s3056_s4, 4096 }
 0x495   : > { %p2253_p2 = scmp.ne.s32.totalorder %s3000_s14, %s2252_s30  ;;  %p2257_p12 = scmp.lt.s32.totalorder %s3000_s14, %s3056_s4 }
 0x496   : > { %p2258_p13 = scmp.lt.s32.totalorder %s2256_s25, %s2252_s30 }
 0x497   : > { %p2254_p6 = pnand %p2253_p2, %p2450_p0 }
 0x498   : > { %p2259_p3 = por %p2258_p13, %p2257_p12 }
 0x499   : > { %p2255_p9 = pneg %p2254_p6 }
 0x49b   : > { %p2260_p1 = pnand %p2259_p3, %p2255_p9 }
 0x49d   : > { %2263 = shalt.err (!%p2260_p1)
}
 0x49e   : > { %s2337_s21 = smov 128   ;;  %s2338_s23 = smov 8  }
 0x49f   : > { %1981 = dma.vmem_to_hbm [thread:$0]  (%p2450_p0), %s3002_s2, 2048, %s3000_s14, %s1544_s26, %s2337_s21, %s2337_s21, %s2338_s23  }
 0x4a0 PF: > { %s1574_s9 = sand.u32 1, %s2306_s15   ;;  %p3090_p4 = scmp.ne.s32.totalorder %s3066_s24, 0 }
 0x4a1   : > { %p3091_p8 = scmp.ge.s32.totalorder %s2326_s20, 2  ;;  %s1575_s7 = scalar_lea.sflag [#allocation7], %s1574_s9 }
 0x4a3   : > { %p1995_p10 = pnand %p3091_p8, %p3090_p4 }
 0x4a5   : > { %p1996_p5 = pneg %p1995_p10 }
 0x4a7   : > { %2301 = dma.done.wait (%p1996_p5), %s1575_s7, 2048  }
 0x4a8   : > { %2303 = vsyncadd (%p1996_p5), %s1575_s7, 4294965248  ;;  %s23_s20 = sadd.s32 1, %s2326_s20   ;;  %s3092_s18 = sld [smem:[#allocation16_spill]] }
 0x4a9   : > { %p20_p7 = scmp.ge.s32.totalorder %s23_s20, 4   ;;  %s3093_s19 = sld [smem:[#allocation17_spill]] }
 0x4aa   : > { %s3094_s15 = smov %s2310_s16  ;;  %s3095_s16 = smov %s2314_s17 }
 0x4ab   : > { %s3096_s17 = smov %s2459_s22  ;;  %22 = sbr.rel (!%p20_p7) target bundleno = 10 (0xa), region = 106 }
 0x4b0   :  { %1580 = vsyncpa [#allocation6], 1 }
 0x4b1   :  { %1582 = vsyncpa [#allocation6 + $0x1], 1 }
 0x4b2   :  { %1583 = vsyncpa [#allocation9], 1 }
 0x4b3   :  { %1585 = vsyncpa [#allocation9 + $0x1], 1 }
 0x4b4   :  { %1586 = vsyncpa [#allocation7], 1 }
 0x4b5   :  { %1588 = vsyncpa [#allocation7 + $0x1], 1 }

// kernel: tpu_custom_call.1
= control target key start
LH: loop header
LB: loop body
LE: loop exit
PB: predicated region body
PF: predicated region fallthrough
CT: control target
= control target key end

     0   :  { %s3052_s0 = inlined_call_operand.hbm [shape: f32[2,128,128], index: 0, kind: input, shape index: {}]   ;;  %s3053_s1 = inlined_call_operand.hbm [shape: f32[2,128,128], index: 1, kind: input, shape index: {}]   ;;  %s3054_s2 = inlined_call_operand.hbm [shape: f32[128,128], index: 2, kind: input, shape index: {}]   ;;  %s3055_s3 = inlined_call_operand.vmem [shape: f32[1,128], index: 3, kind: input, shape index: {}]   ;;  %s3056_s4 = inlined_call_operand.hbm [shape: f32[2,128,128], index: 4, kind: output, shape index: {}]  }
   0x1   :  { %3063 = sst [smem:[#allocation18_spill]] %s3054_s2 }
   0x2   :  { %9 = vsyncpa [#allocation6], 0 }
   0x3   :  { %11 = vsyncpa [#allocation6 + $0x1], 0 }
   0x4   :  { %12 = vsyncpa [#allocation9], 0 }
   0x5   :  { %14 = vsyncpa [#allocation9 + $0x1], 0 }
   0x6   :  { %15 = vsyncpa [#allocation7], 0 }
   0x7   :  { %17 = vsyncpa [#allocation7 + $0x1], 0  ;;  %s2364_s15 = smov 0   ;;  %s2366_s16 = smov 0  }
   0x8   :  { %s2368_s17 = smov 0   ;;  %s2370_s18 = smov 0  }
   0x9   :  { %s2372_s19 = smov 0   ;;  %s2374_s20 = smov 0  }
   0xa LB: > { %3064 = sst [smem:[#allocation16_spill]] %s2322_s19  ;;  %s2395_s21 = sadd.s32 4294967295, %s2326_s20   ;;  %s2326_s20 = sphi %s2374_s20, %s23_s20   ;;  %s2322_s19 = sphi %s2372_s19, %s3093_s19   ;;  %s2318_s18 = sphi %s2370_s18, %s3092_s18   ;;  %s2314_s17 = sphi %s2368_s17, %s3096_s17   ;;  %s2310_s16 = sphi %s2366_s16, %s3095_s16   ;;  %s2306_s15 = sphi %s2364_s15, %s3094_s15  }
   0xb   : > { %s1685_s22 = sadd.s32 4294967294, %s2326_s20   ;;  %p64_p0 = scmp.ne.s32.totalorder %s2310_s16, %s2306_s15 }
   0xc   : > { %p65_p1 = scmp.eq.s32.totalorder %s2395_s21, 0  ;;  %p166_p3 = scmp.eq.s32.totalorder %s1685_s22, 1 }
   0xd   : > { %p1686_p5 = scmp.ge.s32.totalorder %s2326_s20, 1  ;;  %p173_p7 = scmp.lt.s32.totalorder %s2326_s20, 3 }
   0xe   : > { %p2404_p4 = por %p65_p1, %p64_p0  ;;  %p2409_p6 = por %p166_p3, %p64_p0 }
   0xf   : > { %p2414_p8 = pnand %p1686_p5, %p173_p7  ;;  %s2328_s26 = smov [#allocation10]  }
  0x10   : > { %s3066_s24 = scalar_select %p2409_p6, 1, 0 }
  0x11   : > { %s185_s27 = sshll.u32 %s2328_s26, 4  ;;  %p1983_p9 = pneg %p2414_p8  ;;  %s186_s27 = int_to_ptr.vmem [resolvable:$true] %s185_s27 }
  0x12   : > { %s42_s29 = sadd.s32 1, %s2322_s19  ;;  %s2167_s30 = scalar_lea.vmem %s186_s27, 2048 }
  0x13   : > { %p2423_p11 = pnand %p1983_p9, %p65_p1  ;;  %p2168_p13 = scmp.ne.s32.totalorder %s186_s27, %s2167_s30 }
  0x14   : > { %p2175_p5 = scmp.lt.s32.totalorder %s186_s27, %s186_s27  ;;  %p2176_p7 = scmp.lt.s32.totalorder %s2167_s30, %s2167_s30 }
  0x15   : > { %p2158_p12 = pneg %p2423_p11 }
  0x16   : > { %p2177_p2 = por %p2176_p7, %p2175_p5 }
  0x17   : > { %p2170_p0 = pnand %p2168_p13, %p2158_p12 }
  0x19   : > { %p2171_p3 = pneg %p2170_p0 }
  0x1b   : > { %p2178_p6 = pnand %p2177_p2, %p2171_p3 }
  0x1d   : > { %2181 = shalt.err (!%p2178_p6)
}
  0x1e   : > { %s3057_s5 = smov 128   ;;  %s3059_s6 = smov 8  }
  0x1f   : > { %s3069_s2 = sld [smem:[#allocation18_spill]]  ;;  %p44_p2 = scmp.ge.s32.totalorder %s42_s29, 2 }
  0x20   : > { %s51_s9 = sadd.s32 1, %s2314_s17  ;;  %p58_p6 = scmp.ne.s32.totalorder %s2314_s17, %s2310_s16 }
  0x21   : > { %p59_p9 = scmp.eq.s32.totalorder %s2326_s20, 0  ;;  %s3098_s29 = smov (%p44_p2, %s42_s29), 0 }
  0x22   : > { %3070 = sst [smem:[#allocation17_spill]] %s3098_s29  ;;  %p3072_p13 = scmp.eq.s32.totalorder %s2395_s21, 1 }
  0x23   : > { %p2444_p12 = por %p59_p9, %p58_p6  ;;  %s46_s12 = ssub.s32 %s2322_s19, %s3098_s29 }
  0x24   : > { %p2450_p0 = por %p3072_p13, %p58_p6  ;;  %p1999_p3 = scmp.lt.s32.totalorder %s2326_s20, 2 }
  0x25   : > { %1986 = dma.hbm_to_vmem [thread:$0]  (!%p2423_p11), %s3069_s2, 2048, %s186_s27, [#allocation9], %s3057_s5, %s3057_s5, %s3059_s6  }
  0x26   : > { %p49_p11 = scmp.eq.s32.totalorder %s46_s12, 0  ;;  %s202_s13 = sand.u32 1, %s2314_s17  }
  0x27   : > { %s1689_s14 = sshll.u32 %s202_s13, 7  ;;  %s1706_s26 = sshll.u32 %s2322_s19, 11 }
  0x28   : > { %s2459_s22 = scalar_select %p49_p11, %s2314_s17, %s51_s9  }
  0x29   : > { %s214_s30 = scalar_lea.hbm %s3052_s0, %s1706_s26  ;;  %s206_s7 = scalar_lea.vmem [#allocation5], %s1689_s14 }
  0x2a   : > { %s215_s8 = sshll.u32 %s206_s7, 4  ;;  %p2467_p5 = pnand %p1999_p3, %p2444_p12  ;;  %s216_s8 = int_to_ptr.vmem [resolvable:$true] %s215_s8 }
  0x2b   : > { %s2474_s9 = scalar_lea.hbm %s3053_s1, %s1706_s26  ;;  %s229_s12 = scalar_lea.vmem [#allocation8], %s1689_s14 }
  0x2c   : > { %s238_s29 = sshll.u32 %s229_s12, 4  ;;  %s203_s19 = scalar_lea.sflag [#allocation6], %s202_s13  ;;  %s239_s29 = int_to_ptr.vmem [resolvable:$true] %s238_s29 }
  0x2d   : > { %p2184_p7 = pneg %p2467_p5  ;;  %s2195_s27 = scalar_lea.vmem %s216_s8, 2048 }
  0x2e   : > { %p2196_p2 = scmp.ne.s32.totalorder %s216_s8, %s2195_s27  ;;  %s2331_s10 = smov [#allocation5]  }
  0x2f   : > { %s2200_s28 = sshll.u32 %s2331_s10, 4  ;;  %s2201_s28 = int_to_ptr.vmem [resolvable:$false] %s2200_s28 }
  0x30   : > { %p2198_p6 = pnand %p2196_p2, %p2184_p7  ;;  %s2202_s7 = scalar_lea.vmem %s2201_s28, 4096 }
  0x31   : > { %p2203_p12 = scmp.lt.s32.totalorder %s216_s8, %s2201_s28  ;;  %p2204_p13 = scmp.lt.s32.totalorder %s2202_s7, %s2195_s27 }
  0x32   : > { %p2199_p9 = pneg %p2198_p6 }
  0x33   : > { %p2205_p3 = por %p2204_p13, %p2203_p12 }
  0x35   : > { %p2206_p11 = pnand %p2205_p3, %p2199_p9 }
  0x37   : > { %2209 = shalt.err (!%p2206_p11)
}
  0x38   : > { %s3075_s2 = smov 8   ;;  %s3076_s6 = smov 128  }
  0x39   : > { %1990 = dma.hbm_to_vmem [thread:$0]  (!%p2467_p5), %s214_s30, 2048, %s216_s8, %s203_s19, %s3076_s6, %s3076_s6, %s3075_s2  }
  0x3a   : > { %s225_s13 = sand.u32 1, %s2326_s20   ;;  %s2223_s26 = scalar_lea.vmem %s239_s29, 2048 }
  0x3b   : > { %s226_s14 = scalar_lea.sflag [#allocation9], %s225_s13  ;;  %p2224_p2 = scmp.ne.s32.totalorder %s239_s29, %s2223_s26 }
  0x3c   : > { %s2332_s12 = smov [#allocation8]  }
  0x3d   : > { %p2226_p6 = pnand %p2224_p2, %p2184_p7  ;;  %s2228_s27 = sshll.u32 %s2332_s12, 4  ;;  %s2229_s27 = int_to_ptr.vmem [resolvable:$false] %s2228_s27 }
  0x3e   : > { %s2230_s10 = scalar_lea.vmem %s2229_s27, 4096  ;;  %p2231_p9 = scmp.lt.s32.totalorder %s239_s29, %s2229_s27 }
  0x3f   : > { %p2227_p10 = pneg %p2226_p6  ;;  %p2232_p12 = scmp.lt.s32.totalorder %s2230_s10, %s2223_s26 }
  0x41   : > { %p2233_p13 = por %p2232_p12, %p2231_p9 }
  0x43   : > { %p2234_p3 = pnand %p2233_p13, %p2227_p10 }
  0x45   : > { %2237 = shalt.err (!%p2234_p3)
}
  0x46   : > { %1993 = dma.hbm_to_vmem [thread:$0]  (!%p2467_p5), %s2474_s9, 2048, %s239_s29, %s226_s14, %s3076_s6, %s3076_s6, %s3075_s2  }
  0x47   : > { %250 = sbr.rel (%p2414_p8) target bundleno = 1184 (0x4a0), region = 36  ;;  %s2499_s19 = sand.u32 (!%p2414_p8), 1, %s2310_s16  }
  0x48   : > { %s2502_s30 = sshll.u32 (!%p2414_p8), %s2499_s19, 7  ;;  %s253_s8 = scalar_lea.sflag (!%p2414_p8), [#allocation6], %s2499_s19 }
  0x49   : > { %s2506_s28 = scalar_lea.vmem (!%p2414_p8), [#allocation5], %s2502_s30 }
  0x4c   : > { %2289 = dma.done.wait (%p2404_p4), %s253_s8, 2048  }
  0x4d   : > { %2291 = vsyncadd (%p2404_p4), %s253_s8, 4294965248  ;;  %s261_s25 = sand.u32 1, %s2395_s21   ;;  %s2514_s5 = scalar_lea.vmem [#allocation8], %s2502_s30 }
  0x4e   : > { %s262_s29 = scalar_lea.sflag [#allocation9], %s261_s25 }
  0x4f   : > { %2293 = dma.done.wait (%p2404_p4), %s262_s29, 2048  }
  0x50   : > { %2295 = vsyncadd (%p2404_p4), %s262_s29, 4294965248 }
  0x51   : > { %2297 = dma.done.wait (%p65_p1), [#allocation9], 2048  }
  0x52   : > { %2299 = vsyncadd (%p65_p1), [#allocation9], 4294965248  ;;  %v402_v0 = vld [vmem:[%s2514_s5 + $0x78] sm:$0xff]  ;;  %v401_v1 = vld [vmem:[%s2514_s5 + $0x70] sm:$0xff]  ;;  %vm306_vm0 = vcmask 7168   ;;  %v2333_v48 = vmov -inf   ;;  %v548_v49 = vlaneseq }
  0x53   : > { %1805 = vmatprep.subr.mxu0 %v402_v0  ;;  %1861 = vmatprep.subr.mxu1 %v402_v0  ;;  %v400_v2 = vld [vmem:[%s2514_s5 + $0x68] sm:$0xff]  ;;  %v355_v3 = vld [vmem:[%s2506_s28] sm:$0xff]  ;;  %v398_v6 = vld [vmem:[%s2514_s5 + $0x58] sm:$0xff]  ;;  %307 = vst.msk [vmem:[#allocation2] sm:$0xff] %vm306_vm0, %v2333_v48  ;;  %s2979_s9 = scalar_lea.vmem [#allocation11], %s2502_s30  ;;  %s1708_s7 = sshll.u32 %s2318_s18, 11 }
  0x54   : > { %1806 = vmatpush3.xpose.msra.mxu0 %v402_v0  ;;  %1862 = vmatpush3.msra.mxu1 %v402_v0  ;;  %v399_v4 = vld [vmem:[%s2514_s5 + $0x60] sm:$0xff]  ;;  %v371_v5 = vmul.f32 0.17677669, %v355_v3  ;;  %v397_v7 = vld [vmem:[%s2514_s5 + $0x50] sm:$0xff]  ;;  %v396_v8 = vld [vmem:[%s2514_s5 + $0x48] sm:$0xff]  ;;  %308 = vst.msk [vmem:[#allocation2 + $0x8] sm:$0xff] %vm306_vm0, %v2333_v48  ;;  %s3000_s14 = scalar_lea.hbm %s3056_s4, %s1708_s7 }
  0x55   : > { %1807 = vmatprep.subr.mxu0 %v401_v1  ;;  %1863 = vmatprep.subr.mxu1 %v401_v1  ;;  %v395_v9 = vld [vmem:[%s2514_s5 + $0x40] sm:$0xff]  ;;  %v394_v10 = vld [vmem:[%s2514_s5 + $0x38] sm:$0xff]  ;;  %v393_v11 = vld [vmem:[%s2514_s5 + $0x30] sm:$0xff]  ;;  %309 = vst.msk [vmem:[#allocation2 + $0x10] sm:$0xff] %vm306_vm0, %v2333_v48  ;;  %v2572_v50 = vand.u32 127, %v548_v49  ;;  %v2334_v3 = vmov 0  }
  0x56   : > { %1864 = vmatpush3.msra.mxu1 %v401_v1  ;;  %1837 = vmatprep.mubr.f32.mxu0 %v371_v5  ;;  %v392_v12 = vld [vmem:[%s2514_s5 + $0x28] sm:$0xff]  ;;  %v391_v13 = vld [vmem:[%s2514_s5 + $0x20] sm:$0xff]  ;;  %v390_v14 = vld [vmem:[%s2514_s5 + $0x18] sm:$0xff]  ;;  %310 = vst.msk [vmem:[#allocation2 + $0x18] sm:$0xff] %vm306_vm0, %v2333_v48  ;;  %s1559_s2 = sshll.u32 %s2979_s9, 4  ;;  %s1544_s26 = scalar_lea.sflag [#allocation7], %s2499_s19  ;;  %s3002_s2 = int_to_ptr.vmem [resolvable:$true] %s1559_s2 }
  0x57   : > { %1865 = vmatprep.subr.mxu1 %v400_v2  ;;  %v389_v15 = vld [vmem:[%s2514_s5 + $0x10] sm:$0xff]  ;;  %v388_v16 = vld [vmem:[%s2514_s5 + $0x8] sm:$0xff]  ;;  %v387_v17 = vld [vmem:[%s2514_s5] sm:$0xff]  ;;  %311 = vst.msk [vmem:[#allocation2 + $0x20] sm:$0xff] %vm306_vm0, %v2333_v48  ;;  %vm553_vm1 = vcmp.lt.s32.totalorder %v2572_v50, 8  ;;  %2058 = vset.pattern.permute.xlu0 %v2334_v3  ;;  %s2238_s18 = scalar_lea.vmem %s3002_s2, 2048 }
  0x58   : > { %1808 = vmatpush3.xpose.msra.mxu0 %v401_v1  ;;  %1866 = vmatpush3.msra.mxu1 %v400_v2  ;;  %v356_v18 = vld [vmem:[%s2506_s28 + $0x8] sm:$0xff]  ;;  %v357_v19 = vld [vmem:[%s2506_s28 + $0x10] sm:$0xff]  ;;  %v358_v22 = vld [vmem:[%s2506_s28 + $0x18] sm:$0xff]  ;;  %312 = vst.msk [vmem:[#allocation2 + $0x28] sm:$0xff] %vm306_vm0, %v2333_v48  ;;  %p2239_p1 = scmp.ne.s32.totalorder %s3002_s2, %s2238_s18  ;;  %s2336_s12 = smov [#allocation11]  }
  0x59   : > { %1809 = vmatprep.subr.mxu0 %v400_v2  ;;  %1867 = vmatprep.subr.mxu1 %v399_v4  ;;  %v372_v20 = vmul.f32 0.17677669, %v356_v18  ;;  %v373_v21 = vmul.f32 0.17677669, %v357_v19  ;;  %v359_v23 = vld [vmem:[%s2506_s28 + $0x20] sm:$0xff]  ;;  %v360_v26 = vld [vmem:[%s2506_s28 + $0x28] sm:$0xff] }
  0x5a   : > { %1868 = vmatpush3.msra.mxu1 %v399_v4  ;;  %v374_v24 = vmul.f32 0.17677669, %v358_v22  ;;  %v375_v25 = vmul.f32 0.17677669, %v359_v23  ;;  %v361_v27 = vld [vmem:[%s2506_s28 + $0x30] sm:$0xff]  ;;  %v362_v30 = vld [vmem:[%s2506_s28 + $0x38] sm:$0xff]  ;;  %2059 = vset.pattern.permute.xlu1 %v2334_v3  ;;  %p2240_p4 = pnand %p2239_p1, %p2450_p0 }
  0x5b   : > { %1869 = vmatprep.subr.mxu1 %v398_v6  ;;  %v376_v28 = vmul.f32 0.17677669, %v360_v26  ;;  %v377_v29 = vmul.f32 0.17677669, %v361_v27  ;;  %v363_v31 = vld [vmem:[%s2506_s28 + $0x40] sm:$0xff]  ;;  %v364_v34 = vld [vmem:[%s2506_s28 + $0x48] sm:$0xff] }
  0x5c   : > { %1810 = vmatpush3.xpose.msra.mxu0 %v400_v2  ;;  %1870 = vmatpush3.msra.mxu1 %v398_v6  ;;  %v378_v32 = vmul.f32 0.17677669, %v362_v30  ;;  %v379_v33 = vmul.f32 0.17677669, %v363_v31  ;;  %v365_v35 = vld [vmem:[%s2506_s28 + $0x50] sm:$0xff]  ;;  %v366_v38 = vld [vmem:[%s2506_s28 + $0x58] sm:$0xff]  ;;  %p2241_p8 = pneg %p2240_p4 }
  0x5d   : > { %1811 = vmatprep.subr.mxu0 %v399_v4  ;;  %1871 = vmatprep.subr.mxu1 %v397_v7  ;;  %v380_v36 = vmul.f32 0.17677669, %v364_v34  ;;  %v381_v37 = vmul.f32 0.17677669, %v365_v35  ;;  %v367_v39 = vld [vmem:[%s2506_s28 + $0x60] sm:$0xff]  ;;  %v368_v42 = vld [vmem:[%s2506_s28 + $0x68] sm:$0xff] }
  0x5e   : > { %1872 = vmatpush3.msra.mxu1 %v397_v7  ;;  %v382_v40 = vmul.f32 0.17677669, %v366_v38  ;;  %v383_v41 = vmul.f32 0.17677669, %v367_v39  ;;  %v369_v43 = vld [vmem:[%s2506_s28 + $0x70] sm:$0xff]  ;;  %v370_v46 = vld [vmem:[%s2506_s28 + $0x78] sm:$0xff] }
  0x5f   : > { %1873 = vmatprep.subr.mxu1 %v396_v8  ;;  %v384_v44 = vmul.f32 0.17677669, %v368_v42  ;;  %v385_v45 = vmul.f32 0.17677669, %v369_v43  ;;  %v386_v47 = vmul.f32 0.17677669, %v370_v46 }
  0x60   : > { %1812 = vmatpush3.xpose.msra.mxu0 %v399_v4  ;;  %1874 = vmatpush3.msra.mxu1 %v396_v8  ;;  %313 = vst.msk [vmem:[#allocation2 + $0x30] sm:$0xff] %vm306_vm0, %v2333_v48  ;;  %314 = vst.msk [vmem:[#allocation2 + $0x38] sm:$0xff] %vm306_vm0, %v2333_v48  ;;  %v2673_v23 = vld [vmem:[#allocation2 + $0x18] sm:$0xff]  ;;  %v2678_v26 = vld [vmem:[#allocation2 + $0x8] sm:$0xff]  ;;  %s2242_s27 = sshll.u32 %s2336_s12, 4  ;;  %s2243_s27 = int_to_ptr.vmem [resolvable:$false] %s2242_s27 }
  0x61   : > { %1813 = vmatprep.subr.mxu0 %v398_v6  ;;  %1875 = vmatprep.subr.mxu1 %v395_v9  ;;  %315 = vst.msk [vmem:[#allocation2 + $0x40] sm:$0xff] %vm306_vm0, %v2333_v48  ;;  %316 = vst.msk [vmem:[#allocation2 + $0x48] sm:$0xff] %vm306_vm0, %v2333_v48  ;;  %v2688_v30 = vld [vmem:[#allocation2 + $0x10] sm:$0xff]  ;;  %v2697_v34 = vld [vmem:[#allocation2 + $0x20] sm:$0xff]  ;;  %s2244_s10 = scalar_lea.vmem %s2243_s27, 4096  ;;  %p2245_p10 = scmp.lt.s32.totalorder %s3002_s2, %s2243_s27 }
  0x62   : > { %1876 = vmatpush3.msra.mxu1 %v395_v9  ;;  %317 = vst.msk [vmem:[#allocation2 + $0x50] sm:$0xff] %vm306_vm0, %v2333_v48  ;;  %318 = vst.msk [vmem:[#allocation2 + $0x58] sm:$0xff] %vm306_vm0, %v2333_v48  ;;  %p2246_p5 = scmp.lt.s32.totalorder %s2244_s10, %s2238_s18 }
  0x63   : > { %1877 = vmatprep.subr.mxu1 %v394_v10  ;;  %319 = vst.msk [vmem:[#allocation2 + $0x60] sm:$0xff] %vm306_vm0, %v2333_v48  ;;  %320 = vst.msk [vmem:[#allocation2 + $0x68] sm:$0xff] %vm306_vm0, %v2333_v48 }
  0x64   : > { %1814 = vmatpush3.xpose.msra.mxu0 %v398_v6  ;;  %1878 = vmatpush3.msra.mxu1 %v394_v10  ;;  %321 = vst.msk [vmem:[#allocation2 + $0x70] sm:$0xff] %vm306_vm0, %v2333_v48  ;;  %322 = vst.msk [vmem:[#allocation2 + $0x78] sm:$0xff] %vm306_vm0, %v2333_v48  ;;  %p2247_p7 = por %p2246_p5, %p2245_p10 }
  0x65   : > { %1815 = vmatprep.subr.mxu0 %v397_v7  ;;  %1879 = vmatprep.subr.mxu1 %v393_v11 }
  0x66   : > { %1880 = vmatpush3.msra.mxu1 %v393_v11  ;;  %p2248_p11 = pnand %p2247_p7, %p2241_p8 }
  0x67   : > { %1881 = vmatprep.subr.mxu1 %v392_v12  ;;  %v2716_v42 = vld [vmem:[#allocation2 + $0x30] sm:$0xff] }
  0x68   : > { %1816 = vmatpush3.xpose.msra.mxu0 %v397_v7  ;;  %1882 = vmatpush3.msra.mxu1 %v392_v12  ;;  %v2735_v50 = vld [vmem:[#allocation2 + $0x40] sm:$0xff] }
  0x69   : > { %1817 = vmatprep.subr.mxu0 %v396_v8  ;;  %1883 = vmatprep.subr.mxu1 %v391_v13 }
  0x6a   : > { %1884 = vmatpush3.msra.mxu1 %v391_v13 }
  0x6b   : > { %1885 = vmatprep.subr.mxu1 %v390_v14 }
  0x6c   : > { %1818 = vmatpush3.xpose.msra.mxu0 %v396_v8  ;;  %1886 = vmatpush3.msra.mxu1 %v390_v14 }
  0x6d   : > { %1819 = vmatprep.subr.mxu0 %v395_v9  ;;  %1887 = vmatprep.subr.mxu1 %v389_v15 }
  0x6e   : > { %1888 = vmatpush3.msra.mxu1 %v389_v15 }
  0x6f   : > { %1889 = vmatprep.subr.mxu1 %v388_v16 }
  0x70   : > { %1820 = vmatpush3.xpose.msra.mxu0 %v395_v9  ;;  %1890 = vmatpush3.msra.mxu1 %v388_v16 }
  0x71   : > { %1821 = vmatprep.subr.mxu0 %v394_v10  ;;  %1891 = vmatprep.subr.mxu1 %v387_v17 }
  0x72   : > { %1892 = vmatpush3.msra.mxu1 %v387_v17 }
  0x74   : > { %1822 = vmatpush3.xpose.msra.mxu0 %v394_v10 }
  0x75   : > { %1823 = vmatprep.subr.mxu0 %v393_v11 }
  0x78   : > { %1824 = vmatpush3.xpose.msra.mxu0 %v393_v11 }
  0x79   : > { %1825 = vmatprep.subr.mxu0 %v392_v12 }
  0x7c   : > { %1826 = vmatpush3.xpose.msra.mxu0 %v392_v12 }
  0x7d   : > { %1827 = vmatprep.subr.mxu0 %v391_v13 }
  0x80   : > { %1828 = vmatpush3.xpose.msra.mxu0 %v391_v13 }
  0x81   : > { %1829 = vmatprep.subr.mxu0 %v390_v14 }
  0x84   : > { %1830 = vmatpush3.xpose.msra.mxu0 %v390_v14 }
  0x85   : > { %1831 = vmatprep.subr.mxu0 %v389_v15 }
  0x88   : > { %1832 = vmatpush3.xpose.msra.mxu0 %v389_v15 }
  0x89   : > { %1833 = vmatprep.subr.mxu0 %v388_v16 }
  0x8c   : > { %1834 = vmatpush3.xpose.msra.mxu0 %v388_v16  ;;  %v2335_v16 = vmov 0.0  }
  0x8d   : > { %1835 = vmatprep.subr.mxu0 %v387_v17  ;;  %323 = vst.msk [vmem:[#allocation3] sm:$0xff] %vm306_vm0, %v2335_v16  ;;  %324 = vst.msk [vmem:[#allocation3 + $0x8] sm:$0xff] %vm306_vm0, %v2335_v16 }
  0x8e   : > { %325 = vst.msk [vmem:[#allocation3 + $0x10] sm:$0xff] %vm306_vm0, %v2335_v16  ;;  %326 = vst.msk [vmem:[#allocation3 + $0x18] sm:$0xff] %vm306_vm0, %v2335_v16 }
  0x8f   : > { %327 = vst.msk [vmem:[#allocation3 + $0x20] sm:$0xff] %vm306_vm0, %v2335_v16  ;;  %328 = vst.msk [vmem:[#allocation3 + $0x28] sm:$0xff] %vm306_vm0, %v2335_v16 }
  0x90   : > { %1836 = vmatpush3.xpose.msra.mxu0 %v387_v17  ;;  %329 = vst.msk [vmem:[#allocation3 + $0x30] sm:$0xff] %vm306_vm0, %v2335_v16  ;;  %330 = vst.msk [vmem:[#allocation3 + $0x38] sm:$0xff] %vm306_vm0, %v2335_v16 }
  0x91   : > { %331 = vst.msk [vmem:[#allocation3 + $0x40] sm:$0xff] %vm306_vm0, %v2335_v16  ;;  %332 = vst.msk [vmem:[#allocation3 + $0x48] sm:$0xff] %vm306_vm0, %v2335_v16 }
  0x92   : > { %333 = vst.msk [vmem:[#allocation3 + $0x50] sm:$0xff] %vm306_vm0, %v2335_v16  ;;  %334 = vst.msk [vmem:[#allocation3 + $0x58] sm:$0xff] %vm306_vm0, %v2335_v16 }
  0x93   : > { %1838 = vmatmul.mubr.f32.vlgmr.msra.gmra.mxu0 %v372_v20  ;;  %335 = vst.msk [vmem:[#allocation3 + $0x60] sm:$0xff] %vm306_vm0, %v2335_v16  ;;  %336 = vst.msk [vmem:[#allocation3 + $0x68] sm:$0xff] %vm306_vm0, %v2335_v16 }
  0x94   : > { %1840 = vmatprep.mubr.f32.mxu0 %v373_v21  ;;  %337 = vst.msk [vmem:[#allocation3 + $0x70] sm:$0xff] %vm306_vm0, %v2335_v16  ;;  %338 = vst.msk [vmem:[#allocation3 + $0x78] sm:$0xff] %vm306_vm0, %v2335_v16  ;;  %v2671_v21 = vld [vmem:[#allocation2] sm:$0xff] }
  0x95   : > { %v2774_v16 = vld [vmem:[#allocation2 + $0x60] sm:$0xff] }
  0x97   : > { %1841 = vmatmul.mubr.f32.gmra.mxu0 %v374_v24 }
  0x98   : > { %1843 = vmatprep.mubr.f32.mxu0 %v375_v25 }
  0x9b   : > { %1844 = vmatmul.mubr.f32.gmra.mxu0 %v376_v28 }
  0x9c   : > { %1846 = vmatprep.mubr.f32.mxu0 %v377_v29 }
  0x9f   : > { %1847 = vmatmul.mubr.f32.gmra.mxu0 %v378_v32 }
  0xa0   : > { %1849 = vmatprep.mubr.f32.mxu0 %v379_v33 }
  0xa3   : > { %1850 = vmatmul.mubr.f32.gmra.mxu0 %v380_v36 }
  0xa4   : > { %1852 = vmatprep.mubr.f32.mxu0 %v381_v37  ;;  %v2707_v37 = vld [vmem:[#allocation2 + $0x28] sm:$0xff] }
  0xa7   : > { %1853 = vmatmul.mubr.f32.gmra.mxu0 %v382_v40 }
  0xa8   : > { %1855 = vmatprep.mubr.f32.mxu0 %v383_v41 }
  0xab   : > { %1856 = vmatmul.mubr.f32.gmra.mxu0 %v384_v44 }
  0xac   : > { %1858 = vmatprep.mubr.f32.mxu0 %v385_v45  ;;  %v2726_v45 = vld [vmem:[#allocation2 + $0x38] sm:$0xff] }
  0xaf   : > { %1859 = vmatmul.mubr.f32.gmra.mxu0 %v386_v47 }
 0x153   : > { %v1839_v51 = vpop.f32.mrf.mxu0 }
 0x154   : > { %v2587_v57 = vsel %vm553_vm1, %v1839_v51, -1e+30 }
 0x155   : > { %v469_v52 = vpop.f32.mrf.mxu0 }
 0x156   : > { %v2577_v53 = vsel %vm553_vm1, %v469_v52, -1e+30 }
 0x157   : > { %586 = vmax.xlane.f32.xlu0 %v2577_v53  ;;  %v1842_v54 = vpop.f32.mrf.mxu0 }
 0x158   : > { %v2582_v55 = vsel %vm553_vm1, %v1842_v54, -1e+30  ;;  %v2745_v54 = vld [vmem:[#allocation2 + $0x48] sm:$0xff] }
 0x159   : > { %592 = vmax.xlane.f32.xlu1 %v2582_v55  ;;  %v479_v56 = vpop.f32.mrf.mxu0 }
 0x15a   : > { %v2591_v58 = vsel %vm553_vm1, %v479_v56, -1e+30 }
 0x15b   : > { %588 = vmax.xlane.f32.xlu0 %v2587_v57  ;;  %v1845_v59 = vpop.f32.mrf.mxu0 }
 0x15c   : > { %v2597_v61 = vsel %vm553_vm1, %v1845_v59, -1e+30 }
 0x15d   : > { %590 = vmax.xlane.f32.xlu1 %v2591_v58  ;;  %v489_v60 = vpop.f32.mrf.mxu0 }
 0x15e   : > { %v2601_v62 = vsel %vm553_vm1, %v489_v60, -1e+30 }
 0x15f   : > { %v1848_v63 = vpop.f32.mrf.mxu0  ;;  %594 = vmax.xlane.f32.xlu0 %v2601_v62 }
 0x160   : > { %v2607_v1 = vsel %vm553_vm1, %v1848_v63, -1e+30 }
 0x161   : > { %596 = vmax.xlane.f32.xlu1 %v2597_v61  ;;  %v499_v0 = vpop.f32.mrf.mxu0 }
 0x162   : > { %v2611_v2 = vsel %vm553_vm1, %v499_v0, -1e+30  ;;  %v2754_v0 = vld [vmem:[#allocation2 + $0x50] sm:$0xff] }
 0x163   : > { %v1851_v4 = vpop.f32.mrf.mxu0  ;;  %598 = vmax.xlane.f32.xlu0 %v2611_v2 }
 0x164   : > { %v2617_v6 = vsel %vm553_vm1, %v1851_v4, -1e+30 }
 0x165   : > { %600 = vmax.xlane.f32.xlu1 %v2607_v1  ;;  %v509_v5 = vpop.f32.mrf.mxu0 }
 0x166   : > { %v2621_v7 = vsel %vm553_vm1, %v509_v5, -1e+30  ;;  %v2764_v5 = vld [vmem:[#allocation2 + $0x58] sm:$0xff] }
 0x167   : > { %v1854_v8 = vpop.f32.mrf.mxu0  ;;  %602 = vmax.xlane.f32.xlu0 %v2621_v7 }
 0x168   : > { %v2627_v10 = vsel %vm553_vm1, %v1854_v8, -1e+30 }
 0x169   : > { %604 = vmax.xlane.f32.xlu1 %v2617_v6  ;;  %v519_v9 = vpop.f32.mrf.mxu0 }
 0x16a   : > { %v2631_v11 = vsel %vm553_vm1, %v519_v9, -1e+30 }
 0x16b   : > { %v1857_v12 = vpop.f32.mrf.mxu0  ;;  %606 = vmax.xlane.f32.xlu0 %v2631_v11 }
 0x16c   : > { %v2637_v14 = vsel %vm553_vm1, %v1857_v12, -1e+30 }
 0x16d   : > { %608 = vmax.xlane.f32.xlu1 %v2627_v10  ;;  %v529_v13 = vpop.f32.mrf.mxu0 }
 0x16e   : > { %v2641_v15 = vsel %vm553_vm1, %v529_v13, -1e+30 }
 0x16f   : > { %v1860_v17 = vpop.f32.mrf.mxu0  ;;  %610 = vmax.xlane.f32.xlu0 %v2641_v15 }
 0x170   : > { %v2663_v19 = vsel %vm553_vm1, %v1860_v17, -1e+30 }
 0x171   : > { %612 = vmax.xlane.f32.xlu1 %v2637_v14  ;;  %v539_v18 = vpop.f32.mrf.mxu0 }
 0x172   : > { %v2667_v20 = vsel %vm553_vm1, %v539_v18, -1e+30 }
 0x173   : > { %614 = vmax.xlane.f32.xlu0 %v2667_v20 }
 0x175   : > { %616 = vmax.xlane.f32.xlu1 %v2663_v19 }
 0x1e0   : > { %v587_v22 = vpop.xlane.xlu0 %586 }
 0x1e1   : > { %v2676_v24 = vmax.f32 %v2671_v21, %v587_v22  ;;  %v2784_v22 = vld [vmem:[#allocation2 + $0x68] sm:$0xff] }
 0x1e2   : > { %v593_v25 = vpop.xlane.xlu1 %592 }
 0x1e3   : > { %v634_v27 = vsub.f32 %v2671_v21, %v2676_v24  ;;  %1196 = vst.msk [vmem:[#allocation2] sm:$0xff] %vm306_vm0, %v2676_v24  ;;  %v2685_v28 = vmax.f32 %v2673_v23, %v593_v25  ;;  %684 = vperm.xlu0 %2058, %v2676_v24  }
 0x1e4   : > { %v589_v29 = vpop.xlane.xlu0 %588 }
 0x1e5   : > { %1199 = vst.msk [vmem:[#allocation2 + $0x18] sm:$0xff] %vm306_vm0, %v2685_v28  ;;  %v2695_v32 = vmax.f32 %v2678_v26, %v589_v29 }
 0x1e6   : > { %v591_v33 = vpop.xlane.xlu1 %590 }
 0x1e7   : > { %v635_v35 = vsub.f32 %v2678_v26, %v2695_v32  ;;  %1197 = vst.msk [vmem:[#allocation2 + $0x8] sm:$0xff] %vm306_vm0, %v2695_v32  ;;  %v2704_v36 = vmax.f32 %v2688_v30, %v591_v33  ;;  %689 = vperm.xlu1 %2059, %v2695_v32   ;;  %v3077_v26 = vsub.f32 %v2673_v23, %v2685_v28 }
 0x1e8   : > { %v595_v38 = vpop.xlane.xlu0 %594 }
 0x1e9   : > { %v636_v39 = vsub.f32 %v2688_v30, %v2704_v36  ;;  %1198 = vst.msk [vmem:[#allocation2 + $0x10] sm:$0xff] %vm306_vm0, %v2704_v36  ;;  %v2714_v40 = vmax.f32 %v2697_v34, %v595_v38  ;;  %v656_v32 = vmul.f32 1.442695, %v3077_v26 }
 0x1ea   : > { %v597_v41 = vpop.xlane.xlu1 %596 }
 0x1eb   : > { %v2719_v43 = vmax.f32 %v2707_v37, %v597_v41  ;;  %699 = vperm.xlu1 %2059, %v2685_v28   ;;  %1200 = vst.msk [vmem:[#allocation2 + $0x20] sm:$0xff] %vm306_vm0, %v2714_v40  ;;  %v2794_v41 = vld [vmem:[#allocation2 + $0x70] sm:$0xff] }
 0x1ec   : > { %v599_v46 = vpop.xlane.xlu0 %598 }
 0x1ed   : > { %1201 = vst.msk [vmem:[#allocation2 + $0x28] sm:$0xff] %vm306_vm0, %v2719_v43  ;;  %v2733_v48 = vmax.f32 %v2716_v42, %v599_v46  ;;  %v3079_v30 = vsub.f32 %v2707_v37, %v2719_v43 }
 0x1ee   : > { %v601_v49 = vpop.xlane.xlu1 %600 }
 0x1ef   : > { %v2738_v51 = vmax.f32 %v2726_v45, %v601_v49  ;;  %694 = vperm.xlu1 %2059, %v2704_v36   ;;  %1202 = vst.msk [vmem:[#allocation2 + $0x30] sm:$0xff] %vm306_vm0, %v2733_v48  ;;  %v660_v36 = vmul.f32 1.442695, %v3079_v30  ;;  %v3080_v21 = vsub.f32 %v2716_v42, %v2733_v48 }
 0x1f0   : > { %v603_v56 = vpop.xlane.xlu0 %602 }
 0x1f1   : > { %1203 = vst.msk [vmem:[#allocation2 + $0x38] sm:$0xff] %vm306_vm0, %v2738_v51  ;;  %v2752_v60 = vmax.f32 %v2735_v50, %v603_v56  ;;  %v2804_v56 = vld [vmem:[#allocation2 + $0x78] sm:$0xff]  ;;  %v662_v23 = vmul.f32 1.442695, %v3080_v21  ;;  %v3081_v28 = vsub.f32 %v2726_v45, %v2738_v51  ;;  %v815_v21 = vld [vmem:[#allocation3 + $0x28] sm:$0xff] }
 0x1f2   : > { %v605_v63 = vpop.xlane.xlu1 %604 }
 0x1f3   : > { %v2757_v3 = vmax.f32 %v2745_v54, %v605_v63  ;;  %709 = vperm.xlu1 %2059, %v2719_v43   ;;  %1204 = vst.msk [vmem:[#allocation2 + $0x40] sm:$0xff] %vm306_vm0, %v2752_v60 }
 0x1f4   : > { %v607_v8 = vpop.xlane.xlu0 %606 }
 0x1f5   : > { %1205 = vst.msk [vmem:[#allocation2 + $0x48] sm:$0xff] %vm306_vm0, %v2757_v3  ;;  %729 = vperm.xlu0 %2058, %v2757_v3   ;;  %v2772_v12 = vmax.f32 %v2754_v0, %v607_v8  ;;  %v3083_v45 = vsub.f32 %v2745_v54, %v2757_v3 }
 0x1f6   : > { %v609_v13 = vpop.xlane.xlu1 %608 }
 0x1f7   : > { %v2777_v17 = vmax.f32 %v2764_v5, %v609_v13  ;;  %704 = vperm.xlu1 %2059, %v2714_v40   ;;  %1206 = vst.msk [vmem:[#allocation2 + $0x50] sm:$0xff] %vm306_vm0, %v2772_v12 }
 0x1f8   : > { %v611_v25 = vpop.xlane.xlu0 %610 }
 0x1f9   : > { %1207 = vst.msk [vmem:[#allocation2 + $0x58] sm:$0xff] %vm306_vm0, %v2777_v17  ;;  %739 = vperm.xlu0 %2058, %v2777_v17   ;;  %v2792_v33 = vmax.f32 %v2774_v16, %v611_v25 }
 0x1fa   : > { %v613_v38 = vpop.xlane.xlu1 %612 }
 0x1fb   : > { %v2797_v46 = vmax.f32 %v2784_v22, %v613_v38  ;;  %719 = vperm.xlu1 %2059, %v2738_v51   ;;  %1208 = vst.msk [vmem:[#allocation2 + $0x60] sm:$0xff] %vm306_vm0, %v2792_v33  ;;  %v3086_v3 = vsub.f32 %v2774_v16, %v2792_v33 }
 0x1fc   : > { %v615_v63 = vpop.xlane.xlu0 %614 }
 0x1fd   : > { %1209 = vst.msk [vmem:[#allocation2 + $0x68] sm:$0xff] %vm306_vm0, %v2797_v46  ;;  %749 = vperm.xlu0 %2058, %v2797_v46   ;;  %v2812_v13 = vmax.f32 %v2794_v41, %v615_v63 }
 0x1fe   : > { %v617_v25 = vpop.xlane.xlu1 %616 }
 0x1ff   : > { %v2815_v38 = vmax.f32 %v2804_v56, %v617_v25  ;;  %714 = vperm.xlu1 %2059, %v2733_v48   ;;  %1210 = vst.msk [vmem:[#allocation2 + $0x70] sm:$0xff] %vm306_vm0, %v2812_v13  ;;  %v668_v48 = vmul.f32 1.442695, %v3083_v45 }
 0x201   : > { %1211 = vst.msk [vmem:[#allocation2 + $0x78] sm:$0xff] %vm306_vm0, %v2815_v38  ;;  %759 = vperm.xlu0 %2058, %v2815_v38  }
 0x203   : > { %724 = vperm.xlu1 %2059, %v2752_v60  }
 0x207   : > { %734 = vperm.xlu1 %2059, %v2772_v12  }
 0x20b   : > { %744 = vperm.xlu1 %2059, %v2792_v33   ;;  %v3089_v33 = vsub.f32 %v2804_v56, %v2815_v38  ;;  %v1374_v38 = vld [vmem:[#allocation10 + $0x78] sm:$0xff] }
 0x20c   : > { %1917 = vmatprep.subr.mxu1 %v1374_v38 }
 0x20f   : > { %754 = vperm.xlu1 %2059, %v2812_v13  }
 0x25e   : > { %v685_v63 = vpop.permute.xlu0 %684 }
 0x25f   : > { %v762_v25 = vsub.f32 %v2577_v53, %v685_v63 }
 0x261   : > { %v778_v49 = vmul.f32 1.442695, %v762_v25 }
 0x262   : > { %v690_v29 = vpop.permute.xlu1 %689 }
 0x263   : > { %2060 = vpow2.f32 %v778_v49  ;;  %v763_v8 = vsub.f32 %v2587_v57, %v690_v29 }
 0x265   : > { %v780_v18 = vmul.f32 1.442695, %v763_v8 }
 0x266   : > { %v700_v9 = vpop.permute.xlu1 %699 }
 0x267   : > { %2062 = vpow2.f32 %v780_v18  ;;  %v765_v4 = vsub.f32 %v2582_v55, %v700_v9 }
 0x269   : > { %v784_v59 = vmul.f32 1.442695, %v765_v4 }
 0x26a   : > { %v695_v52 = vpop.permute.xlu1 %694 }
 0x26b   : > { %2064 = vpow2.f32 %v784_v59  ;;  %v764_v47 = vsub.f32 %v2591_v58, %v695_v52 }
 0x26d   : > { %v782_v44 = vmul.f32 1.442695, %v764_v47 }
 0x26e   : > { %v710_v31 = vpop.permute.xlu1 %709 }
 0x26f   : > { %2066 = vpow2.f32 %v782_v44  ;;  %v767_v53 = vsub.f32 %v2597_v61, %v710_v31 }
 0x270   : > { %v2061_v63 = vpop.eup %2060  ;;  %v730_v25 = vpop.permute.xlu0 %729 }
 0x271   : > { %v788_v49 = vmul.f32 1.442695, %v767_v53  ;;  %842 = vadd.xlane.f32.xlu1 %v2061_v63  ;;  %1893 = vmatprep.mubr.f32.mxu1 %v2061_v63  ;;  %v771_v61 = vsub.f32 %v2617_v6, %v730_v25 }
 0x272   : > { %v705_v57 = vpop.permute.xlu1 %704 }
 0x273   : > { %2068 = vpow2.f32 %v788_v49  ;;  %v766_v18 = vsub.f32 %v2601_v62, %v705_v57  ;;  %v796_v8 = vmul.f32 1.442695, %v771_v61 }
 0x274   : > { %v2063_v55 = vpop.eup %2062  ;;  %v740_v9 = vpop.permute.xlu0 %739 }
 0x275   : > { %v786_v4 = vmul.f32 1.442695, %v766_v18  ;;  %844 = vadd.xlane.f32.xlu0 %v2063_v55  ;;  %1894 = vmatmul.mubr.f32.vlgmr.msra.gmra.mxu1 %v2063_v55  ;;  %v773_v53 = vsub.f32 %v2627_v10, %v740_v9 }
 0x276   : > { %v720_v58 = vpop.permute.xlu1 %719  ;;  %1918 = vmatpush3.msra.mxu1 %v1374_v38 }
 0x277   : > { %2070 = vpow2.f32 %v786_v4  ;;  %v769_v44 = vsub.f32 %v2607_v1, %v720_v58  ;;  %v800_v25 = vmul.f32 1.442695, %v773_v53 }
 0x278   : > { %v2065_v47 = vpop.eup %2064  ;;  %v750_v59 = vpop.permute.xlu0 %749 }
 0x279   : > { %v792_v31 = vmul.f32 1.442695, %v769_v44  ;;  %848 = vadd.xlane.f32.xlu1 %v2065_v47  ;;  %v775_v57 = vsub.f32 %v2637_v14, %v750_v59 }
 0x27a   : > { %v715_v52 = vpop.permute.xlu1 %714 }
 0x27b   : > { %2072 = vpow2.f32 %v792_v31  ;;  %v768_v29 = vsub.f32 %v2611_v2, %v715_v52  ;;  %v804_v9 = vmul.f32 1.442695, %v775_v57 }
 0x27c   : > { %v2067_v62 = vpop.eup %2066  ;;  %v760_v18 = vpop.permute.xlu0 %759 }
 0x27d   : > { %v790_v63 = vmul.f32 1.442695, %v768_v29  ;;  %846 = vadd.xlane.f32.xlu0 %v2067_v62  ;;  %1896 = vmatprep.mubr.f32.mxu1 %v2067_v62  ;;  %v777_v58 = vsub.f32 %v2663_v19, %v760_v18  ;;  %v3084_v18 = vsub.f32 %v2754_v0, %v2772_v12  ;;  %v3087_v12 = vsub.f32 %v2784_v22, %v2797_v46 }
 0x27e   : > { %v725_v49 = vpop.permute.xlu1 %724  ;;  %1897 = vmatmul.mubr.f32.gmra.mxu1 %v2065_v47 }
 0x27f   : > { %2074 = vpow2.f32 %v790_v63  ;;  %v770_v1 = vsub.f32 %v2621_v7, %v725_v49  ;;  %v808_v61 = vmul.f32 1.442695, %v777_v58  ;;  %v652_v49 = vmul.f32 1.442695, %v635_v35 }
 0x280   : > { %v2069_v6 = vpop.eup %2068  ;;  %2076 = vpow2.f32 %v796_v8  ;;  %v3078_v35 = vsub.f32 %v2697_v34, %v2714_v40  ;;  %v664_v34 = vmul.f32 1.442695, %v3081_v28  ;;  %v3082_v40 = vsub.f32 %v2735_v50, %v2752_v60 }
 0x281   : > { %v794_v55 = vmul.f32 1.442695, %v770_v1  ;;  %852 = vadd.xlane.f32.xlu1 %v2069_v6  ;;  %v3085_v60 = vsub.f32 %v2764_v5, %v2777_v17  ;;  %v3088_v17 = vsub.f32 %v2794_v41, %v2812_v13  ;;  %v680_v58 = vmul.f32 1.442695, %v3089_v33 }
 0x282   : > { %v735_v2 = vpop.permute.xlu1 %734  ;;  %v658_v57 = vmul.f32 1.442695, %v3078_v35  ;;  %v666_v42 = vmul.f32 1.442695, %v3082_v40  ;;  %v812_v35 = vld [vmem:[#allocation3 + $0x10] sm:$0xff] }
 0x283   : > { %2078 = vpow2.f32 %v794_v55  ;;  %v772_v10 = vsub.f32 %v2631_v11, %v735_v2  ;;  %v670_v55 = vmul.f32 1.442695, %v3084_v18  ;;  %v672_v2 = vmul.f32 1.442695, %v3085_v60  ;;  %v816_v60 = vld [vmem:[#allocation3 + $0x30] sm:$0xff] }
 0x284   : > { %v2071_v4 = vpop.eup %2070  ;;  %2080 = vpow2.f32 %v800_v25  ;;  %v650_v25 = vmul.f32 1.442695, %v634_v27 }
 0x285   : > { %v798_v44 = vmul.f32 1.442695, %v772_v10  ;;  %850 = vadd.xlane.f32.xlu0 %v2071_v4  ;;  %1899 = vmatprep.mubr.f32.mxu1 %v2071_v4  ;;  %v674_v10 = vmul.f32 1.442695, %v3086_v3  ;;  %v676_v4 = vmul.f32 1.442695, %v3087_v12 }
 0x286   : > { %v745_v7 = vpop.permute.xlu1 %744  ;;  %1900 = vmatmul.mubr.f32.gmra.mxu1 %v2069_v6  ;;  %v654_v6 = vmul.f32 1.442695, %v636_v39  ;;  %v1361_v12 = vld [vmem:[#allocation10 + $0x10] sm:$0xff] }
 0x287   : > { %2082 = vpow2.f32 %v798_v44  ;;  %v774_v14 = vsub.f32 %v2641_v15, %v745_v7  ;;  %v1373_v44 = vld [vmem:[#allocation10 + $0x70] sm:$0xff]  ;;  %v1372_v7 = vld [vmem:[#allocation10 + $0x68] sm:$0xff] }
 0x288   : > { %v2073_v47 = vpop.eup %2072  ;;  %2084 = vpow2.f32 %v804_v9  ;;  %v678_v9 = vmul.f32 1.442695, %v3088_v17  ;;  %1919 = vmatprep.subr.mxu1 %v1373_v44 }
 0x289   : > { %v802_v31 = vmul.f32 1.442695, %v774_v14  ;;  %856 = vadd.xlane.f32.xlu1 %v2073_v47  ;;  %1920 = vmatpush3.msra.mxu1 %v1373_v44  ;;  %v1371_v14 = vld [vmem:[#allocation10 + $0x60] sm:$0xff] }
 0x28a   : > { %v755_v52 = vpop.permute.xlu1 %754  ;;  %1921 = vmatprep.subr.mxu1 %v1372_v7 }
 0x28b   : > { %2086 = vpow2.f32 %v802_v31  ;;  %v776_v11 = vsub.f32 %v2667_v20, %v755_v52  ;;  %1922 = vmatpush3.msra.mxu1 %v1372_v7  ;;  %v1368_v31 = vld [vmem:[#allocation10 + $0x48] sm:$0xff]  ;;  %v1367_v52 = vld [vmem:[#allocation10 + $0x40] sm:$0xff]  ;;  %v821_v7 = vld [vmem:[#allocation3 + $0x58] sm:$0xff] }
 0x28c   : > { %v2075_v59 = vpop.eup %2074  ;;  %2088 = vpow2.f32 %v808_v61  ;;  %1923 = vmatprep.subr.mxu1 %v1371_v14  ;;  %v1369_v61 = vld [vmem:[#allocation10 + $0x50] sm:$0xff] }
 0x28d   : > { %v2077_v19 = vpop.eup %2076  ;;  %v806_v29 = vmul.f32 1.442695, %v776_v11  ;;  %854 = vadd.xlane.f32.xlu0 %v2075_v59  ;;  %1902 = vmatprep.mubr.f32.mxu1 %v2075_v59  ;;  %v1366_v11 = vld [vmem:[#allocation10 + $0x38] sm:$0xff]  ;;  %v1365_v59 = vld [vmem:[#allocation10 + $0x30] sm:$0xff] }
 0x28e   : > { %860 = vadd.xlane.f32.xlu1 %v2077_v19  ;;  %1903 = vmatmul.mubr.f32.gmra.mxu1 %v2073_v47  ;;  %v1370_v47 = vld [vmem:[#allocation10 + $0x58] sm:$0xff] }
 0x28f   : > { %2090 = vpow2.f32 %v806_v29  ;;  %1924 = vmatpush3.msra.mxu1 %v1371_v14  ;;  %v810_v29 = vld [vmem:[#allocation3] sm:$0xff] }
 0x290   : > { %v2079_v62 = vpop.eup %2078  ;;  %2092 = vpow2.f32 %v652_v49  ;;  %1925 = vmatprep.subr.mxu1 %v1370_v47  ;;  %v1359_v14 = vld [vmem:[#allocation10] sm:$0xff] }
 0x291   : > { %v2081_v15 = vpop.eup %2080  ;;  %858 = vadd.xlane.f32.xlu0 %v2079_v62  ;;  %1905 = vmatprep.mubr.f32.mxu1 %v2079_v62  ;;  %2094 = vpow2.f32 %v654_v6  ;;  %v1363_v62 = vld [vmem:[#allocation10 + $0x20] sm:$0xff]  ;;  %v813_v6 = vld [vmem:[#allocation3 + $0x18] sm:$0xff] }
 0x292   : > { %864 = vadd.xlane.f32.xlu1 %v2081_v15  ;;  %1906 = vmatmul.mubr.f32.gmra.mxu1 %v2077_v19  ;;  %2096 = vpow2.f32 %v650_v25  ;;  %v1364_v19 = vld [vmem:[#allocation10 + $0x28] sm:$0xff] }
 0x293   : > { %2098 = vpow2.f32 %v656_v32  ;;  %1926 = vmatpush3.msra.mxu1 %v1370_v47 }
 0x294   : > { %v2083_v8 = vpop.eup %2082  ;;  %2100 = vpow2.f32 %v658_v57  ;;  %1927 = vmatprep.subr.mxu1 %v1369_v61 }
 0x295   : > { %v2085_v53 = vpop.eup %2084  ;;  %862 = vadd.xlane.f32.xlu0 %v2083_v8  ;;  %1908 = vmatprep.mubr.f32.mxu1 %v2083_v8  ;;  %2102 = vpow2.f32 %v660_v36 }
 0x296   : > { %868 = vadd.xlane.f32.xlu1 %v2085_v53  ;;  %1909 = vmatmul.mubr.f32.gmra.mxu1 %v2081_v15  ;;  %2104 = vpow2.f32 %v662_v23  ;;  %v1362_v15 = vld [vmem:[#allocation10 + $0x18] sm:$0xff] }
 0x297   : > { %2106 = vpow2.f32 %v664_v34  ;;  %1928 = vmatpush3.msra.mxu1 %v1369_v61  ;;  %v814_v34 = vld [vmem:[#allocation3 + $0x20] sm:$0xff] }
 0x298   : > { %v2087_v20 = vpop.eup %2086  ;;  %2108 = vpow2.f32 %v666_v42  ;;  %1929 = vmatprep.subr.mxu1 %v1368_v31 }
 0x299   : > { %v2089_v63 = vpop.eup %2088  ;;  %866 = vadd.xlane.f32.xlu0 %v2087_v20  ;;  %1911 = vmatprep.mubr.f32.mxu1 %v2087_v20  ;;  %2110 = vpow2.f32 %v668_v48  ;;  %v811_v20 = vld [vmem:[#allocation3 + $0x8] sm:$0xff] }
 0x29a   : > { %872 = vadd.xlane.f32.xlu1 %v2089_v63  ;;  %1912 = vmatmul.mubr.f32.gmra.mxu1 %v2085_v53  ;;  %2112 = vpow2.f32 %v670_v55 }
 0x29b   : > { %2114 = vpow2.f32 %v672_v2  ;;  %1930 = vmatpush3.msra.mxu1 %v1368_v31 }
 0x29c   : > { %v2091_v1 = vpop.eup %2090  ;;  %2116 = vpow2.f32 %v674_v10  ;;  %1931 = vmatprep.subr.mxu1 %v1367_v52  ;;  %v819_v10 = vld [vmem:[#allocation3 + $0x48] sm:$0xff] }
 0x29d   : > { %870 = vadd.xlane.f32.xlu0 %v2091_v1  ;;  %1914 = vmatprep.mubr.f32.mxu1 %v2091_v1  ;;  %v2865_v39 = vpop.eup %2092  ;;  %2118 = vpow2.f32 %v676_v4  ;;  %v1360_v4 = vld [vmem:[#allocation10 + $0x8] sm:$0xff] }
 0x29e   : > { %1915 = vmatmul.mubr.f32.gmra.mxu1 %v2089_v63  ;;  %v2871_v24 = vpop.eup %2094  ;;  %2120 = vpow2.f32 %v678_v9  ;;  %v827_v49 = vmul.f32 %v2865_v39, %v811_v20 }
 0x29f   : > { %v2874_v27 = vpop.eup %2096  ;;  %2122 = vpow2.f32 %v680_v58  ;;  %1932 = vmatpush3.msra.mxu1 %v1367_v52  ;;  %v828_v30 = vmul.f32 %v2871_v24, %v812_v35  ;;  %v820_v52 = vld [vmem:[#allocation3 + $0x50] sm:$0xff] }
 0x2a0   : > { %v2879_v37 = vpop.eup %2098  ;;  %1933 = vmatprep.subr.mxu1 %v1366_v11  ;;  %v826_v8 = vmul.f32 %v2874_v27, %v810_v29  ;;  %v823_v29 = vld [vmem:[#allocation3 + $0x68] sm:$0xff] }
 0x2a1   : > { %v2886_v43 = vpop.eup %2100  ;;  %1934 = vmatpush3.msra.mxu1 %v1366_v11  ;;  %v829_v26 = vmul.f32 %v2879_v37, %v813_v6 }
 0x2a2   : > { %v2892_v51 = vpop.eup %2102  ;;  %1935 = vmatprep.subr.mxu1 %v1365_v59  ;;  %v830_v42 = vmul.f32 %v2886_v43, %v814_v34 }
 0x2a3   : > { %v2898_v50 = vpop.eup %2104  ;;  %1936 = vmatpush3.msra.mxu1 %v1365_v59 }
 0x2a4   : > { %v2904_v54 = vpop.eup %2106  ;;  %1937 = vmatprep.subr.mxu1 %v1364_v19 }
 0x2a5   : > { %v2910_v0 = vpop.eup %2108  ;;  %1938 = vmatpush3.msra.mxu1 %v1364_v19 }
 0x2a6   : > { %v2916_v5 = vpop.eup %2110  ;;  %1939 = vmatprep.subr.mxu1 %v1363_v62 }
 0x2a7   : > { %v2922_v16 = vpop.eup %2112  ;;  %1940 = vmatpush3.msra.mxu1 %v1363_v62  ;;  %v835_v9 = vmul.f32 %v2916_v5, %v819_v10 }
 0x2a8   : > { %v2928_v22 = vpop.eup %2114  ;;  %1941 = vmatprep.subr.mxu1 %v1362_v15 }
 0x2a9   : > { %v2931_v46 = vpop.eup %2116  ;;  %1942 = vmatpush3.msra.mxu1 %v1362_v15  ;;  %v836_v15 = vmul.f32 %v2922_v16, %v820_v52 }
 0x2aa   : > { %v2934_v41 = vpop.eup %2118  ;;  %1943 = vmatprep.subr.mxu1 %v1361_v12 }
 0x2ab   : > { %930 = vperm.xlu1 %2059, %v2865_v39   ;;  %v2937_v13 = vpop.eup %2120  ;;  %v831_v39 = vmul.f32 %v2892_v51, %v815_v21  ;;  %1944 = vmatpush3.msra.mxu1 %v1361_v12 }
 0x2ac   : > { %v2940_v56 = vpop.eup %2122  ;;  %1945 = vmatprep.subr.mxu1 %v1360_v4 }
 0x2ad   : > { %1946 = vmatpush3.msra.mxu1 %v1360_v4 }
 0x2ae   : > { %1947 = vmatprep.subr.mxu1 %v1359_v14 }
 0x2af   : > { %935 = vperm.xlu1 %2059, %v2871_v24   ;;  %v817_v24 = vld [vmem:[#allocation3 + $0x38] sm:$0xff]  ;;  %1948 = vmatpush3.msra.mxu1 %v1359_v14 }
 0x2b0   : > { %v833_v55 = vmul.f32 %v2904_v54, %v817_v24 }
 0x2b3   : > { %940 = vperm.xlu1 %2059, %v2879_v37   ;;  %925 = vperm.xlu0 %2058, %v2874_v27  }
 0x2b7   : > { %945 = vperm.xlu1 %2059, %v2886_v43   ;;  %v832_v43 = vmul.f32 %v2898_v50, %v816_v60 }
 0x2bb   : > { %950 = vperm.xlu1 %2059, %v2892_v51  }
 0x2bf   : > { %955 = vperm.xlu1 %2059, %v2898_v50  }
 0x2c3   : > { %960 = vperm.xlu1 %2059, %v2904_v54   ;;  %v818_v54 = vld [vmem:[#allocation3 + $0x40] sm:$0xff] }
 0x2c4   : > { %v834_v50 = vmul.f32 %v2910_v0, %v818_v54 }
 0x2c7   : > { %965 = vperm.xlu1 %2059, %v2910_v0  }
 0x2cb   : > { %970 = vperm.xlu1 %2059, %v2916_v5   ;;  %v837_v5 = vmul.f32 %v2928_v22, %v821_v7 }
 0x2cf   : > { %975 = vperm.xlu1 %2059, %v2922_v16  }
 0x2d3   : > { %980 = vperm.xlu1 %2059, %v2928_v22   ;;  %v822_v22 = vld [vmem:[#allocation3 + $0x60] sm:$0xff] }
 0x2d7   : > { %985 = vperm.xlu1 %2059, %v2931_v46  }
 0x2db   : > { %990 = vperm.xlu1 %2059, %v2934_v41  }
 0x2df   : > { %995 = vperm.xlu1 %2059, %v2937_v13  }
 0x2e3   : > { %1000 = vperm.xlu1 %2059, %v2940_v56  }
 0x2fa   : > { %v843_v53 = vpop.xlane.xlu1 %842 }
 0x2fb   : > { %v874_v63 = vadd.f32 %v843_v53, %v826_v8  ;;  %v839_v8 = vmul.f32 %v2934_v41, %v823_v29  ;;  %v824_v41 = vld [vmem:[#allocation3 + $0x70] sm:$0xff] }
 0x2fc   : > { %v840_v21 = vmul.f32 %v2937_v13, %v824_v41 }
 0x2fd   : > { %891 = vst.msk [vmem:[#allocation3] sm:$0xff] %vm306_vm0, %v874_v63 }
 0x2fe   : > { %v845_v1 = vpop.xlane.xlu0 %844 }
 0x2ff   : > { %v875_v25 = vadd.f32 %v845_v1, %v827_v49  ;;  %v825_v1 = vld [vmem:[#allocation3 + $0x78] sm:$0xff] }
 0x301   : > { %892 = vst.msk [vmem:[#allocation3 + $0x8] sm:$0xff] %vm306_vm0, %v875_v25  ;;  %v838_v25 = vmul.f32 %v2931_v46, %v822_v22 }
 0x302   : > { %v849_v32 = vpop.xlane.xlu1 %848 }
 0x303   : > { %v877_v57 = vadd.f32 %v849_v32, %v829_v26  ;;  %v841_v26 = vmul.f32 %v2940_v56, %v825_v1 }
 0x304   : > { %v1231_v40 = vld [vmem:[#allocation3] sm:$0xff] }
 0x305   : > { %894 = vst.msk [vmem:[#allocation3 + $0x18] sm:$0xff] %vm306_vm0, %v877_v57 }
 0x306   : > { %v847_v36 = vpop.xlane.xlu0 %846 }
 0x307   : > { %v876_v23 = vadd.f32 %v847_v36, %v828_v30 }
 0x308   : > { %v1232_v27 = vld [vmem:[#allocation3 + $0x8] sm:$0xff] }
 0x309   : > { %893 = vst.msk [vmem:[#allocation3 + $0x10] sm:$0xff] %vm306_vm0, %v876_v23  ;;  %2124 = vrcp.f32 %v1232_v27 }
 0x30a   : > { %v853_v28 = vpop.xlane.xlu1 %852  ;;  %2126 = vrcp.f32 %v1231_v40 }
 0x30b   : > { %v879_v37 = vadd.f32 %v853_v28, %v831_v39 }
 0x30c   : > { %v1234_v48 = vld [vmem:[#allocation3 + $0x18] sm:$0xff] }
 0x30d   : > { %896 = vst.msk [vmem:[#allocation3 + $0x28] sm:$0xff] %vm306_vm0, %v879_v37  ;;  %2128 = vrcp.f32 %v1234_v48 }
 0x30e   : > { %v851_v45 = vpop.xlane.xlu0 %850 }
 0x30f   : > { %v878_v18 = vadd.f32 %v851_v45, %v830_v42 }
 0x310   : > { %v1233_v2 = vld [vmem:[#allocation3 + $0x10] sm:$0xff] }
 0x311   : > { %895 = vst.msk [vmem:[#allocation3 + $0x20] sm:$0xff] %vm306_vm0, %v878_v18  ;;  %2130 = vrcp.f32 %v1233_v2 }
 0x312   : > { %v857_v51 = vpop.xlane.xlu1 %856 }
 0x313   : > { %v881_v3 = vadd.f32 %v857_v51, %v833_v55 }
 0x314   : > { %v1236_v58 = vld [vmem:[#allocation3 + $0x28] sm:$0xff] }
 0x315   : > { %898 = vst.msk [vmem:[#allocation3 + $0x38] sm:$0xff] %vm306_vm0, %v881_v3  ;;  %2132 = vrcp.f32 %v1236_v58 }
 0x316   : > { %v2125_v17 = vpop.eup %2124  ;;  %v855_v33 = vpop.xlane.xlu0 %854 }
 0x317   : > { %v861_v38 = vpop.xlane.xlu1 %860  ;;  %v880_v44 = vadd.f32 %v855_v33, %v832_v43  ;;  %1270 = vperm.xlu0 %2058, %v2125_v17   ;;  %v2127_v61 = vpop.eup %2126 }
 0x318   : > { %v883_v47 = vadd.f32 %v861_v38, %v835_v9  ;;  %v1235_v11 = vld [vmem:[#allocation3 + $0x20] sm:$0xff] }
 0x319   : > { %897 = vst.msk [vmem:[#allocation3 + $0x30] sm:$0xff] %vm306_vm0, %v880_v44  ;;  %2134 = vrcp.f32 %v1235_v11 }
 0x31a   : > { %900 = vst.msk [vmem:[#allocation3 + $0x48] sm:$0xff] %vm306_vm0, %v883_v47  ;;  %v859_v31 = vpop.xlane.xlu0 %858  ;;  %v2129_v0 = vpop.eup %2128 }
 0x31b   : > { %v865_v59 = vpop.xlane.xlu1 %864  ;;  %v882_v19 = vadd.f32 %v859_v31, %v834_v50  ;;  %1265 = vperm.xlu0 %2058, %v2127_v61  }
 0x31c   : > { %v885_v62 = vadd.f32 %v865_v59, %v837_v5  ;;  %v1238_v20 = vld [vmem:[#allocation3 + $0x38] sm:$0xff] }
 0x31d   : > { %899 = vst.msk [vmem:[#allocation3 + $0x40] sm:$0xff] %vm306_vm0, %v882_v19  ;;  %2136 = vrcp.f32 %v1238_v20 }
 0x31e   : > { %902 = vst.msk [vmem:[#allocation3 + $0x58] sm:$0xff] %vm306_vm0, %v885_v62  ;;  %v863_v53 = vpop.xlane.xlu0 %862  ;;  %v2131_v16 = vpop.eup %2130 }
 0x31f   : > { %v869_v63 = vpop.xlane.xlu1 %868  ;;  %v884_v49 = vadd.f32 %v863_v53, %v836_v15  ;;  %1280 = vperm.xlu0 %2058, %v2129_v0  }
 0x320   : > { %v887_v6 = vadd.f32 %v869_v63, %v839_v8  ;;  %v1237_v35 = vld [vmem:[#allocation3 + $0x30] sm:$0xff] }
 0x321   : > { %901 = vst.msk [vmem:[#allocation3 + $0x50] sm:$0xff] %vm306_vm0, %v884_v49  ;;  %2138 = vrcp.f32 %v1237_v35  ;;  %v1240_v27 = vld [vmem:[#allocation3 + $0x48] sm:$0xff] }
 0x322   : > { %904 = vst.msk [vmem:[#allocation3 + $0x68] sm:$0xff] %vm306_vm0, %v887_v6  ;;  %v867_v32 = vpop.xlane.xlu0 %866  ;;  %v2133_v23 = vpop.eup %2132  ;;  %2140 = vrcp.f32 %v1240_v27 }
 0x323   : > { %v873_v57 = vpop.xlane.xlu1 %872  ;;  %v886_v30 = vadd.f32 %v867_v32, %v838_v25  ;;  %1275 = vperm.xlu0 %2058, %v2131_v16  }
 0x324   : > { %v889_v36 = vadd.f32 %v873_v57, %v841_v26  ;;  %v1239_v28 = vld [vmem:[#allocation3 + $0x40] sm:$0xff] }
 0x325   : > { %903 = vst.msk [vmem:[#allocation3 + $0x60] sm:$0xff] %vm306_vm0, %v886_v30  ;;  %2142 = vrcp.f32 %v1239_v28  ;;  %v1242_v34 = vld [vmem:[#allocation3 + $0x58] sm:$0xff] }
 0x326   : > { %906 = vst.msk [vmem:[#allocation3 + $0x78] sm:$0xff] %vm306_vm0, %v889_v36  ;;  %v871_v46 = vpop.xlane.xlu0 %870  ;;  %v2135_v56 = vpop.eup %2134  ;;  %2144 = vrcp.f32 %v1242_v34 }
 0x327   : > { %v888_v39 = vadd.f32 %v871_v46, %v840_v21  ;;  %1290 = vperm.xlu0 %2058, %v2133_v23   ;;  %v931_v4 = vpop.permute.xlu1 %930 }
 0x328   : > { %v1241_v42 = vld [vmem:[#allocation3 + $0x50] sm:$0xff]  ;;  %v1004_v61 = vmul.f32 0.0, %v931_v4 }
 0x329   : > { %905 = vst.msk [vmem:[#allocation3 + $0x70] sm:$0xff] %vm306_vm0, %v888_v39  ;;  %v1244_v18 = vld [vmem:[#allocation3 + $0x68] sm:$0xff] }
 0x32a   : > { %v2137_v40 = vpop.eup %2136 }
 0x32b   : > { %1285 = vperm.xlu0 %2058, %v2135_v56   ;;  %v936_v43 = vpop.permute.xlu1 %935 }
 0x32c   : > { %v1243_v24 = vld [vmem:[#allocation3 + $0x60] sm:$0xff]  ;;  %v1005_v0 = vmul.f32 0.0, %v936_v43 }
 0x32d   : > { %v1246_v60 = vld [vmem:[#allocation3 + $0x78] sm:$0xff] }
 0x32e   : > { %v2139_v13 = vpop.eup %2138  ;;  %v926_v38 = vpop.permute.xlu0 %925 }
 0x32f   : > { %1300 = vperm.xlu0 %2058, %v2137_v40   ;;  %v2141_v45 = vpop.eup %2140  ;;  %v941_v17 = vpop.permute.xlu1 %940  ;;  %v1003_v47 = vmul.f32 0.0, %v926_v38 }
 0x330   : > { %v1245_v37 = vld [vmem:[#allocation3 + $0x70] sm:$0xff]  ;;  %v1006_v8 = vmul.f32 0.0, %v941_v17 }
 0x331   : > { %2146 = vrcp.f32 %v1245_v37 }
 0x332   : > { %2148 = vrcp.f32 %v1241_v42  ;;  %v2143_v48 = vpop.eup %2142 }
 0x333   : > { %1295 = vperm.xlu0 %2058, %v2139_v13   ;;  %2150 = vrcp.f32 %v1243_v24  ;;  %v2145_v55 = vpop.eup %2144  ;;  %v946_v9 = vpop.permute.xlu1 %945 }
 0x334   : > { %2152 = vrcp.f32 %v1244_v18  ;;  %v1007_v26 = vmul.f32 0.0, %v946_v9 }
 0x335   : > { %2154 = vrcp.f32 %v1246_v60  ;;  %v1895_v58 = vpop.f32.mrf.mxu1 }
 0x336   : > { %v1165_v31 = vadd.f32 %v1895_v58, %v1004_v61 }
 0x337   : > { %1310 = vperm.xlu0 %2058, %v2141_v45   ;;  %v951_v33 = vpop.permute.xlu1 %950  ;;  %v1085_v44 = vpop.f32.mrf.mxu1 }
 0x338   : > { %v1164_v5 = vadd.f32 %v1085_v44, %v1003_v47  ;;  %v1008_v35 = vmul.f32 0.0, %v951_v33 }
 0x33b   : > { %1305 = vperm.xlu0 %2058, %v2143_v48   ;;  %v956_v54 = vpop.permute.xlu1 %955 }
 0x33c   : > { %v1009_v56 = vmul.f32 0.0, %v956_v54 }
 0x33e   : > { %v2147_v51 = vpop.eup %2146  ;;  %v1898_v50 = vpop.f32.mrf.mxu1 }
 0x33f   : > { %1335 = vperm.xlu1 %2059, %v2147_v51   ;;  %1320 = vperm.xlu0 %2058, %v2145_v55   ;;  %v2149_v2 = vpop.eup %2148  ;;  %v961_v7 = vpop.permute.xlu1 %960  ;;  %v1167_v63 = vadd.f32 %v1898_v50, %v1006_v8 }
 0x340   : > { %v2151_v3 = vpop.eup %2150  ;;  %v1095_v11 = vpop.f32.mrf.mxu1  ;;  %v1010_v34 = vmul.f32 0.0, %v961_v7 }
 0x341   : > { %v2153_v10 = vpop.eup %2152  ;;  %v1166_v53 = vadd.f32 %v1095_v11, %v1005_v0 }
 0x342   : > { %v2155_v12 = vpop.eup %2154 }
 0x343   : > { %1315 = vperm.xlu0 %2058, %v2149_v2   ;;  %v966_v59 = vpop.permute.xlu1 %965 }
 0x344   : > { %v1011_v55 = vmul.f32 0.0, %v966_v59 }
 0x346   : > { %v1901_v62 = vpop.f32.mrf.mxu1 }
 0x347   : > { %1325 = vperm.xlu0 %2058, %v2151_v3   ;;  %v971_v22 = vpop.permute.xlu1 %970  ;;  %v1169_v30 = vadd.f32 %v1901_v62, %v1008_v35 }
 0x348   : > { %v1105_v20 = vpop.f32.mrf.mxu1  ;;  %v1012_v60 = vmul.f32 0.0, %v971_v22 }
 0x349   : > { %v1168_v57 = vadd.f32 %v1105_v20, %v1007_v26 }
 0x34b   : > { %1330 = vperm.xlu0 %2058, %v2153_v10   ;;  %v976_v32 = vpop.permute.xlu1 %975 }
 0x34c   : > { %v1013_v33 = vmul.f32 0.0, %v976_v32 }
 0x34e   : > { %v1904_v1 = vpop.f32.mrf.mxu1 }
 0x34f   : > { %1340 = vperm.xlu0 %2058, %v2155_v12   ;;  %v981_v27 = vpop.permute.xlu1 %980  ;;  %v1171_v37 = vadd.f32 %v1904_v1, %v1010_v34 }
 0x350   : > { %v1115_v41 = vpop.f32.mrf.mxu1  ;;  %v1014_v38 = vmul.f32 0.0, %v981_v27 }
 0x351   : > { %v1170_v40 = vadd.f32 %v1115_v41, %v1009_v56 }
 0x352   : > { %v1907_v21 = vpop.f32.mrf.mxu1 }
 0x353   : > { %v986_v42 = vpop.permute.xlu1 %985  ;;  %v1173_v10 = vadd.f32 %v1907_v21, %v1012_v60 }
 0x354   : > { %v1125_v28 = vpop.f32.mrf.mxu1  ;;  %v1015_v47 = vmul.f32 0.0, %v986_v42 }
 0x355   : > { %v1172_v2 = vadd.f32 %v1125_v28, %v1011_v55 }
 0x356   : > { %v1910_v45 = vpop.f32.mrf.mxu1 }
 0x357   : > { %v991_v3 = vpop.permute.xlu1 %990  ;;  %v1175_v7 = vadd.f32 %v1910_v45, %v1014_v38 }
 0x358   : > { %v1135_v51 = vpop.f32.mrf.mxu1  ;;  %v1016_v59 = vmul.f32 0.0, %v991_v3 }
 0x359   : > { %v1174_v44 = vadd.f32 %v1135_v51, %v1013_v33 }
 0x35a   : > { %v1913_v4 = vpop.f32.mrf.mxu1 }
 0x35b   : > { %v996_v54 = vpop.permute.xlu1 %995 }
 0x35c   : > { %v1145_v58 = vpop.f32.mrf.mxu1  ;;  %v1017_v62 = vmul.f32 0.0, %v996_v54 }
 0x35e   : > { %v1916_v50 = vpop.f32.mrf.mxu1 }
 0x392   : > { %v1271_v14 = vpop.permute.xlu0 %1270 }
 0x393   : > { %v1344_v29 = vmul.f32 %v1271_v14, %v1165_v31  ;;  %v1176_v31 = vadd.f32 %v1145_v58, %v1015_v47 }
 0x396   : > { %v1266_v52 = vpop.permute.xlu0 %1265 }
 0x397   : > { %v1343_v19 = vmul.f32 %v1266_v52, %v1164_v5  ;;  %v1001_v52 = vpop.permute.xlu1 %1000 }
 0x398   : > { %v1018_v0 = vmul.f32 0.0, %v1001_v52 }
 0x399   : > { %1949 = vmatprep.mubr.f32.mxu1 %v1343_v19  ;;  %v1155_v19 = vpop.f32.mrf.mxu1 }
 0x39a   : > { %1950 = vmatmul.mubr.f32.vlgmr.msra.gmra.mxu1 %v1344_v29  ;;  %v1281_v15 = vpop.permute.xlu0 %1280 }
 0x39b   : > { %v1346_v25 = vmul.f32 %v1281_v15, %v1167_v63  ;;  %v1177_v15 = vadd.f32 %v1913_v4, %v1016_v59 }
 0x39e   : > { %v1276_v49 = vpop.permute.xlu0 %1275 }
 0x39f   : > { %v1345_v6 = vmul.f32 %v1276_v49, %v1166_v53  ;;  %v1178_v53 = vadd.f32 %v1155_v19, %v1017_v62  ;;  %v1179_v49 = vadd.f32 %v1916_v50, %v1018_v0 }
 0x3a1   : > { %1952 = vmatprep.mubr.f32.mxu1 %v1345_v6 }
 0x3a2   : > { %1953 = vmatmul.mubr.f32.gmra.mxu1 %v1346_v25  ;;  %v1291_v16 = vpop.permute.xlu0 %1290  ;;  %v1700_v25 = vld [vmem:[%s3055_s3] ss:$0 sm:$0xff] }
 0x3a3   : > { %v1348_v46 = vmul.f32 %v1291_v16, %v1169_v30 }
 0x3a6   : > { %v1286_v36 = vpop.permute.xlu0 %1285 }
 0x3a7   : > { %v1347_v23 = vmul.f32 %v1286_v36, %v1168_v57 }
 0x3a9   : > { %1955 = vmatprep.mubr.f32.mxu1 %v1347_v23 }
 0x3aa   : > { %1956 = vmatmul.mubr.f32.gmra.mxu1 %v1348_v46  ;;  %v1301_v39 = vpop.permute.xlu0 %1300 }
 0x3ab   : > { %v1350_v48 = vmul.f32 %v1301_v39, %v1171_v37 }
 0x3ae   : > { %v1296_v13 = vpop.permute.xlu0 %1295 }
 0x3af   : > { %v1349_v24 = vmul.f32 %v1296_v13, %v1170_v40 }
 0x3b1   : > { %1958 = vmatprep.mubr.f32.mxu1 %v1349_v24 }
 0x3b2   : > { %1959 = vmatmul.mubr.f32.gmra.mxu1 %v1350_v48  ;;  %v1311_v18 = vpop.permute.xlu0 %1310 }
 0x3b3   : > { %v1352_v17 = vmul.f32 %v1311_v18, %v1173_v10 }
 0x3b6   : > { %v1306_v12 = vpop.permute.xlu0 %1305 }
 0x3b7   : > { %v1351_v43 = vmul.f32 %v1306_v12, %v1172_v2 }
 0x3b9   : > { %1961 = vmatprep.mubr.f32.mxu1 %v1351_v43 }
 0x3ba   : > { %1962 = vmatmul.mubr.f32.gmra.mxu1 %v1352_v17  ;;  %v1321_v9 = vpop.permute.xlu0 %1320  ;;  %v1336_v8 = vpop.permute.xlu1 %1335 }
 0x3bb   : > { %v1354_v5 = vmul.f32 %v1321_v9, %v1175_v7  ;;  %v1357_v63 = vmul.f32 %v1336_v8, %v1178_v53 }
 0x3be   : > { %v1316_v14 = vpop.permute.xlu0 %1315 }
 0x3bf   : > { %v1353_v61 = vmul.f32 %v1316_v14, %v1174_v44 }
 0x3c1   : > { %1964 = vmatprep.mubr.f32.mxu1 %v1353_v61 }
 0x3c2   : > { %1965 = vmatmul.mubr.f32.gmra.mxu1 %v1354_v5  ;;  %v1326_v11 = vpop.permute.xlu0 %1325 }
 0x3c3   : > { %v1355_v29 = vmul.f32 %v1326_v11, %v1176_v31 }
 0x3c5   : > { %1967 = vmatprep.mubr.f32.mxu1 %v1355_v29 }
 0x3c6   : > { %v1331_v22 = vpop.permute.xlu0 %1330 }
 0x3c7   : > { %v1356_v20 = vmul.f32 %v1331_v22, %v1177_v15 }
 0x3c9   : > { %1968 = vmatmul.mubr.f32.gmra.mxu1 %v1356_v20 }
 0x3ca   : > { %1970 = vmatprep.mubr.f32.mxu1 %v1357_v63  ;;  %v1341_v1 = vpop.permute.xlu0 %1340 }
 0x3cb   : > { %v1358_v6 = vmul.f32 %v1341_v1, %v1179_v49 }
 0x3cd   : > { %1971 = vmatmul.mubr.f32.gmra.mxu1 %v1358_v6 }
 0x45a   : > { %v1951_v16 = vpop.f32.mrf.mxu1 }
 0x45b   : > { %v1454_v26 = vadd.f32 %v1951_v16, %v1700_v25 }
 0x45c   : > { %v1448_v32 = vpop.f32.mrf.mxu1 }
 0x45d   : > { %1528 = vst [vmem:[%s2979_s9 + $0x8] sm:$0xff] %v1454_v26  ;;  %v1449_v41 = vadd.f32 %v1700_v25, %v1448_v32 }
 0x45f   : > { %1527 = vst [vmem:[%s2979_s9] sm:$0xff] %v1449_v41 }
 0x462   : > { %v1954_v35 = vpop.f32.mrf.mxu1 }
 0x463   : > { %v1464_v57 = vadd.f32 %v1954_v35, %v1700_v25 }
 0x464   : > { %v1458_v30 = vpop.f32.mrf.mxu1 }
 0x465   : > { %1530 = vst [vmem:[%s2979_s9 + $0x18] sm:$0xff] %v1464_v57  ;;  %v1459_v36 = vadd.f32 %v1700_v25, %v1458_v30 }
 0x467   : > { %1529 = vst [vmem:[%s2979_s9 + $0x10] sm:$0xff] %v1459_v36 }
 0x46a   : > { %v1957_v21 = vpop.f32.mrf.mxu1 }
 0x46b   : > { %v1474_v23 = vadd.f32 %v1957_v21, %v1700_v25 }
 0x46c   : > { %v1468_v46 = vpop.f32.mrf.mxu1 }
 0x46d   : > { %1532 = vst [vmem:[%s2979_s9 + $0x28] sm:$0xff] %v1474_v23  ;;  %v1469_v27 = vadd.f32 %v1700_v25, %v1468_v46 }
 0x46f   : > { %1531 = vst [vmem:[%s2979_s9 + $0x20] sm:$0xff] %v1469_v27 }
 0x472   : > { %v1960_v39 = vpop.f32.mrf.mxu1 }
 0x473   : > { %v1484_v56 = vadd.f32 %v1960_v39, %v1700_v25 }
 0x474   : > { %v1478_v28 = vpop.f32.mrf.mxu1 }
 0x475   : > { %1534 = vst [vmem:[%s2979_s9 + $0x38] sm:$0xff] %v1484_v56  ;;  %v1479_v34 = vadd.f32 %v1700_v25, %v1478_v28 }
 0x477   : > { %1533 = vst [vmem:[%s2979_s9 + $0x30] sm:$0xff] %v1479_v34 }
 0x47a   : > { %v1963_v40 = vpop.f32.mrf.mxu1 }
 0x47b   : > { %v1494_v37 = vadd.f32 %v1963_v40, %v1700_v25 }
 0x47c   : > { %v1488_v13 = vpop.f32.mrf.mxu1 }
 0x47d   : > { %1536 = vst [vmem:[%s2979_s9 + $0x48] sm:$0xff] %v1494_v37  ;;  %v1489_v42 = vadd.f32 %v1700_v25, %v1488_v13 }
 0x47f   : > { %1535 = vst [vmem:[%s2979_s9 + $0x40] sm:$0xff] %v1489_v42 }
 0x482   : > { %v1966_v45 = vpop.f32.mrf.mxu1 }
 0x483   : > { %v1504_v24 = vadd.f32 %v1966_v45, %v1700_v25 }
 0x484   : > { %v1498_v48 = vpop.f32.mrf.mxu1 }
 0x485   : > { %1538 = vst [vmem:[%s2979_s9 + $0x58] sm:$0xff] %v1504_v24  ;;  %v1499_v18 = vadd.f32 %v1700_v25, %v1498_v48 }
 0x487   : > { %1537 = vst [vmem:[%s2979_s9 + $0x50] sm:$0xff] %v1499_v18 }
 0x489   : > { %v1969_v55 = vpop.f32.mrf.mxu1 }
 0x48a   : > { %v1514_v51 = vadd.f32 %v1969_v55, %v1700_v25 }
 0x48b   : > { %v1508_v60 = vpop.f32.mrf.mxu1 }
 0x48c   : > { %1540 = vst [vmem:[%s2979_s9 + $0x68] sm:$0xff] %v1514_v51  ;;  %v1509_v2 = vadd.f32 %v1700_v25, %v1508_v60 }
 0x48d   : > { %v1972_v3 = vpop.f32.mrf.mxu1 }
 0x48e   : > { %1539 = vst [vmem:[%s2979_s9 + $0x60] sm:$0xff] %v1509_v2  ;;  %v1524_v10 = vadd.f32 %v1972_v3, %v1700_v25 }
 0x48f   : > { %v1518_v12 = vpop.f32.mrf.mxu1 }
 0x490   : > { %1542 = vst [vmem:[%s2979_s9 + $0x78] sm:$0xff] %v1524_v10  ;;  %v1519_v4 = vadd.f32 %v1700_v25, %v1518_v12 }
 0x492   : > { %1541 = vst [vmem:[%s2979_s9 + $0x70] sm:$0xff] %v1519_v4 }
 0x493   : > { %2251 = shalt.err (!%p2248_p11)
}
 0x494   : > { %s2252_s30 = scalar_lea.hbm %s3000_s14, 2048  ;;  %s2256_s25 = scalar_lea.hbm %s3056_s4, 4096 }
 0x495   : > { %p2253_p2 = scmp.ne.s32.totalorder %s3000_s14, %s2252_s30  ;;  %p2257_p12 = scmp.lt.s32.totalorder %s3000_s14, %s3056_s4 }
 0x496   : > { %p2258_p13 = scmp.lt.s32.totalorder %s2256_s25, %s2252_s30 }
 0x497   : > { %p2254_p6 = pnand %p2253_p2, %p2450_p0 }
 0x498   : > { %p2259_p3 = por %p2258_p13, %p2257_p12 }
 0x499   : > { %p2255_p9 = pneg %p2254_p6 }
 0x49b   : > { %p2260_p1 = pnand %p2259_p3, %p2255_p9 }
 0x49d   : > { %2263 = shalt.err (!%p2260_p1)
}
 0x49e   : > { %s2337_s21 = smov 128   ;;  %s2338_s23 = smov 8  }
 0x49f   : > { %1981 = dma.vmem_to_hbm [thread:$0]  (%p2450_p0), %s3002_s2, 2048, %s3000_s14, %s1544_s26, %s2337_s21, %s2337_s21, %s2338_s23  }
 0x4a0 PF: > { %s1574_s9 = sand.u32 1, %s2306_s15   ;;  %p3090_p4 = scmp.ne.s32.totalorder %s3066_s24, 0 }
 0x4a1   : > { %p3091_p8 = scmp.ge.s32.totalorder %s2326_s20, 2  ;;  %s1575_s7 = scalar_lea.sflag [#allocation7], %s1574_s9 }
 0x4a3   : > { %p1995_p10 = pnand %p3091_p8, %p3090_p4 }
 0x4a5   : > { %p1996_p5 = pneg %p1995_p10 }
 0x4a7   : > { %2301 = dma.done.wait (%p1996_p5), %s1575_s7, 2048  }
 0x4a8   : > { %2303 = vsyncadd (%p1996_p5), %s1575_s7, 4294965248  ;;  %s23_s20 = sadd.s32 1, %s2326_s20   ;;  %s3092_s18 = sld [smem:[#allocation16_spill]] }
 0x4a9   : > { %p20_p7 = scmp.ge.s32.totalorder %s23_s20, 4   ;;  %s3093_s19 = sld [smem:[#allocation17_spill]] }
 0x4aa   : > { %s3094_s15 = smov %s2310_s16  ;;  %s3095_s16 = smov %s2314_s17 }
 0x4ab   : > { %s3096_s17 = smov %s2459_s22  ;;  %22 = sbr.rel (!%p20_p7) target bundleno = 10 (0xa), region = 106 }
 0x4b0   :  { %1580 = vsyncpa [#allocation6], 1 }
 0x4b1   :  { %1582 = vsyncpa [#allocation6 + $0x1], 1 }
 0x4b2   :  { %1583 = vsyncpa [#allocation9], 1 }
 0x4b3   :  { %1585 = vsyncpa [#allocation9 + $0x1], 1 }
 0x4b4   :  { %1586 = vsyncpa [#allocation7], 1 }
 0x4b5   :  { %1588 = vsyncpa [#allocation7 + $0x1], 1 }

</bundles_post_ra>
